<compile_context>
chip_gen: v7x
topology: tpu7x:2x2x1
jax: 0.10.0
libtpu: 0.0.40
codegen_flags: <defaults>
</compile_context>

<pallas_src>
import math
import functools

import jax
import jax.numpy as jnp
from jax.experimental import pallas as pl
from jax.experimental.pallas import tpu as pltpu


# ----------------------------------------------------------------------------- kernel

def decoder_kernel(trg_ref, src_ref, tmask_ref, cmask_ref,
                   ft_w, ft_b,
                   sa_wqkv, sa_bqkv, sa_wf, sa_bf,
                   ea_wq, ea_bq, ea_wkv, ea_bkv, ea_wf, ea_bf,
                   pf_w1, pf_b1, pf_w2, pf_b2,
                   ln1_g, ln1_b, ln2_g, ln2_b, ln3_g, ln3_b,
                   o_w1, o_b1, o_w2, o_b2, o_w3, o_b3, o_w4, o_b4,
                   out_ref, x_scr, *, n_heads, eps):
    f32, bf16 = jnp.float32, jnp.bfloat16
    layer = pl.program_id(1)

    T, H = x_scr.shape
    S = src_ref.shape[1]
    hd = H // n_heads
    inv_scale = 1.0 / math.sqrt(hd)

    tmask = tmask_ref[0]                           # [T, 1] (1 = keep, 0 = mask)
    cmask = cmask_ref[0]                           # [1, S]
    # Hoisted additive mask biases (0 = keep, -1e10 = masked) — built once per grid
    # step, never re-broadcast per head or per attention.
    self_bias = (tmask - 1.0) * 1e10               # [T, 1] -> masks query rows
    cross_bias = (cmask - 1.0) * 1e10              # [1, S] -> masks key columns
    src_bf = src_ref[0].astype(bf16)               # cast once, reused by cross-attn K/V

    def mm(a_bf, w_bf):
        # bf16 MXU operands, f32 accumulation
        return jnp.dot(a_bf, w_bf, preferred_element_type=f32)

    def mm_nt(a_bf, b_bf):
        # contract last dims of both operands (a @ b.T) without an explicit transpose
        return jax.lax.dot_general(a_bf, b_bf, (((1,), (1,)), ((), ())),
                                   preferred_element_type=f32)

    def layer_norm(x, gamma, beta):
        # torch reference semantics: mean / unbiased std (N-1), divide by (std + eps)
        mean = jnp.mean(x, axis=-1, keepdims=True)
        var = jnp.sum((x - mean) ** 2, axis=-1, keepdims=True) * (1.0 / (H - 1))
        return gamma * ((x - mean) / (jnp.sqrt(var) + eps)) + beta

    def softmax(e):
        m = jnp.max(e, axis=-1, keepdims=True)
        p = jnp.exp(e - m)
        return p * pl.reciprocal(jnp.sum(p, axis=-1, keepdims=True), approx=True)

    def multi_head(q_all, kv_all, bias, wf, b_out, k_off, v_off):
        # q_all / kv_all: outputs of the fused projections (bf16). Each head is a
        # 2-D MXU matmul; its context is folded back through the matching slice of
        # the output projection and accumulated -> no lane-dim concatenate.
        attn = jnp.zeros((T, H), dtype=f32)
        for h in range(n_heads):
            qh = q_all[:, h * hd:(h + 1) * hd]
            kh = kv_all[:, k_off + h * hd:k_off + (h + 1) * hd]
            vh = kv_all[:, v_off + h * hd:v_off + (h + 1) * hd]
            e = mm_nt(qh, kh) * inv_scale + bias          # [T, kv_len] f32
            p = softmax(e).astype(bf16)
            ctx = mm(p, vh).astype(bf16)                  # [T, hd]
            attn = attn + mm(ctx, wf[h * hd:(h + 1) * hd, :])
        return attn + b_out

    # ---- first layer step: apply `ft` linear and seed the carried activation ----
    @pl.when(layer == 0)
    def _():
        x_scr[...] = mm(trg_ref[0].astype(bf16), ft_w[...]) + ft_b[...]

    x = x_scr[...]                                                    # [T, H] f32

    # ---- self attention (fused QKV: one [H,3H] matmul, one bf16 cast) ----
    qkv = (mm(x.astype(bf16), sa_wqkv[0]) + sa_bqkv[0]).astype(bf16)  # [T, 3H]
    sa = multi_head(qkv, qkv, self_bias, sa_wf[0], sa_bf[0], k_off=H, v_off=2 * H)
    x = layer_norm(x + sa, ln1_g[0], ln1_b[0])

    # ---- cross attention (Q from x, fused KV over src: one [H,2H] matmul) ----
    q = (mm(x.astype(bf16), ea_wq[0]) + ea_bq[0]).astype(bf16)        # [T, H]
    kv = (mm(src_bf, ea_wkv[0]) + ea_bkv[0]).astype(bf16)             # [S, 2H]
    ea = multi_head(q, kv, cross_bias, ea_wf[0], ea_bf[0], k_off=0, v_off=H)
    x = layer_norm(x + ea, ln2_g[0], ln2_b[0])

    # ---- position-wise FFN (Conv1d with kernel 1 == per-token Linear), ReLU ----
    h1 = jnp.maximum(mm(x.astype(bf16), pf_w1[0]) + pf_b1[0], 0.0)
    ff = mm(h1.astype(bf16), pf_w2[0]) + pf_b2[0]
    x = layer_norm(x + ff, ln3_g[0], ln3_b[0])

    x_scr[...] = x                                  # carry to the next layer step

    # ---- last layer step: masked mean pool + MLP head (H->256->64->32->1) ----
    @pl.when(layer == pl.num_programs(1) - 1)
    def _():
        num = jnp.sum(x * tmask, axis=0, keepdims=True)               # [1, H]
        den = jnp.sum(tmask, axis=0, keepdims=True)                   # [1, 1]
        pooled = (num / den).astype(bf16)
        h = jnp.maximum(mm(pooled, o_w1[...]) + o_b1[...], 0.0).astype(bf16)
        h = jnp.maximum(mm(h, o_w2[...]) + o_b2[...], 0.0).astype(bf16)
        h = jnp.maximum(mm(h, o_w3[...]) + o_b3[...], 0.0).astype(bf16)
        out = mm(h, o_w4[...]) + o_b4[...]          # [1, 128]; column 0 = real output
        out_ref[...] = out.reshape(1, 1, 128)       # lane-dense (unmasked) store


# ----------------------------------------------------------------------------- specs

def _batch_spec(shape):
    nd = len(shape)
    return pl.BlockSpec((1,) + tuple(shape[1:]),
                        lambda b, l, _n=nd: (b,) + (0,) * (_n - 1))


def _layer_spec(shape):
    nd = len(shape)
    return pl.BlockSpec((1,) + tuple(shape[1:]),
                        lambda b, l, _n=nd: (l,) + (0,) * (_n - 1))


def _const_spec(shape):
    nd = len(shape)
    return pl.BlockSpec(tuple(shape), lambda b, l, _n=nd: (0,) * _n)


# ----------------------------------------------------------------------------- wrapper

def decoder_forward(params, trg, src, trg_mask, cross_attn_mask, *, n_heads, n_layers):
    """trg: [B,T,H], src: [B,S,H], trg_mask: [B,1,T,1], cross_attn_mask: [B,1,1,S]."""
    B, T, H = trg.shape

    # rank-3 per-sample mask vectors; the additive [T,S] biases are built in-kernel
    tmask = trg_mask[:, 0, :, :].astype(jnp.float32)              # [B, T, 1]
    cmask = cross_attn_mask[:, 0, :, :].astype(jnp.float32)       # [B, 1, S]
    data = (trg.astype(jnp.float32), src.astype(jnp.float32), tmask, cmask)

    params = tuple(params)
    n_front, n_stacked = 2, 20                     # (ft_w, ft_b) | per-layer stacked
    front = params[:n_front]
    stacked = params[n_front:n_front + n_stacked]
    head = params[n_front + n_stacked:]

    in_specs = ([_batch_spec(a.shape) for a in data]
                + [_const_spec(a.shape) for a in front]
                + [_layer_spec(a.shape) for a in stacked]
                + [_const_spec(a.shape) for a in head])

    kernel = functools.partial(decoder_kernel, n_heads=n_heads, eps=1e-12)

    out = pl.pallas_call(
        kernel,
        out_shape=jax.ShapeDtypeStruct((B, 1, 128), jnp.float32),
        grid=(B, n_layers),
        in_specs=in_specs,
        out_specs=pl.BlockSpec((1, 1, 128), lambda b, l: (b, 0, 0)),
        scratch_shapes=[pltpu.VMEM((T, H), jnp.float32)],          # carried activation
        compiler_params=pltpu.CompilerParams(
            dimension_semantics=("parallel", "arbitrary"),
            vmem_limit_bytes=64 * 1024 * 1024),                    # explicit VMEM cap
    )(*data, *params)
    return out[:, :, :1]                                           # [B, 1, 1]


# ----------------------------------------------------------------------------- params

def init_params(key, hid_dim, pf_dim, n_layers):
    """Flat tuple of params in the exact order the kernel unpacks them.
    Weight matrices are bf16 (MXU operands); biases / LayerNorm params are f32.
    Q|K|V (self) and K|V (cross) weights are fused at init time."""
    wdt = jnp.bfloat16
    H, PF = hid_dim, pf_dim

    def dense(k, fi, fo):
        k1, k2 = jax.random.split(k)
        w = (jax.random.normal(k1, (fi, fo), jnp.float32) / math.sqrt(fi)).astype(wdt)
        b = 0.01 * jax.random.normal(k2, (1, fo), jnp.float32)
        return w, b

    keys = jax.random.split(key, 3)
    ft_w, ft_b = dense(keys[0], H, H)

    lkeys = jax.random.split(keys[1], n_layers)
    per_layer = []
    for li in range(n_layers):
        ks = jax.random.split(lkeys[li], 10)
        wq, bq = dense(ks[0], H, H)
        wk, bk = dense(ks[1], H, H)
        wv, bv = dense(ks[2], H, H)
        sa_wqkv = jnp.concatenate([wq, wk, wv], axis=1)            # [H, 3H]
        sa_bqkv = jnp.concatenate([bq, bk, bv], axis=1)            # [1, 3H]
        sa_wf, sa_bf = dense(ks[3], H, H)

        ea_wq, ea_bq = dense(ks[4], H, H)
        wk2, bk2 = dense(ks[5], H, H)
        wv2, bv2 = dense(ks[6], H, H)
        ea_wkv = jnp.concatenate([wk2, wv2], axis=1)               # [H, 2H]
        ea_bkv = jnp.concatenate([bk2, bv2], axis=1)
        ea_wf, ea_bf = dense(ks[7], H, H)

        pf_w1, pf_b1 = dense(ks[8], H, PF)
        pf_w2, pf_b2 = dense(ks[9], PF, H)
        gamma = jnp.ones((1, H), jnp.float32)
        beta = jnp.zeros((1, H), jnp.float32)

        per_layer.append([sa_wqkv, sa_bqkv, sa_wf, sa_bf,
                          ea_wq, ea_bq, ea_wkv, ea_bkv, ea_wf, ea_bf,
                          pf_w1, pf_b1, pf_w2, pf_b2,
                          gamma, beta, gamma, beta, gamma, beta])   # ln1, ln2, ln3

    # stack each of the 20 per-layer tensors along a leading layer axis
    stacked = [jnp.stack([per_layer[li][j] for li in range(n_layers)], axis=0)
               for j in range(20)]

    okeys = jax.random.split(keys[2], 4)
    o_w1, o_b1 = dense(okeys[0], H, 256)
    o_w2, o_b2 = dense(okeys[1], 256, 64)
    o_w3, o_b3 = dense(okeys[2], 64, 32)
    w4, b4 = dense(okeys[3], 32, 1)
    # lane-pad the final 32->1 linear to 128 output columns (cols 1..127 are zero)
    o_w4 = jnp.zeros((32, 128), wdt).at[:, :1].set(w4)
    o_b4 = jnp.zeros((1, 128), jnp.float32).at[:, :1].set(b4)

    return (ft_w, ft_b, *stacked, o_w1, o_b1, o_w2, o_b2, o_w3, o_b3, o_w4, o_b4)


# ----------------------------------------------------------------------------- main

if __name__ == "__main__":
    B, T, S, H, NH, PF, NL = 2, 8, 8, 32, 4, 64, 2

    key = jax.random.PRNGKey(0)
    k_trg, k_src, k_p = jax.random.split(key, 3)

    trg = jax.random.normal(k_trg, (B, T, H), jnp.float32)
    src = jax.random.normal(k_src, (B, S, H), jnp.float32)
    trg_mask = jnp.ones((B, 1, T, 1), jnp.float32).at[1, 0, 6:, 0].set(0.0)
    cross_attn_mask = jnp.ones((B, 1, 1, S), jnp.float32).at[1, 0, 0, 5:].set(0.0)

    params = init_params(k_p, H, PF, NL)

    # NOTE: dropout layers are identity (inference mode).
    out = decoder_forward(params, trg, src, trg_mask, cross_attn_mask,
                          n_heads=NH, n_layers=NL)
    out = jax.block_until_ready(out)
    assert out.shape == (B, 1, 1) and bool(jnp.all(jnp.isfinite(out)))
    print("KERNEL_OK")
</pallas_src>

<mosaic_0001>
module attributes {stable_mosaic.version = 11 : i64} {
  func.func @decoder_kernel(%arg0: i32, %arg1: i32, %arg2: memref<1x8x32xf32, #tpu.memory_space<vmem>>, %arg3: memref<1x8x32xf32, #tpu.memory_space<vmem>>, %arg4: memref<1x8x1xf32, #tpu.memory_space<vmem>>, %arg5: memref<1x1x8xf32, #tpu.memory_space<vmem>>, %arg6: memref<32x32xbf16, #tpu.memory_space<vmem>>, %arg7: memref<1x32xf32, #tpu.memory_space<vmem>>, %arg8: memref<1x32x96xbf16, #tpu.memory_space<vmem>>, %arg9: memref<1x1x96xf32, #tpu.memory_space<vmem>>, %arg10: memref<1x32x32xbf16, #tpu.memory_space<vmem>>, %arg11: memref<1x1x32xf32, #tpu.memory_space<vmem>>, %arg12: memref<1x32x32xbf16, #tpu.memory_space<vmem>>, %arg13: memref<1x1x32xf32, #tpu.memory_space<vmem>>, %arg14: memref<1x32x64xbf16, #tpu.memory_space<vmem>>, %arg15: memref<1x1x64xf32, #tpu.memory_space<vmem>>, %arg16: memref<1x32x32xbf16, #tpu.memory_space<vmem>>, %arg17: memref<1x1x32xf32, #tpu.memory_space<vmem>>, %arg18: memref<1x32x64xbf16, #tpu.memory_space<vmem>>, %arg19: memref<1x1x64xf32, #tpu.memory_space<vmem>>, %arg20: memref<1x64x32xbf16, #tpu.memory_space<vmem>>, %arg21: memref<1x1x32xf32, #tpu.memory_space<vmem>>, %arg22: memref<1x1x32xf32, #tpu.memory_space<vmem>>, %arg23: memref<1x1x32xf32, #tpu.memory_space<vmem>>, %arg24: memref<1x1x32xf32, #tpu.memory_space<vmem>>, %arg25: memref<1x1x32xf32, #tpu.memory_space<vmem>>, %arg26: memref<1x1x32xf32, #tpu.memory_space<vmem>>, %arg27: memref<1x1x32xf32, #tpu.memory_space<vmem>>, %arg28: memref<32x256xbf16, #tpu.memory_space<vmem>>, %arg29: memref<1x256xf32, #tpu.memory_space<vmem>>, %arg30: memref<256x64xbf16, #tpu.memory_space<vmem>>, %arg31: memref<1x64xf32, #tpu.memory_space<vmem>>, %arg32: memref<64x32xbf16, #tpu.memory_space<vmem>>, %arg33: memref<1x32xf32, #tpu.memory_space<vmem>>, %arg34: memref<32x128xbf16, #tpu.memory_space<vmem>>, %arg35: memref<1x128xf32, #tpu.memory_space<vmem>>, %arg36: memref<1x1x128xf32, #tpu.memory_space<vmem>>, %arg37: memref<8x32xf32, #tpu.memory_space<vmem>>) attributes {dimension_semantics = [#tpu.dimension_semantics<parallel>, #tpu.dimension_semantics<arbitrary>], iteration_bounds = array<i64: 2, 2>, scalar_prefetch = 0 : i64, scratch_operands = 1 : i64, tpu.core_type = #tpu.core_type<tc>, window_params = [{transform_indices = @transform_0, window_bounds = array<i64: 1, 8, 32>}, {transform_indices = @transform_1, window_bounds = array<i64: 1, 8, 32>}, {transform_indices = @transform_2, window_bounds = array<i64: 1, 8, 1>}, {transform_indices = @transform_3, window_bounds = array<i64: 1, 1, 8>}, {pipeline_mode = #tpu.pipeline_mode<synchronous>, transform_indices = @transform_4, window_bounds = array<i64: 32, 32>}, {pipeline_mode = #tpu.pipeline_mode<synchronous>, transform_indices = @transform_5, window_bounds = array<i64: 1, 32>}, {transform_indices = @transform_6, window_bounds = array<i64: 1, 32, 96>}, {transform_indices = @transform_7, window_bounds = array<i64: 1, 1, 96>}, {transform_indices = @transform_8, window_bounds = array<i64: 1, 32, 32>}, {transform_indices = @transform_9, window_bounds = array<i64: 1, 1, 32>}, {transform_indices = @transform_10, window_bounds = array<i64: 1, 32, 32>}, {transform_indices = @transform_11, window_bounds = array<i64: 1, 1, 32>}, {transform_indices = @transform_12, window_bounds = array<i64: 1, 32, 64>}, {transform_indices = @transform_13, window_bounds = array<i64: 1, 1, 64>}, {transform_indices = @transform_14, window_bounds = array<i64: 1, 32, 32>}, {transform_indices = @transform_15, window_bounds = array<i64: 1, 1, 32>}, {transform_indices = @transform_16, window_bounds = array<i64: 1, 32, 64>}, {transform_indices = @transform_17, window_bounds = array<i64: 1, 1, 64>}, {transform_indices = @transform_18, window_bounds = array<i64: 1, 64, 32>}, {transform_indices = @transform_19, window_bounds = array<i64: 1, 1, 32>}, {transform_indices = @transform_20, window_bounds = array<i64: 1, 1, 32>}, {transform_indices = @transform_21, window_bounds = array<i64: 1, 1, 32>}, {transform_indices = @transform_22, window_bounds = array<i64: 1, 1, 32>}, {transform_indices = @transform_23, window_bounds = array<i64: 1, 1, 32>}, {transform_indices = @transform_24, window_bounds = array<i64: 1, 1, 32>}, {transform_indices = @transform_25, window_bounds = array<i64: 1, 1, 32>}, {pipeline_mode = #tpu.pipeline_mode<synchronous>, transform_indices = @transform_26, window_bounds = array<i64: 32, 256>}, {pipeline_mode = #tpu.pipeline_mode<synchronous>, transform_indices = @transform_27, window_bounds = array<i64: 1, 256>}, {pipeline_mode = #tpu.pipeline_mode<synchronous>, transform_indices = @transform_28, window_bounds = array<i64: 256, 64>}, {pipeline_mode = #tpu.pipeline_mode<synchronous>, transform_indices = @transform_29, window_bounds = array<i64: 1, 64>}, {pipeline_mode = #tpu.pipeline_mode<synchronous>, transform_indices = @transform_30, window_bounds = array<i64: 64, 32>}, {pipeline_mode = #tpu.pipeline_mode<synchronous>, transform_indices = @transform_31, window_bounds = array<i64: 1, 32>}, {pipeline_mode = #tpu.pipeline_mode<synchronous>, transform_indices = @transform_32, window_bounds = array<i64: 32, 128>}, {pipeline_mode = #tpu.pipeline_mode<synchronous>, transform_indices = @transform_33, window_bounds = array<i64: 1, 128>}, {transform_indices = @transform_34, window_bounds = array<i64: 1, 1, 128>}]} {
    %c0 = arith.constant 0 : index
    %c0_0 = arith.constant 0 : index
    %c0_1 = arith.constant 0 : index
    %0 = vector.load %arg4[%c0, %c0_0, %c0_1] : memref<1x8x1xf32, #tpu.memory_space<vmem>>, vector<1x8x1xf32>
    %1 = vector.shape_cast %0 : vector<1x8x1xf32> to vector<8x1xf32>
    %c0_2 = arith.constant 0 : index
    %c0_3 = arith.constant 0 : index
    %c0_4 = arith.constant 0 : index
    %2 = vector.load %arg5[%c0_2, %c0_3, %c0_4] : memref<1x1x8xf32, #tpu.memory_space<vmem>>, vector<1x1x8xf32>
    %3 = vector.shape_cast %2 : vector<1x1x8xf32> to vector<1x8xf32>
    %cst = arith.constant 1.000000e+00 : f32
    %4 = vector.broadcast %cst : f32 to vector<8x1xf32>
    %5 = arith.subf %1, %4 : vector<8x1xf32>
    %cst_5 = arith.constant 1.000000e+10 : f32
    %6 = vector.broadcast %cst_5 : f32 to vector<8x1xf32>
    %7 = arith.mulf %5, %6 : vector<8x1xf32>
    %cst_6 = arith.constant 1.000000e+00 : f32
    %8 = vector.broadcast %cst_6 : f32 to vector<1x8xf32>
    %9 = arith.subf %3, %8 : vector<1x8xf32>
    %cst_7 = arith.constant 1.000000e+10 : f32
    %10 = vector.broadcast %cst_7 : f32 to vector<1x8xf32>
    %11 = arith.mulf %9, %10 : vector<1x8xf32>
    %c0_8 = arith.constant 0 : index
    %c0_9 = arith.constant 0 : index
    %c0_10 = arith.constant 0 : index
    %12 = vector.load %arg3[%c0_8, %c0_9, %c0_10] : memref<1x8x32xf32, #tpu.memory_space<vmem>>, vector<1x8x32xf32>
    %13 = vector.shape_cast %12 : vector<1x8x32xf32> to vector<8x32xf32>
    %14 = arith.truncf %13 : vector<8x32xf32> to vector<8x32xbf16>
    %c0_i32 = arith.constant 0 : i32
    %15 = arith.cmpi eq, %arg1, %c0_i32 : i32
    %16 = arith.extui %15 : i1 to i32
    %c0_i32_11 = arith.constant 0 : i32
    %17 = arith.cmpi ne, %16, %c0_i32_11 : i32
    scf.if %17 {
      %c0_148 = arith.constant 0 : index
      %c0_149 = arith.constant 0 : index
      %c0_150 = arith.constant 0 : index
      %354 = vector.load %arg2[%c0_148, %c0_149, %c0_150] : memref<1x8x32xf32, #tpu.memory_space<vmem>>, vector<1x8x32xf32>
      %355 = vector.shape_cast %354 : vector<1x8x32xf32> to vector<8x32xf32>
      %356 = arith.truncf %355 : vector<8x32xf32> to vector<8x32xbf16>
      %c0_151 = arith.constant 0 : index
      %c0_152 = arith.constant 0 : index
      %357 = vector.load %arg6[%c0_151, %c0_152] : memref<32x32xbf16, #tpu.memory_space<vmem>>, vector<32x32xbf16>
      %cst_153 = arith.constant dense<0.000000e+00> : vector<8x32xf32>
      %358 = tpu.matmul %356, %357, %cst_153 {dimension_numbers = #tpu.dot_dimension_numbers<[1], [0], [0], [1], [0, 0, 1, 1], [], []>} : vector<8x32xbf16>, vector<32x32xbf16>, vector<8x32xf32> -> vector<8x32xf32>
      %c0_154 = arith.constant 0 : index
      %c0_155 = arith.constant 0 : index
      %359 = vector.load %arg7[%c0_154, %c0_155] : memref<1x32xf32, #tpu.memory_space<vmem>>, vector<1x32xf32>
      %360 = vector.broadcast %359 : vector<1x32xf32> to vector<8x32xf32>
      %361 = arith.addf %358, %360 : vector<8x32xf32>
      %c0_156 = arith.constant 0 : index
      %c0_157 = arith.constant 0 : index
      %362 = vector.load %arg37[%c0_156, %c0_157] : memref<8x32xf32, #tpu.memory_space<vmem>>, vector<8x32xf32>
      tpu.vector_store %arg37[%c0_156, %c0_157], %361 {strides = array<i32>} : memref<8x32xf32, #tpu.memory_space<vmem>>, vector<8x32xf32>,
    } else {
    }
    %c0_12 = arith.constant 0 : index
    %c0_13 = arith.constant 0 : index
    %18 = vector.load %arg37[%c0_12, %c0_13] : memref<8x32xf32, #tpu.memory_space<vmem>>, vector<8x32xf32>
    %19 = arith.truncf %18 : vector<8x32xf32> to vector<8x32xbf16>
    %c0_14 = arith.constant 0 : index
    %c0_15 = arith.constant 0 : index
    %c0_16 = arith.constant 0 : index
    %20 = vector.load %arg8[%c0_14, %c0_15, %c0_16] : memref<1x32x96xbf16, #tpu.memory_space<vmem>>, vector<1x32x96xbf16>
    %21 = vector.shape_cast %20 : vector<1x32x96xbf16> to vector<32x96xbf16>
    %cst_17 = arith.constant dense<0.000000e+00> : vector<8x96xf32>
    %22 = tpu.matmul %19, %21, %cst_17 {dimension_numbers = #tpu.dot_dimension_numbers<[1], [0], [0], [1], [0, 0, 1, 1], [], []>} : vector<8x32xbf16>, vector<32x96xbf16>, vector<8x96xf32> -> vector<8x96xf32>
    %c0_18 = arith.constant 0 : index
    %c0_19 = arith.constant 0 : index
    %c0_20 = arith.constant 0 : index
    %23 = vector.load %arg9[%c0_18, %c0_19, %c0_20] : memref<1x1x96xf32, #tpu.memory_space<vmem>>, vector<1x1x96xf32>
    %24 = vector.shape_cast %23 : vector<1x1x96xf32> to vector<1x96xf32>
    %25 = vector.broadcast %24 : vector<1x96xf32> to vector<8x96xf32>
    %26 = arith.addf %22, %25 : vector<8x96xf32>
    %27 = arith.truncf %26 : vector<8x96xf32> to vector<8x96xbf16>
    %c0_21 = arith.constant 0 : index
    %c0_22 = arith.constant 0 : index
    %c0_23 = arith.constant 0 : index
    %28 = vector.load %arg10[%c0_21, %c0_22, %c0_23] : memref<1x32x32xbf16, #tpu.memory_space<vmem>>, vector<1x32x32xbf16>
    %29 = vector.shape_cast %28 : vector<1x32x32xbf16> to vector<32x32xbf16>
    %c0_24 = arith.constant 0 : index
    %c0_25 = arith.constant 0 : index
    %c0_26 = arith.constant 0 : index
    %30 = vector.load %arg11[%c0_24, %c0_25, %c0_26] : memref<1x1x32xf32, #tpu.memory_space<vmem>>, vector<1x1x32xf32>
    %31 = vector.shape_cast %30 : vector<1x1x32xf32> to vector<1x32xf32>
    %cst_27 = arith.constant 0.000000e+00 : f32
    %32 = vector.broadcast %cst_27 : f32 to vector<8x32xf32>
    %33 = vector.extract_strided_slice %27 {offsets = [0, 0], sizes = [8, 8], strides = [1, 1]} : vector<8x96xbf16> to vector<8x8xbf16>
    %34 = vector.extract_strided_slice %27 {offsets = [0, 32], sizes = [8, 8], strides = [1, 1]} : vector<8x96xbf16> to vector<8x8xbf16>
    %35 = vector.extract_strided_slice %27 {offsets = [0, 64], sizes = [8, 8], strides = [1, 1]} : vector<8x96xbf16> to vector<8x8xbf16>
    %cst_28 = arith.constant dense<0.000000e+00> : vector<8x8xf32>
    %36 = tpu.matmul %33, %34, %cst_28 {dimension_numbers = #tpu.dot_dimension_numbers<[1], [1], [0], [0], [0, 0, 1, 0], [], []>} : vector<8x8xbf16>, vector<8x8xbf16>, vector<8x8xf32> -> vector<8x8xf32>
    %cst_29 = arith.constant 0.353553385 : f32
    %37 = vector.broadcast %cst_29 : f32 to vector<8x8xf32>
    %38 = arith.mulf %36, %37 : vector<8x8xf32>
    %39 = vector.broadcast %7 : vector<8x1xf32> to vector<8x8xf32>
    %40 = arith.addf %38, %39 : vector<8x8xf32>
    %cst_30 = arith.constant dense<0xFF800000> : vector<8xf32>
    %41 = vector.multi_reduction <maximumf>, %40, %cst_30 [1] : vector<8x8xf32> to vector<8xf32>
    %42 = vector.shape_cast %41 : vector<8xf32> to vector<8x1xf32>
    %43 = vector.broadcast %42 : vector<8x1xf32> to vector<8x8xf32>
    %44 = arith.subf %40, %43 : vector<8x8xf32>
    %45 = math.exp %44 : vector<8x8xf32>
    %cst_31 = arith.constant dense<0.000000e+00> : vector<8xf32>
    %46 = vector.multi_reduction <add>, %45, %cst_31 [1] : vector<8x8xf32> to vector<8xf32>
    %47 = vector.shape_cast %46 : vector<8xf32> to vector<8x1xf32>
    %48 = tpu.reciprocal %47 {approx = true} : vector<8x1xf32> -> vector<8x1xf32>
    %49 = vector.broadcast %48 : vector<8x1xf32> to vector<8x8xf32>
    %50 = arith.mulf %45, %49 : vector<8x8xf32>
    %51 = arith.truncf %50 : vector<8x8xf32> to vector<8x8xbf16>
    %cst_32 = arith.constant dense<0.000000e+00> : vector<8x8xf32>
    %52 = tpu.matmul %51, %35, %cst_32 {dimension_numbers = #tpu.dot_dimension_numbers<[1], [0], [0], [1], [0, 0, 1, 1], [], []>} : vector<8x8xbf16>, vector<8x8xbf16>, vector<8x8xf32> -> vector<8x8xf32>
    %53 = arith.truncf %52 : vector<8x8xf32> to vector<8x8xbf16>
    %54 = vector.extract_strided_slice %29 {offsets = [0, 0], sizes = [8, 32], strides = [1, 1]} : vector<32x32xbf16> to vector<8x32xbf16>
    %cst_33 = arith.constant dense<0.000000e+00> : vector<8x32xf32>
    %55 = tpu.matmul %53, %54, %cst_33 {dimension_numbers = #tpu.dot_dimension_numbers<[1], [0], [0], [1], [0, 0, 1, 1], [], []>} : vector<8x8xbf16>, vector<8x32xbf16>, vector<8x32xf32> -> vector<8x32xf32>
    %56 = arith.addf %32, %55 : vector<8x32xf32>
    %57 = vector.extract_strided_slice %27 {offsets = [0, 8], sizes = [8, 8], strides = [1, 1]} : vector<8x96xbf16> to vector<8x8xbf16>
    %58 = vector.extract_strided_slice %27 {offsets = [0, 40], sizes = [8, 8], strides = [1, 1]} : vector<8x96xbf16> to vector<8x8xbf16>
    %59 = vector.extract_strided_slice %27 {offsets = [0, 72], sizes = [8, 8], strides = [1, 1]} : vector<8x96xbf16> to vector<8x8xbf16>
    %cst_34 = arith.constant dense<0.000000e+00> : vector<8x8xf32>
    %60 = tpu.matmul %57, %58, %cst_34 {dimension_numbers = #tpu.dot_dimension_numbers<[1], [1], [0], [0], [0, 0, 1, 0], [], []>} : vector<8x8xbf16>, vector<8x8xbf16>, vector<8x8xf32> -> vector<8x8xf32>
    %cst_35 = arith.constant 0.353553385 : f32
    %61 = vector.broadcast %cst_35 : f32 to vector<8x8xf32>
    %62 = arith.mulf %60, %61 : vector<8x8xf32>
    %63 = vector.broadcast %7 : vector<8x1xf32> to vector<8x8xf32>
    %64 = arith.addf %62, %63 : vector<8x8xf32>
    %cst_36 = arith.constant dense<0xFF800000> : vector<8xf32>
    %65 = vector.multi_reduction <maximumf>, %64, %cst_36 [1] : vector<8x8xf32> to vector<8xf32>
    %66 = vector.shape_cast %65 : vector<8xf32> to vector<8x1xf32>
    %67 = vector.broadcast %66 : vector<8x1xf32> to vector<8x8xf32>
    %68 = arith.subf %64, %67 : vector<8x8xf32>
    %69 = math.exp %68 : vector<8x8xf32>
    %cst_37 = arith.constant dense<0.000000e+00> : vector<8xf32>
    %70 = vector.multi_reduction <add>, %69, %cst_37 [1] : vector<8x8xf32> to vector<8xf32>
    %71 = vector.shape_cast %70 : vector<8xf32> to vector<8x1xf32>
    %72 = tpu.reciprocal %71 {approx = true} : vector<8x1xf32> -> vector<8x1xf32>
    %73 = vector.broadcast %72 : vector<8x1xf32> to vector<8x8xf32>
    %74 = arith.mulf %69, %73 : vector<8x8xf32>
    %75 = arith.truncf %74 : vector<8x8xf32> to vector<8x8xbf16>
    %cst_38 = arith.constant dense<0.000000e+00> : vector<8x8xf32>
    %76 = tpu.matmul %75, %59, %cst_38 {dimension_numbers = #tpu.dot_dimension_numbers<[1], [0], [0], [1], [0, 0, 1, 1], [], []>} : vector<8x8xbf16>, vector<8x8xbf16>, vector<8x8xf32> -> vector<8x8xf32>
    %77 = arith.truncf %76 : vector<8x8xf32> to vector<8x8xbf16>
    %78 = vector.extract_strided_slice %29 {offsets = [8, 0], sizes = [8, 32], strides = [1, 1]} : vector<32x32xbf16> to vector<8x32xbf16>
    %cst_39 = arith.constant dense<0.000000e+00> : vector<8x32xf32>
    %79 = tpu.matmul %77, %78, %cst_39 {dimension_numbers = #tpu.dot_dimension_numbers<[1], [0], [0], [1], [0, 0, 1, 1], [], []>} : vector<8x8xbf16>, vector<8x32xbf16>, vector<8x32xf32> -> vector<8x32xf32>
    %80 = arith.addf %56, %79 : vector<8x32xf32>
    %81 = vector.extract_strided_slice %27 {offsets = [0, 16], sizes = [8, 8], strides = [1, 1]} : vector<8x96xbf16> to vector<8x8xbf16>
    %82 = vector.extract_strided_slice %27 {offsets = [0, 48], sizes = [8, 8], strides = [1, 1]} : vector<8x96xbf16> to vector<8x8xbf16>
    %83 = vector.extract_strided_slice %27 {offsets = [0, 80], sizes = [8, 8], strides = [1, 1]} : vector<8x96xbf16> to vector<8x8xbf16>
    %cst_40 = arith.constant dense<0.000000e+00> : vector<8x8xf32>
    %84 = tpu.matmul %81, %82, %cst_40 {dimension_numbers = #tpu.dot_dimension_numbers<[1], [1], [0], [0], [0, 0, 1, 0], [], []>} : vector<8x8xbf16>, vector<8x8xbf16>, vector<8x8xf32> -> vector<8x8xf32>
    %cst_41 = arith.constant 0.353553385 : f32
    %85 = vector.broadcast %cst_41 : f32 to vector<8x8xf32>
    %86 = arith.mulf %84, %85 : vector<8x8xf32>
    %87 = vector.broadcast %7 : vector<8x1xf32> to vector<8x8xf32>
    %88 = arith.addf %86, %87 : vector<8x8xf32>
    %cst_42 = arith.constant dense<0xFF800000> : vector<8xf32>
    %89 = vector.multi_reduction <maximumf>, %88, %cst_42 [1] : vector<8x8xf32> to vector<8xf32>
    %90 = vector.shape_cast %89 : vector<8xf32> to vector<8x1xf32>
    %91 = vector.broadcast %90 : vector<8x1xf32> to vector<8x8xf32>
    %92 = arith.subf %88, %91 : vector<8x8xf32>
    %93 = math.exp %92 : vector<8x8xf32>
    %cst_43 = arith.constant dense<0.000000e+00> : vector<8xf32>
    %94 = vector.multi_reduction <add>, %93, %cst_43 [1] : vector<8x8xf32> to vector<8xf32>
    %95 = vector.shape_cast %94 : vector<8xf32> to vector<8x1xf32>
    %96 = tpu.reciprocal %95 {approx = true} : vector<8x1xf32> -> vector<8x1xf32>
    %97 = vector.broadcast %96 : vector<8x1xf32> to vector<8x8xf32>
    %98 = arith.mulf %93, %97 : vector<8x8xf32>
    %99 = arith.truncf %98 : vector<8x8xf32> to vector<8x8xbf16>
    %cst_44 = arith.constant dense<0.000000e+00> : vector<8x8xf32>
    %100 = tpu.matmul %99, %83, %cst_44 {dimension_numbers = #tpu.dot_dimension_numbers<[1], [0], [0], [1], [0, 0, 1, 1], [], []>} : vector<8x8xbf16>, vector<8x8xbf16>, vector<8x8xf32> -> vector<8x8xf32>
    %101 = arith.truncf %100 : vector<8x8xf32> to vector<8x8xbf16>
    %102 = vector.extract_strided_slice %29 {offsets = [16, 0], sizes = [8, 32], strides = [1, 1]} : vector<32x32xbf16> to vector<8x32xbf16>
    %cst_45 = arith.constant dense<0.000000e+00> : vector<8x32xf32>
    %103 = tpu.matmul %101, %102, %cst_45 {dimension_numbers = #tpu.dot_dimension_numbers<[1], [0], [0], [1], [0, 0, 1, 1], [], []>} : vector<8x8xbf16>, vector<8x32xbf16>, vector<8x32xf32> -> vector<8x32xf32>
    %104 = arith.addf %80, %103 : vector<8x32xf32>
    %105 = vector.extract_strided_slice %27 {offsets = [0, 24], sizes = [8, 8], strides = [1, 1]} : vector<8x96xbf16> to vector<8x8xbf16>
    %106 = vector.extract_strided_slice %27 {offsets = [0, 56], sizes = [8, 8], strides = [1, 1]} : vector<8x96xbf16> to vector<8x8xbf16>
    %107 = vector.extract_strided_slice %27 {offsets = [0, 88], sizes = [8, 8], strides = [1, 1]} : vector<8x96xbf16> to vector<8x8xbf16>
    %cst_46 = arith.constant dense<0.000000e+00> : vector<8x8xf32>
    %108 = tpu.matmul %105, %106, %cst_46 {dimension_numbers = #tpu.dot_dimension_numbers<[1], [1], [0], [0], [0, 0, 1, 0], [], []>} : vector<8x8xbf16>, vector<8x8xbf16>, vector<8x8xf32> -> vector<8x8xf32>
    %cst_47 = arith.constant 0.353553385 : f32
    %109 = vector.broadcast %cst_47 : f32 to vector<8x8xf32>
    %110 = arith.mulf %108, %109 : vector<8x8xf32>
    %111 = vector.broadcast %7 : vector<8x1xf32> to vector<8x8xf32>
    %112 = arith.addf %110, %111 : vector<8x8xf32>
    %cst_48 = arith.constant dense<0xFF800000> : vector<8xf32>
    %113 = vector.multi_reduction <maximumf>, %112, %cst_48 [1] : vector<8x8xf32> to vector<8xf32>
    %114 = vector.shape_cast %113 : vector<8xf32> to vector<8x1xf32>
    %115 = vector.broadcast %114 : vector<8x1xf32> to vector<8x8xf32>
    %116 = arith.subf %112, %115 : vector<8x8xf32>
    %117 = math.exp %116 : vector<8x8xf32>
    %cst_49 = arith.constant dense<0.000000e+00> : vector<8xf32>
    %118 = vector.multi_reduction <add>, %117, %cst_49 [1] : vector<8x8xf32> to vector<8xf32>
    %119 = vector.shape_cast %118 : vector<8xf32> to vector<8x1xf32>
    %120 = tpu.reciprocal %119 {approx = true} : vector<8x1xf32> -> vector<8x1xf32>
    %121 = vector.broadcast %120 : vector<8x1xf32> to vector<8x8xf32>
    %122 = arith.mulf %117, %121 : vector<8x8xf32>
    %123 = arith.truncf %122 : vector<8x8xf32> to vector<8x8xbf16>
    %cst_50 = arith.constant dense<0.000000e+00> : vector<8x8xf32>
    %124 = tpu.matmul %123, %107, %cst_50 {dimension_numbers = #tpu.dot_dimension_numbers<[1], [0], [0], [1], [0, 0, 1, 1], [], []>} : vector<8x8xbf16>, vector<8x8xbf16>, vector<8x8xf32> -> vector<8x8xf32>
    %125 = arith.truncf %124 : vector<8x8xf32> to vector<8x8xbf16>
    %126 = vector.extract_strided_slice %29 {offsets = [24, 0], sizes = [8, 32], strides = [1, 1]} : vector<32x32xbf16> to vector<8x32xbf16>
    %cst_51 = arith.constant dense<0.000000e+00> : vector<8x32xf32>
    %127 = tpu.matmul %125, %126, %cst_51 {dimension_numbers = #tpu.dot_dimension_numbers<[1], [0], [0], [1], [0, 0, 1, 1], [], []>} : vector<8x8xbf16>, vector<8x32xbf16>, vector<8x32xf32> -> vector<8x32xf32>
    %128 = arith.addf %104, %127 : vector<8x32xf32>
    %129 = vector.broadcast %31 : vector<1x32xf32> to vector<8x32xf32>
    %130 = arith.addf %128, %129 : vector<8x32xf32>
    %131 = arith.addf %18, %130 : vector<8x32xf32>
    %c0_52 = arith.constant 0 : index
    %c0_53 = arith.constant 0 : index
    %c0_54 = arith.constant 0 : index
    %132 = vector.load %arg22[%c0_52, %c0_53, %c0_54] : memref<1x1x32xf32, #tpu.memory_space<vmem>>, vector<1x1x32xf32>
    %133 = vector.shape_cast %132 : vector<1x1x32xf32> to vector<1x32xf32>
    %c0_55 = arith.constant 0 : index
    %c0_56 = arith.constant 0 : index
    %c0_57 = arith.constant 0 : index
    %134 = vector.load %arg23[%c0_55, %c0_56, %c0_57] : memref<1x1x32xf32, #tpu.memory_space<vmem>>, vector<1x1x32xf32>
    %135 = vector.shape_cast %134 : vector<1x1x32xf32> to vector<1x32xf32>
    %cst_58 = arith.constant dense<0.000000e+00> : vector<8xf32>
    %136 = vector.multi_reduction <add>, %131, %cst_58 [1] : vector<8x32xf32> to vector<8xf32>
    %137 = vector.shape_cast %136 : vector<8xf32> to vector<8x1xf32>
    %cst_59 = arith.constant 3.200000e+01 : f32
    %138 = vector.broadcast %cst_59 : f32 to vector<8x1xf32>
    %139 = arith.divf %137, %138 : vector<8x1xf32>
    %140 = vector.broadcast %139 : vector<8x1xf32> to vector<8x32xf32>
    %141 = arith.subf %131, %140 : vector<8x32xf32>
    %142 = arith.mulf %141, %141 : vector<8x32xf32>
    %cst_60 = arith.constant dense<0.000000e+00> : vector<8xf32>
    %143 = vector.multi_reduction <add>, %142, %cst_60 [1] : vector<8x32xf32> to vector<8xf32>
    %144 = vector.shape_cast %143 : vector<8xf32> to vector<8x1xf32>
    %cst_61 = arith.constant 0.0322580636 : f32
    %145 = vector.broadcast %cst_61 : f32 to vector<8x1xf32>
    %146 = arith.mulf %144, %145 : vector<8x1xf32>
    %147 = vector.broadcast %139 : vector<8x1xf32> to vector<8x32xf32>
    %148 = arith.subf %131, %147 : vector<8x32xf32>
    %149 = math.sqrt %146 : vector<8x1xf32>
    %cst_62 = arith.constant 9.99999996E-13 : f32
    %150 = vector.broadcast %cst_62 : f32 to vector<8x1xf32>
    %151 = arith.addf %149, %150 : vector<8x1xf32>
    %152 = vector.broadcast %151 : vector<8x1xf32> to vector<8x32xf32>
    %153 = arith.divf %148, %152 : vector<8x32xf32>
    %154 = vector.broadcast %133 : vector<1x32xf32> to vector<8x32xf32>
    %155 = arith.mulf %154, %153 : vector<8x32xf32>
    %156 = vector.broadcast %135 : vector<1x32xf32> to vector<8x32xf32>
    %157 = arith.addf %155, %156 : vector<8x32xf32>
    %158 = arith.truncf %157 : vector<8x32xf32> to vector<8x32xbf16>
    %c0_63 = arith.constant 0 : index
    %c0_64 = arith.constant 0 : index
    %c0_65 = arith.constant 0 : index
    %159 = vector.load %arg12[%c0_63, %c0_64, %c0_65] : memref<1x32x32xbf16, #tpu.memory_space<vmem>>, vector<1x32x32xbf16>
    %160 = vector.shape_cast %159 : vector<1x32x32xbf16> to vector<32x32xbf16>
    %cst_66 = arith.constant dense<0.000000e+00> : vector<8x32xf32>
    %161 = tpu.matmul %158, %160, %cst_66 {dimension_numbers = #tpu.dot_dimension_numbers<[1], [0], [0], [1], [0, 0, 1, 1], [], []>} : vector<8x32xbf16>, vector<32x32xbf16>, vector<8x32xf32> -> vector<8x32xf32>
    %c0_67 = arith.constant 0 : index
    %c0_68 = arith.constant 0 : index
    %c0_69 = arith.constant 0 : index
    %162 = vector.load %arg13[%c0_67, %c0_68, %c0_69] : memref<1x1x32xf32, #tpu.memory_space<vmem>>, vector<1x1x32xf32>
    %163 = vector.shape_cast %162 : vector<1x1x32xf32> to vector<1x32xf32>
    %164 = vector.broadcast %163 : vector<1x32xf32> to vector<8x32xf32>
    %165 = arith.addf %161, %164 : vector<8x32xf32>
    %166 = arith.truncf %165 : vector<8x32xf32> to vector<8x32xbf16>
    %c0_70 = arith.constant 0 : index
    %c0_71 = arith.constant 0 : index
    %c0_72 = arith.constant 0 : index
    %167 = vector.load %arg14[%c0_70, %c0_71, %c0_72] : memref<1x32x64xbf16, #tpu.memory_space<vmem>>, vector<1x32x64xbf16>
    %168 = vector.shape_cast %167 : vector<1x32x64xbf16> to vector<32x64xbf16>
    %cst_73 = arith.constant dense<0.000000e+00> : vector<8x64xf32>
    %169 = tpu.matmul %14, %168, %cst_73 {dimension_numbers = #tpu.dot_dimension_numbers<[1], [0], [0], [1], [0, 0, 1, 1], [], []>} : vector<8x32xbf16>, vector<32x64xbf16>, vector<8x64xf32> -> vector<8x64xf32>
    %c0_74 = arith.constant 0 : index
    %c0_75 = arith.constant 0 : index
    %c0_76 = arith.constant 0 : index
    %170 = vector.load %arg15[%c0_74, %c0_75, %c0_76] : memref<1x1x64xf32, #tpu.memory_space<vmem>>, vector<1x1x64xf32>
    %171 = vector.shape_cast %170 : vector<1x1x64xf32> to vector<1x64xf32>
    %172 = vector.broadcast %171 : vector<1x64xf32> to vector<8x64xf32>
    %173 = arith.addf %169, %172 : vector<8x64xf32>
    %174 = arith.truncf %173 : vector<8x64xf32> to vector<8x64xbf16>
    %c0_77 = arith.constant 0 : index
    %c0_78 = arith.constant 0 : index
    %c0_79 = arith.constant 0 : index
    %175 = vector.load %arg16[%c0_77, %c0_78, %c0_79] : memref<1x32x32xbf16, #tpu.memory_space<vmem>>, vector<1x32x32xbf16>
    %176 = vector.shape_cast %175 : vector<1x32x32xbf16> to vector<32x32xbf16>
    %c0_80 = arith.constant 0 : index
    %c0_81 = arith.constant 0 : index
    %c0_82 = arith.constant 0 : index
    %177 = vector.load %arg17[%c0_80, %c0_81, %c0_82] : memref<1x1x32xf32, #tpu.memory_space<vmem>>, vector<1x1x32xf32>
    %178 = vector.shape_cast %177 : vector<1x1x32xf32> to vector<1x32xf32>
    %cst_83 = arith.constant 0.000000e+00 : f32
    %179 = vector.broadcast %cst_83 : f32 to vector<8x32xf32>
    %180 = vector.extract_strided_slice %166 {offsets = [0, 0], sizes = [8, 8], strides = [1, 1]} : vector<8x32xbf16> to vector<8x8xbf16>
    %181 = vector.extract_strided_slice %174 {offsets = [0, 0], sizes = [8, 8], strides = [1, 1]} : vector<8x64xbf16> to vector<8x8xbf16>
    %182 = vector.extract_strided_slice %174 {offsets = [0, 32], sizes = [8, 8], strides = [1, 1]} : vector<8x64xbf16> to vector<8x8xbf16>
    %cst_84 = arith.constant dense<0.000000e+00> : vector<8x8xf32>
    %183 = tpu.matmul %180, %181, %cst_84 {dimension_numbers = #tpu.dot_dimension_numbers<[1], [1], [0], [0], [0, 0, 1, 0], [], []>} : vector<8x8xbf16>, vector<8x8xbf16>, vector<8x8xf32> -> vector<8x8xf32>
    %cst_85 = arith.constant 0.353553385 : f32
    %184 = vector.broadcast %cst_85 : f32 to vector<8x8xf32>
    %185 = arith.mulf %183, %184 : vector<8x8xf32>
    %186 = vector.broadcast %11 : vector<1x8xf32> to vector<8x8xf32>
    %187 = arith.addf %185, %186 : vector<8x8xf32>
    %cst_86 = arith.constant dense<0xFF800000> : vector<8xf32>
    %188 = vector.multi_reduction <maximumf>, %187, %cst_86 [1] : vector<8x8xf32> to vector<8xf32>
    %189 = vector.shape_cast %188 : vector<8xf32> to vector<8x1xf32>
    %190 = vector.broadcast %189 : vector<8x1xf32> to vector<8x8xf32>
    %191 = arith.subf %187, %190 : vector<8x8xf32>
    %192 = math.exp %191 : vector<8x8xf32>
    %cst_87 = arith.constant dense<0.000000e+00> : vector<8xf32>
    %193 = vector.multi_reduction <add>, %192, %cst_87 [1] : vector<8x8xf32> to vector<8xf32>
    %194 = vector.shape_cast %193 : vector<8xf32> to vector<8x1xf32>
    %195 = tpu.reciprocal %194 {approx = true} : vector<8x1xf32> -> vector<8x1xf32>
    %196 = vector.broadcast %195 : vector<8x1xf32> to vector<8x8xf32>
    %197 = arith.mulf %192, %196 : vector<8x8xf32>
    %198 = arith.truncf %197 : vector<8x8xf32> to vector<8x8xbf16>
    %cst_88 = arith.constant dense<0.000000e+00> : vector<8x8xf32>
    %199 = tpu.matmul %198, %182, %cst_88 {dimension_numbers = #tpu.dot_dimension_numbers<[1], [0], [0], [1], [0, 0, 1, 1], [], []>} : vector<8x8xbf16>, vector<8x8xbf16>, vector<8x8xf32> -> vector<8x8xf32>
    %200 = arith.truncf %199 : vector<8x8xf32> to vector<8x8xbf16>
    %201 = vector.extract_strided_slice %176 {offsets = [0, 0], sizes = [8, 32], strides = [1, 1]} : vector<32x32xbf16> to vector<8x32xbf16>
    %cst_89 = arith.constant dense<0.000000e+00> : vector<8x32xf32>
    %202 = tpu.matmul %200, %201, %cst_89 {dimension_numbers = #tpu.dot_dimension_numbers<[1], [0], [0], [1], [0, 0, 1, 1], [], []>} : vector<8x8xbf16>, vector<8x32xbf16>, vector<8x32xf32> -> vector<8x32xf32>
    %203 = arith.addf %179, %202 : vector<8x32xf32>
    %204 = vector.extract_strided_slice %166 {offsets = [0, 8], sizes = [8, 8], strides = [1, 1]} : vector<8x32xbf16> to vector<8x8xbf16>
    %205 = vector.extract_strided_slice %174 {offsets = [0, 8], sizes = [8, 8], strides = [1, 1]} : vector<8x64xbf16> to vector<8x8xbf16>
    %206 = vector.extract_strided_slice %174 {offsets = [0, 40], sizes = [8, 8], strides = [1, 1]} : vector<8x64xbf16> to vector<8x8xbf16>
    %cst_90 = arith.constant dense<0.000000e+00> : vector<8x8xf32>
    %207 = tpu.matmul %204, %205, %cst_90 {dimension_numbers = #tpu.dot_dimension_numbers<[1], [1], [0], [0], [0, 0, 1, 0], [], []>} : vector<8x8xbf16>, vector<8x8xbf16>, vector<8x8xf32> -> vector<8x8xf32>
    %cst_91 = arith.constant 0.353553385 : f32
    %208 = vector.broadcast %cst_91 : f32 to vector<8x8xf32>
    %209 = arith.mulf %207, %208 : vector<8x8xf32>
    %210 = vector.broadcast %11 : vector<1x8xf32> to vector<8x8xf32>
    %211 = arith.addf %209, %210 : vector<8x8xf32>
    %cst_92 = arith.constant dense<0xFF800000> : vector<8xf32>
    %212 = vector.multi_reduction <maximumf>, %211, %cst_92 [1] : vector<8x8xf32> to vector<8xf32>
    %213 = vector.shape_cast %212 : vector<8xf32> to vector<8x1xf32>
    %214 = vector.broadcast %213 : vector<8x1xf32> to vector<8x8xf32>
    %215 = arith.subf %211, %214 : vector<8x8xf32>
    %216 = math.exp %215 : vector<8x8xf32>
    %cst_93 = arith.constant dense<0.000000e+00> : vector<8xf32>
    %217 = vector.multi_reduction <add>, %216, %cst_93 [1] : vector<8x8xf32> to vector<8xf32>
    %218 = vector.shape_cast %217 : vector<8xf32> to vector<8x1xf32>
    %219 = tpu.reciprocal %218 {approx = true} : vector<8x1xf32> -> vector<8x1xf32>
    %220 = vector.broadcast %219 : vector<8x1xf32> to vector<8x8xf32>
    %221 = arith.mulf %216, %220 : vector<8x8xf32>
    %222 = arith.truncf %221 : vector<8x8xf32> to vector<8x8xbf16>
    %cst_94 = arith.constant dense<0.000000e+00> : vector<8x8xf32>
    %223 = tpu.matmul %222, %206, %cst_94 {dimension_numbers = #tpu.dot_dimension_numbers<[1], [0], [0], [1], [0, 0, 1, 1], [], []>} : vector<8x8xbf16>, vector<8x8xbf16>, vector<8x8xf32> -> vector<8x8xf32>
    %224 = arith.truncf %223 : vector<8x8xf32> to vector<8x8xbf16>
    %225 = vector.extract_strided_slice %176 {offsets = [8, 0], sizes = [8, 32], strides = [1, 1]} : vector<32x32xbf16> to vector<8x32xbf16>
    %cst_95 = arith.constant dense<0.000000e+00> : vector<8x32xf32>
    %226 = tpu.matmul %224, %225, %cst_95 {dimension_numbers = #tpu.dot_dimension_numbers<[1], [0], [0], [1], [0, 0, 1, 1], [], []>} : vector<8x8xbf16>, vector<8x32xbf16>, vector<8x32xf32> -> vector<8x32xf32>
    %227 = arith.addf %203, %226 : vector<8x32xf32>
    %228 = vector.extract_strided_slice %166 {offsets = [0, 16], sizes = [8, 8], strides = [1, 1]} : vector<8x32xbf16> to vector<8x8xbf16>
    %229 = vector.extract_strided_slice %174 {offsets = [0, 16], sizes = [8, 8], strides = [1, 1]} : vector<8x64xbf16> to vector<8x8xbf16>
    %230 = vector.extract_strided_slice %174 {offsets = [0, 48], sizes = [8, 8], strides = [1, 1]} : vector<8x64xbf16> to vector<8x8xbf16>
    %cst_96 = arith.constant dense<0.000000e+00> : vector<8x8xf32>
    %231 = tpu.matmul %228, %229, %cst_96 {dimension_numbers = #tpu.dot_dimension_numbers<[1], [1], [0], [0], [0, 0, 1, 0], [], []>} : vector<8x8xbf16>, vector<8x8xbf16>, vector<8x8xf32> -> vector<8x8xf32>
    %cst_97 = arith.constant 0.353553385 : f32
    %232 = vector.broadcast %cst_97 : f32 to vector<8x8xf32>
    %233 = arith.mulf %231, %232 : vector<8x8xf32>
    %234 = vector.broadcast %11 : vector<1x8xf32> to vector<8x8xf32>
    %235 = arith.addf %233, %234 : vector<8x8xf32>
    %cst_98 = arith.constant dense<0xFF800000> : vector<8xf32>
    %236 = vector.multi_reduction <maximumf>, %235, %cst_98 [1] : vector<8x8xf32> to vector<8xf32>
    %237 = vector.shape_cast %236 : vector<8xf32> to vector<8x1xf32>
    %238 = vector.broadcast %237 : vector<8x1xf32> to vector<8x8xf32>
    %239 = arith.subf %235, %238 : vector<8x8xf32>
    %240 = math.exp %239 : vector<8x8xf32>
    %cst_99 = arith.constant dense<0.000000e+00> : vector<8xf32>
    %241 = vector.multi_reduction <add>, %240, %cst_99 [1] : vector<8x8xf32> to vector<8xf32>
    %242 = vector.shape_cast %241 : vector<8xf32> to vector<8x1xf32>
    %243 = tpu.reciprocal %242 {approx = true} : vector<8x1xf32> -> vector<8x1xf32>
    %244 = vector.broadcast %243 : vector<8x1xf32> to vector<8x8xf32>
    %245 = arith.mulf %240, %244 : vector<8x8xf32>
    %246 = arith.truncf %245 : vector<8x8xf32> to vector<8x8xbf16>
    %cst_100 = arith.constant dense<0.000000e+00> : vector<8x8xf32>
    %247 = tpu.matmul %246, %230, %cst_100 {dimension_numbers = #tpu.dot_dimension_numbers<[1], [0], [0], [1], [0, 0, 1, 1], [], []>} : vector<8x8xbf16>, vector<8x8xbf16>, vector<8x8xf32> -> vector<8x8xf32>
    %248 = arith.truncf %247 : vector<8x8xf32> to vector<8x8xbf16>
    %249 = vector.extract_strided_slice %176 {offsets = [16, 0], sizes = [8, 32], strides = [1, 1]} : vector<32x32xbf16> to vector<8x32xbf16>
    %cst_101 = arith.constant dense<0.000000e+00> : vector<8x32xf32>
    %250 = tpu.matmul %248, %249, %cst_101 {dimension_numbers = #tpu.dot_dimension_numbers<[1], [0], [0], [1], [0, 0, 1, 1], [], []>} : vector<8x8xbf16>, vector<8x32xbf16>, vector<8x32xf32> -> vector<8x32xf32>
    %251 = arith.addf %227, %250 : vector<8x32xf32>
    %252 = vector.extract_strided_slice %166 {offsets = [0, 24], sizes = [8, 8], strides = [1, 1]} : vector<8x32xbf16> to vector<8x8xbf16>
    %253 = vector.extract_strided_slice %174 {offsets = [0, 24], sizes = [8, 8], strides = [1, 1]} : vector<8x64xbf16> to vector<8x8xbf16>
    %254 = vector.extract_strided_slice %174 {offsets = [0, 56], sizes = [8, 8], strides = [1, 1]} : vector<8x64xbf16> to vector<8x8xbf16>
    %cst_102 = arith.constant dense<0.000000e+00> : vector<8x8xf32>
    %255 = tpu.matmul %252, %253, %cst_102 {dimension_numbers = #tpu.dot_dimension_numbers<[1], [1], [0], [0], [0, 0, 1, 0], [], []>} : vector<8x8xbf16>, vector<8x8xbf16>, vector<8x8xf32> -> vector<8x8xf32>
    %cst_103 = arith.constant 0.353553385 : f32
    %256 = vector.broadcast %cst_103 : f32 to vector<8x8xf32>
    %257 = arith.mulf %255, %256 : vector<8x8xf32>
    %258 = vector.broadcast %11 : vector<1x8xf32> to vector<8x8xf32>
    %259 = arith.addf %257, %258 : vector<8x8xf32>
    %cst_104 = arith.constant dense<0xFF800000> : vector<8xf32>
    %260 = vector.multi_reduction <maximumf>, %259, %cst_104 [1] : vector<8x8xf32> to vector<8xf32>
    %261 = vector.shape_cast %260 : vector<8xf32> to vector<8x1xf32>
    %262 = vector.broadcast %261 : vector<8x1xf32> to vector<8x8xf32>
    %263 = arith.subf %259, %262 : vector<8x8xf32>
    %264 = math.exp %263 : vector<8x8xf32>
    %cst_105 = arith.constant dense<0.000000e+00> : vector<8xf32>
    %265 = vector.multi_reduction <add>, %264, %cst_105 [1] : vector<8x8xf32> to vector<8xf32>
    %266 = vector.shape_cast %265 : vector<8xf32> to vector<8x1xf32>
    %267 = tpu.reciprocal %266 {approx = true} : vector<8x1xf32> -> vector<8x1xf32>
    %268 = vector.broadcast %267 : vector<8x1xf32> to vector<8x8xf32>
    %269 = arith.mulf %264, %268 : vector<8x8xf32>
    %270 = arith.truncf %269 : vector<8x8xf32> to vector<8x8xbf16>
    %cst_106 = arith.constant dense<0.000000e+00> : vector<8x8xf32>
    %271 = tpu.matmul %270, %254, %cst_106 {dimension_numbers = #tpu.dot_dimension_numbers<[1], [0], [0], [1], [0, 0, 1, 1], [], []>} : vector<8x8xbf16>, vector<8x8xbf16>, vector<8x8xf32> -> vector<8x8xf32>
    %272 = arith.truncf %271 : vector<8x8xf32> to vector<8x8xbf16>
    %273 = vector.extract_strided_slice %176 {offsets = [24, 0], sizes = [8, 32], strides = [1, 1]} : vector<32x32xbf16> to vector<8x32xbf16>
    %cst_107 = arith.constant dense<0.000000e+00> : vector<8x32xf32>
    %274 = tpu.matmul %272, %273, %cst_107 {dimension_numbers = #tpu.dot_dimension_numbers<[1], [0], [0], [1], [0, 0, 1, 1], [], []>} : vector<8x8xbf16>, vector<8x32xbf16>, vector<8x32xf32> -> vector<8x32xf32>
    %275 = arith.addf %251, %274 : vector<8x32xf32>
    %276 = vector.broadcast %178 : vector<1x32xf32> to vector<8x32xf32>
    %277 = arith.addf %275, %276 : vector<8x32xf32>
    %278 = arith.addf %157, %277 : vector<8x32xf32>
    %c0_108 = arith.constant 0 : index
    %c0_109 = arith.constant 0 : index
    %c0_110 = arith.constant 0 : index
    %279 = vector.load %arg24[%c0_108, %c0_109, %c0_110] : memref<1x1x32xf32, #tpu.memory_space<vmem>>, vector<1x1x32xf32>
    %280 = vector.shape_cast %279 : vector<1x1x32xf32> to vector<1x32xf32>
    %c0_111 = arith.constant 0 : index
    %c0_112 = arith.constant 0 : index
    %c0_113 = arith.constant 0 : index
    %281 = vector.load %arg25[%c0_111, %c0_112, %c0_113] : memref<1x1x32xf32, #tpu.memory_space<vmem>>, vector<1x1x32xf32>
    %282 = vector.shape_cast %281 : vector<1x1x32xf32> to vector<1x32xf32>
    %cst_114 = arith.constant dense<0.000000e+00> : vector<8xf32>
    %283 = vector.multi_reduction <add>, %278, %cst_114 [1] : vector<8x32xf32> to vector<8xf32>
    %284 = vector.shape_cast %283 : vector<8xf32> to vector<8x1xf32>
    %cst_115 = arith.constant 3.200000e+01 : f32
    %285 = vector.broadcast %cst_115 : f32 to vector<8x1xf32>
    %286 = arith.divf %284, %285 : vector<8x1xf32>
    %287 = vector.broadcast %286 : vector<8x1xf32> to vector<8x32xf32>
    %288 = arith.subf %278, %287 : vector<8x32xf32>
    %289 = arith.mulf %288, %288 : vector<8x32xf32>
    %cst_116 = arith.constant dense<0.000000e+00> : vector<8xf32>
    %290 = vector.multi_reduction <add>, %289, %cst_116 [1] : vector<8x32xf32> to vector<8xf32>
    %291 = vector.shape_cast %290 : vector<8xf32> to vector<8x1xf32>
    %cst_117 = arith.constant 0.0322580636 : f32
    %292 = vector.broadcast %cst_117 : f32 to vector<8x1xf32>
    %293 = arith.mulf %291, %292 : vector<8x1xf32>
    %294 = vector.broadcast %286 : vector<8x1xf32> to vector<8x32xf32>
    %295 = arith.subf %278, %294 : vector<8x32xf32>
    %296 = math.sqrt %293 : vector<8x1xf32>
    %cst_118 = arith.constant 9.99999996E-13 : f32
    %297 = vector.broadcast %cst_118 : f32 to vector<8x1xf32>
    %298 = arith.addf %296, %297 : vector<8x1xf32>
    %299 = vector.broadcast %298 : vector<8x1xf32> to vector<8x32xf32>
    %300 = arith.divf %295, %299 : vector<8x32xf32>
    %301 = vector.broadcast %280 : vector<1x32xf32> to vector<8x32xf32>
    %302 = arith.mulf %301, %300 : vector<8x32xf32>
    %303 = vector.broadcast %282 : vector<1x32xf32> to vector<8x32xf32>
    %304 = arith.addf %302, %303 : vector<8x32xf32>
    %305 = arith.truncf %304 : vector<8x32xf32> to vector<8x32xbf16>
    %c0_119 = arith.constant 0 : index
    %c0_120 = arith.constant 0 : index
    %c0_121 = arith.constant 0 : index
    %306 = vector.load %arg18[%c0_119, %c0_120, %c0_121] : memref<1x32x64xbf16, #tpu.memory_space<vmem>>, vector<1x32x64xbf16>
    %307 = vector.shape_cast %306 : vector<1x32x64xbf16> to vector<32x64xbf16>
    %cst_122 = arith.constant dense<0.000000e+00> : vector<8x64xf32>
    %308 = tpu.matmul %305, %307, %cst_122 {dimension_numbers = #tpu.dot_dimension_numbers<[1], [0], [0], [1], [0, 0, 1, 1], [], []>} : vector<8x32xbf16>, vector<32x64xbf16>, vector<8x64xf32> -> vector<8x64xf32>
    %c0_123 = arith.constant 0 : index
    %c0_124 = arith.constant 0 : index
    %c0_125 = arith.constant 0 : index
    %309 = vector.load %arg19[%c0_123, %c0_124, %c0_125] : memref<1x1x64xf32, #tpu.memory_space<vmem>>, vector<1x1x64xf32>
    %310 = vector.shape_cast %309 : vector<1x1x64xf32> to vector<1x64xf32>
    %311 = vector.broadcast %310 : vector<1x64xf32> to vector<8x64xf32>
    %312 = arith.addf %308, %311 : vector<8x64xf32>
    %cst_126 = arith.constant 0.000000e+00 : f32
    %313 = vector.broadcast %cst_126 : f32 to vector<8x64xf32>
    %314 = arith.maximumf %312, %313 : vector<8x64xf32>
    %315 = arith.truncf %314 : vector<8x64xf32> to vector<8x64xbf16>
    %c0_127 = arith.constant 0 : index
    %c0_128 = arith.constant 0 : index
    %c0_129 = arith.constant 0 : index
    %316 = vector.load %arg20[%c0_127, %c0_128, %c0_129] : memref<1x64x32xbf16, #tpu.memory_space<vmem>>, vector<1x64x32xbf16>
    %317 = vector.shape_cast %316 : vector<1x64x32xbf16> to vector<64x32xbf16>
    %cst_130 = arith.constant dense<0.000000e+00> : vector<8x32xf32>
    %318 = tpu.matmul %315, %317, %cst_130 {dimension_numbers = #tpu.dot_dimension_numbers<[1], [0], [0], [1], [0, 0, 1, 1], [], []>} : vector<8x64xbf16>, vector<64x32xbf16>, vector<8x32xf32> -> vector<8x32xf32>
    %c0_131 = arith.constant 0 : index
    %c0_132 = arith.constant 0 : index
    %c0_133 = arith.constant 0 : index
    %319 = vector.load %arg21[%c0_131, %c0_132, %c0_133] : memref<1x1x32xf32, #tpu.memory_space<vmem>>, vector<1x1x32xf32>
    %320 = vector.shape_cast %319 : vector<1x1x32xf32> to vector<1x32xf32>
    %321 = vector.broadcast %320 : vector<1x32xf32> to vector<8x32xf32>
    %322 = arith.addf %318, %321 : vector<8x32xf32>
    %323 = arith.addf %304, %322 : vector<8x32xf32>
    %c0_134 = arith.constant 0 : index
    %c0_135 = arith.constant 0 : index
    %c0_136 = arith.constant 0 : index
    %324 = vector.load %arg26[%c0_134, %c0_135, %c0_136] : memref<1x1x32xf32, #tpu.memory_space<vmem>>, vector<1x1x32xf32>
    %325 = vector.shape_cast %324 : vector<1x1x32xf32> to vector<1x32xf32>
    %c0_137 = arith.constant 0 : index
    %c0_138 = arith.constant 0 : index
    %c0_139 = arith.constant 0 : index
    %326 = vector.load %arg27[%c0_137, %c0_138, %c0_139] : memref<1x1x32xf32, #tpu.memory_space<vmem>>, vector<1x1x32xf32>
    %327 = vector.shape_cast %326 : vector<1x1x32xf32> to vector<1x32xf32>
    %cst_140 = arith.constant dense<0.000000e+00> : vector<8xf32>
    %328 = vector.multi_reduction <add>, %323, %cst_140 [1] : vector<8x32xf32> to vector<8xf32>
    %329 = vector.shape_cast %328 : vector<8xf32> to vector<8x1xf32>
    %cst_141 = arith.constant 3.200000e+01 : f32
    %330 = vector.broadcast %cst_141 : f32 to vector<8x1xf32>
    %331 = arith.divf %329, %330 : vector<8x1xf32>
    %332 = vector.broadcast %331 : vector<8x1xf32> to vector<8x32xf32>
    %333 = arith.subf %323, %332 : vector<8x32xf32>
    %334 = arith.mulf %333, %333 : vector<8x32xf32>
    %cst_142 = arith.constant dense<0.000000e+00> : vector<8xf32>
    %335 = vector.multi_reduction <add>, %334, %cst_142 [1] : vector<8x32xf32> to vector<8xf32>
    %336 = vector.shape_cast %335 : vector<8xf32> to vector<8x1xf32>
    %cst_143 = arith.constant 0.0322580636 : f32
    %337 = vector.broadcast %cst_143 : f32 to vector<8x1xf32>
    %338 = arith.mulf %336, %337 : vector<8x1xf32>
    %339 = vector.broadcast %331 : vector<8x1xf32> to vector<8x32xf32>
    %340 = arith.subf %323, %339 : vector<8x32xf32>
    %341 = math.sqrt %338 : vector<8x1xf32>
    %cst_144 = arith.constant 9.99999996E-13 : f32
    %342 = vector.broadcast %cst_144 : f32 to vector<8x1xf32>
    %343 = arith.addf %341, %342 : vector<8x1xf32>
    %344 = vector.broadcast %343 : vector<8x1xf32> to vector<8x32xf32>
    %345 = arith.divf %340, %344 : vector<8x32xf32>
    %346 = vector.broadcast %325 : vector<1x32xf32> to vector<8x32xf32>
    %347 = arith.mulf %346, %345 : vector<8x32xf32>
    %348 = vector.broadcast %327 : vector<1x32xf32> to vector<8x32xf32>
    %349 = arith.addf %347, %348 : vector<8x32xf32>
    %c0_145 = arith.constant 0 : index
    %c0_146 = arith.constant 0 : index
    %350 = vector.load %arg37[%c0_145, %c0_146] : memref<8x32xf32, #tpu.memory_space<vmem>>, vector<8x32xf32>
    tpu.vector_store %arg37[%c0_145, %c0_146], %349 {strides = array<i32>} : memref<8x32xf32, #tpu.memory_space<vmem>>, vector<8x32xf32>,
    %c1_i32 = arith.constant 1 : i32
    %351 = arith.cmpi eq, %arg1, %c1_i32 : i32
    %352 = arith.extui %351 : i1 to i32
    %c0_i32_147 = arith.constant 0 : i32
    %353 = arith.cmpi ne, %352, %c0_i32_147 : i32
    scf.if %353 {
      %354 = vector.broadcast %1 : vector<8x1xf32> to vector<8x32xf32>
      %355 = arith.mulf %349, %354 : vector<8x32xf32>
      %cst_148 = arith.constant dense<0.000000e+00> : vector<32xf32>
      %356 = vector.multi_reduction <add>, %355, %cst_148 [0] : vector<8x32xf32> to vector<32xf32>
      %357 = vector.shape_cast %356 : vector<32xf32> to vector<1x32xf32>
      %cst_149 = arith.constant dense<0.000000e+00> : vector<1xf32>
      %358 = vector.multi_reduction <add>, %1, %cst_149 [0] : vector<8x1xf32> to vector<1xf32>
      %359 = vector.shape_cast %358 : vector<1xf32> to vector<1x1xf32>
      %360 = vector.broadcast %359 : vector<1x1xf32> to vector<1x32xf32>
      %361 = arith.divf %357, %360 : vector<1x32xf32>
      %362 = arith.truncf %361 : vector<1x32xf32> to vector<1x32xbf16>
      %c0_150 = arith.constant 0 : index
      %c0_151 = arith.constant 0 : index
      %363 = vector.load %arg28[%c0_150, %c0_151] : memref<32x256xbf16, #tpu.memory_space<vmem>>, vector<32x256xbf16>
      %cst_152 = arith.constant dense<0.000000e+00> : vector<1x256xf32>
      %364 = tpu.matmul %362, %363, %cst_152 {dimension_numbers = #tpu.dot_dimension_numbers<[1], [0], [0], [1], [0, 0, 1, 1], [], []>} : vector<1x32xbf16>, vector<32x256xbf16>, vector<1x256xf32> -> vector<1x256xf32>
      %c0_153 = arith.constant 0 : index
      %c0_154 = arith.constant 0 : index
      %365 = vector.load %arg29[%c0_153, %c0_154] : memref<1x256xf32, #tpu.memory_space<vmem>>, vector<1x256xf32>
      %366 = arith.addf %364, %365 : vector<1x256xf32>
      %cst_155 = arith.constant 0.000000e+00 : f32
      %367 = vector.broadcast %cst_155 : f32 to vector<1x256xf32>
      %368 = arith.maximumf %366, %367 : vector<1x256xf32>
      %369 = arith.truncf %368 : vector<1x256xf32> to vector<1x256xbf16>
      %c0_156 = arith.constant 0 : index
      %c0_157 = arith.constant 0 : index
      %370 = vector.load %arg30[%c0_156, %c0_157] : memref<256x64xbf16, #tpu.memory_space<vmem>>, vector<256x64xbf16>
      %cst_158 = arith.constant dense<0.000000e+00> : vector<1x64xf32>
      %371 = tpu.matmul %369, %370, %cst_158 {dimension_numbers = #tpu.dot_dimension_numbers<[1], [0], [0], [1], [0, 0, 1, 1], [], []>} : vector<1x256xbf16>, vector<256x64xbf16>, vector<1x64xf32> -> vector<1x64xf32>
      %c0_159 = arith.constant 0 : index
      %c0_160 = arith.constant 0 : index
      %372 = vector.load %arg31[%c0_159, %c0_160] : memref<1x64xf32, #tpu.memory_space<vmem>>, vector<1x64xf32>
      %373 = arith.addf %371, %372 : vector<1x64xf32>
      %cst_161 = arith.constant 0.000000e+00 : f32
      %374 = vector.broadcast %cst_161 : f32 to vector<1x64xf32>
      %375 = arith.maximumf %373, %374 : vector<1x64xf32>
      %376 = arith.truncf %375 : vector<1x64xf32> to vector<1x64xbf16>
      %c0_162 = arith.constant 0 : index
      %c0_163 = arith.constant 0 : index
      %377 = vector.load %arg32[%c0_162, %c0_163] : memref<64x32xbf16, #tpu.memory_space<vmem>>, vector<64x32xbf16>
      %cst_164 = arith.constant dense<0.000000e+00> : vector<1x32xf32>
      %378 = tpu.matmul %376, %377, %cst_164 {dimension_numbers = #tpu.dot_dimension_numbers<[1], [0], [0], [1], [0, 0, 1, 1], [], []>} : vector<1x64xbf16>, vector<64x32xbf16>, vector<1x32xf32> -> vector<1x32xf32>
      %c0_165 = arith.constant 0 : index
      %c0_166 = arith.constant 0 : index
      %379 = vector.load %arg33[%c0_165, %c0_166] : memref<1x32xf32, #tpu.memory_space<vmem>>, vector<1x32xf32>
      %380 = arith.addf %378, %379 : vector<1x32xf32>
      %cst_167 = arith.constant 0.000000e+00 : f32
      %381 = vector.broadcast %cst_167 : f32 to vector<1x32xf32>
      %382 = arith.maximumf %380, %381 : vector<1x32xf32>
      %383 = arith.truncf %382 : vector<1x32xf32> to vector<1x32xbf16>
      %c0_168 = arith.constant 0 : index
      %c0_169 = arith.constant 0 : index
      %384 = vector.load %arg34[%c0_168, %c0_169] : memref<32x128xbf16, #tpu.memory_space<vmem>>, vector<32x128xbf16>
      %cst_170 = arith.constant dense<0.000000e+00> : vector<1x128xf32>
      %385 = tpu.matmul %383, %384, %cst_170 {dimension_numbers = #tpu.dot_dimension_numbers<[1], [0], [0], [1], [0, 0, 1, 1], [], []>} : vector<1x32xbf16>, vector<32x128xbf16>, vector<1x128xf32> -> vector<1x128xf32>
      %c0_171 = arith.constant 0 : index
      %c0_172 = arith.constant 0 : index
      %386 = vector.load %arg35[%c0_171, %c0_172] : memref<1x128xf32, #tpu.memory_space<vmem>>, vector<1x128xf32>
      %387 = arith.addf %385, %386 : vector<1x128xf32>
      %388 = vector.shape_cast %387 : vector<1x128xf32> to vector<1x1x128xf32>
      %c0_173 = arith.constant 0 : index
      %c0_174 = arith.constant 0 : index
      %c0_175 = arith.constant 0 : index
      %389 = vector.load %arg36[%c0_173, %c0_174, %c0_175] : memref<1x1x128xf32, #tpu.memory_space<vmem>>, vector<1x1x128xf32>
      tpu.vector_store %arg36[%c0_173, %c0_174, %c0_175], %388 {strides = array<i32>} : memref<1x1x128xf32, #tpu.memory_space<vmem>>, vector<1x1x128xf32>,
    } else {
    }
    return
  }
  func.func @transform_0(%arg0: i32, %arg1: i32) -> (i32, i32, i32) {
    %c0_i32 = arith.constant 0 : i32
    %c0_i32_0 = arith.constant 0 : i32
    %c0_i32_1 = arith.constant 0 : i32
    return %arg0, %c0_i32, %c0_i32_0 : i32, i32, i32
  }
  func.func @transform_1(%arg0: i32, %arg1: i32) -> (i32, i32, i32) {
    %c0_i32 = arith.constant 0 : i32
    %c0_i32_0 = arith.constant 0 : i32
    %c0_i32_1 = arith.constant 0 : i32
    return %arg0, %c0_i32, %c0_i32_0 : i32, i32, i32
  }
  func.func @transform_2(%arg0: i32, %arg1: i32) -> (i32, i32, i32) {
    %c0_i32 = arith.constant 0 : i32
    %c0_i32_0 = arith.constant 0 : i32
    %c0_i32_1 = arith.constant 0 : i32
    return %arg0, %c0_i32, %c0_i32_0 : i32, i32, i32
  }
  func.func @transform_3(%arg0: i32, %arg1: i32) -> (i32, i32, i32) {
    %c0_i32 = arith.constant 0 : i32
    %c0_i32_0 = arith.constant 0 : i32
    %c0_i32_1 = arith.constant 0 : i32
    return %arg0, %c0_i32, %c0_i32_0 : i32, i32, i32
  }
  func.func @transform_4(%arg0: i32, %arg1: i32) -> (i32, i32) {
    %c0_i32 = arith.constant 0 : i32
    %c0_i32_0 = arith.constant 0 : i32
    %c0_i32_1 = arith.constant 0 : i32
    return %c0_i32, %c0_i32_0 : i32, i32
  }
  func.func @transform_5(%arg0: i32, %arg1: i32) -> (i32, i32) {
    %c0_i32 = arith.constant 0 : i32
    %c0_i32_0 = arith.constant 0 : i32
    %c0_i32_1 = arith.constant 0 : i32
    return %c0_i32, %c0_i32_0 : i32, i32
  }
  func.func @transform_6(%arg0: i32, %arg1: i32) -> (i32, i32, i32) {
    %c0_i32 = arith.constant 0 : i32
    %c0_i32_0 = arith.constant 0 : i32
    %c0_i32_1 = arith.constant 0 : i32
    return %arg1, %c0_i32, %c0_i32_0 : i32, i32, i32
  }
  func.func @transform_7(%arg0: i32, %arg1: i32) -> (i32, i32, i32) {
    %c0_i32 = arith.constant 0 : i32
    %c0_i32_0 = arith.constant 0 : i32
    %c0_i32_1 = arith.constant 0 : i32
    return %arg1, %c0_i32, %c0_i32_0 : i32, i32, i32
  }
  func.func @transform_8(%arg0: i32, %arg1: i32) -> (i32, i32, i32) {
    %c0_i32 = arith.constant 0 : i32
    %c0_i32_0 = arith.constant 0 : i32
    %c0_i32_1 = arith.constant 0 : i32
    return %arg1, %c0_i32, %c0_i32_0 : i32, i32, i32
  }
  func.func @transform_9(%arg0: i32, %arg1: i32) -> (i32, i32, i32) {
    %c0_i32 = arith.constant 0 : i32
    %c0_i32_0 = arith.constant 0 : i32
    %c0_i32_1 = arith.constant 0 : i32
    return %arg1, %c0_i32, %c0_i32_0 : i32, i32, i32
  }
  func.func @transform_10(%arg0: i32, %arg1: i32) -> (i32, i32, i32) {
    %c0_i32 = arith.constant 0 : i32
    %c0_i32_0 = arith.constant 0 : i32
    %c0_i32_1 = arith.constant 0 : i32
    return %arg1, %c0_i32, %c0_i32_0 : i32, i32, i32
  }
  func.func @transform_11(%arg0: i32, %arg1: i32) -> (i32, i32, i32) {
    %c0_i32 = arith.constant 0 : i32
    %c0_i32_0 = arith.constant 0 : i32
    %c0_i32_1 = arith.constant 0 : i32
    return %arg1, %c0_i32, %c0_i32_0 : i32, i32, i32
  }
  func.func @transform_12(%arg0: i32, %arg1: i32) -> (i32, i32, i32) {
    %c0_i32 = arith.constant 0 : i32
    %c0_i32_0 = arith.constant 0 : i32
    %c0_i32_1 = arith.constant 0 : i32
    return %arg1, %c0_i32, %c0_i32_0 : i32, i32, i32
  }
  func.func @transform_13(%arg0: i32, %arg1: i32) -> (i32, i32, i32) {
    %c0_i32 = arith.constant 0 : i32
    %c0_i32_0 = arith.constant 0 : i32
    %c0_i32_1 = arith.constant 0 : i32
    return %arg1, %c0_i32, %c0_i32_0 : i32, i32, i32
  }
  func.func @transform_14(%arg0: i32, %arg1: i32) -> (i32, i32, i32) {
    %c0_i32 = arith.constant 0 : i32
    %c0_i32_0 = arith.constant 0 : i32
    %c0_i32_1 = arith.constant 0 : i32
    return %arg1, %c0_i32, %c0_i32_0 : i32, i32, i32
  }
  func.func @transform_15(%arg0: i32, %arg1: i32) -> (i32, i32, i32) {
    %c0_i32 = arith.constant 0 : i32
    %c0_i32_0 = arith.constant 0 : i32
    %c0_i32_1 = arith.constant 0 : i32
    return %arg1, %c0_i32, %c0_i32_0 : i32, i32, i32
  }
  func.func @transform_16(%arg0: i32, %arg1: i32) -> (i32, i32, i32) {
    %c0_i32 = arith.constant 0 : i32
    %c0_i32_0 = arith.constant 0 : i32
    %c0_i32_1 = arith.constant 0 : i32
    return %arg1, %c0_i32, %c0_i32_0 : i32, i32, i32
  }
  func.func @transform_17(%arg0: i32, %arg1: i32) -> (i32, i32, i32) {
    %c0_i32 = arith.constant 0 : i32
    %c0_i32_0 = arith.constant 0 : i32
    %c0_i32_1 = arith.constant 0 : i32
    return %arg1, %c0_i32, %c0_i32_0 : i32, i32, i32
  }
  func.func @transform_18(%arg0: i32, %arg1: i32) -> (i32, i32, i32) {
    %c0_i32 = arith.constant 0 : i32
    %c0_i32_0 = arith.constant 0 : i32
    %c0_i32_1 = arith.constant 0 : i32
    return %arg1, %c0_i32, %c0_i32_0 : i32, i32, i32
  }
  func.func @transform_19(%arg0: i32, %arg1: i32) -> (i32, i32, i32) {
    %c0_i32 = arith.constant 0 : i32
    %c0_i32_0 = arith.constant 0 : i32
    %c0_i32_1 = arith.constant 0 : i32
    return %arg1, %c0_i32, %c0_i32_0 : i32, i32, i32
  }
  func.func @transform_20(%arg0: i32, %arg1: i32) -> (i32, i32, i32) {
    %c0_i32 = arith.constant 0 : i32
    %c0_i32_0 = arith.constant 0 : i32
    %c0_i32_1 = arith.constant 0 : i32
    return %arg1, %c0_i32, %c0_i32_0 : i32, i32, i32
  }
  func.func @transform_21(%arg0: i32, %arg1: i32) -> (i32, i32, i32) {
    %c0_i32 = arith.constant 0 : i32
    %c0_i32_0 = arith.constant 0 : i32
    %c0_i32_1 = arith.constant 0 : i32
    return %arg1, %c0_i32, %c0_i32_0 : i32, i32, i32
  }
  func.func @transform_22(%arg0: i32, %arg1: i32) -> (i32, i32, i32) {
    %c0_i32 = arith.constant 0 : i32
    %c0_i32_0 = arith.constant 0 : i32
    %c0_i32_1 = arith.constant 0 : i32
    return %arg1, %c0_i32, %c0_i32_0 : i32, i32, i32
  }
  func.func @transform_23(%arg0: i32, %arg1: i32) -> (i32, i32, i32) {
    %c0_i32 = arith.constant 0 : i32
    %c0_i32_0 = arith.constant 0 : i32
    %c0_i32_1 = arith.constant 0 : i32
    return %arg1, %c0_i32, %c0_i32_0 : i32, i32, i32
  }
  func.func @transform_24(%arg0: i32, %arg1: i32) -> (i32, i32, i32) {
    %c0_i32 = arith.constant 0 : i32
    %c0_i32_0 = arith.constant 0 : i32
    %c0_i32_1 = arith.constant 0 : i32
    return %arg1, %c0_i32, %c0_i32_0 : i32, i32, i32
  }
  func.func @transform_25(%arg0: i32, %arg1: i32) -> (i32, i32, i32) {
    %c0_i32 = arith.constant 0 : i32
    %c0_i32_0 = arith.constant 0 : i32
    %c0_i32_1 = arith.constant 0 : i32
    return %arg1, %c0_i32, %c0_i32_0 : i32, i32, i32
  }
  func.func @transform_26(%arg0: i32, %arg1: i32) -> (i32, i32) {
    %c0_i32 = arith.constant 0 : i32
    %c0_i32_0 = arith.constant 0 : i32
    %c0_i32_1 = arith.constant 0 : i32
    return %c0_i32, %c0_i32_0 : i32, i32
  }
  func.func @transform_27(%arg0: i32, %arg1: i32) -> (i32, i32) {
    %c0_i32 = arith.constant 0 : i32
    %c0_i32_0 = arith.constant 0 : i32
    %c0_i32_1 = arith.constant 0 : i32
    return %c0_i32, %c0_i32_0 : i32, i32
  }
  func.func @transform_28(%arg0: i32, %arg1: i32) -> (i32, i32) {
    %c0_i32 = arith.constant 0 : i32
    %c0_i32_0 = arith.constant 0 : i32
    %c0_i32_1 = arith.constant 0 : i32
    return %c0_i32, %c0_i32_0 : i32, i32
  }
  func.func @transform_29(%arg0: i32, %arg1: i32) -> (i32, i32) {
    %c0_i32 = arith.constant 0 : i32
    %c0_i32_0 = arith.constant 0 : i32
    %c0_i32_1 = arith.constant 0 : i32
    return %c0_i32, %c0_i32_0 : i32, i32
  }
  func.func @transform_30(%arg0: i32, %arg1: i32) -> (i32, i32) {
    %c0_i32 = arith.constant 0 : i32
    %c0_i32_0 = arith.constant 0 : i32
    %c0_i32_1 = arith.constant 0 : i32
    return %c0_i32, %c0_i32_0 : i32, i32
  }
  func.func @transform_31(%arg0: i32, %arg1: i32) -> (i32, i32) {
    %c0_i32 = arith.constant 0 : i32
    %c0_i32_0 = arith.constant 0 : i32
    %c0_i32_1 = arith.constant 0 : i32
    return %c0_i32, %c0_i32_0 : i32, i32
  }
  func.func @transform_32(%arg0: i32, %arg1: i32) -> (i32, i32) {
    %c0_i32 = arith.constant 0 : i32
    %c0_i32_0 = arith.constant 0 : i32
    %c0_i32_1 = arith.constant 0 : i32
    return %c0_i32, %c0_i32_0 : i32, i32
  }
  func.func @transform_33(%arg0: i32, %arg1: i32) -> (i32, i32) {
    %c0_i32 = arith.constant 0 : i32
    %c0_i32_0 = arith.constant 0 : i32
    %c0_i32_1 = arith.constant 0 : i32
    return %c0_i32, %c0_i32_0 : i32, i32
  }
  func.func @transform_34(%arg0: i32, %arg1: i32) -> (i32, i32, i32) {
    %c0_i32 = arith.constant 0 : i32
    %c0_i32_0 = arith.constant 0 : i32
    %c0_i32_1 = arith.constant 0 : i32
    return %arg0, %c0_i32, %c0_i32_0 : i32, i32, i32
  }
}

</mosaic_0001>

<bundles_post_ra>
// kernel: tpu_custom_call.1
= control target key start
LH: loop header
LB: loop body
LE: loop exit
PB: predicated region body
PF: predicated region fallthrough
CT: control target
= control target key end

     0   :  { %s6979_s6 = smov 1   ;;  %s6980_s10 = smov 2   ;;  %s8693_s0 = inlined_call_operand.smem [shape: u32[35], index: -1, kind: input, shape index: {}] }
   0x1   :  { %s7081_s5 = sld [smem:[%s8693_s0]]   ;;  %s6981_s14 = smov 3  }
   0x2   :  { %s7086_s9 = sld [smem:[%s8693_s0 + %s6979_s6]]   ;;  %s6982_s18 = smov 4  }
   0x3   :  { %s7091_s13 = sld [smem:[%s8693_s0 + %s6980_s10]]   ;;  %s6983_s22 = smov 5  }
   0x4   :  { %s7096_s17 = sld [smem:[%s8693_s0 + %s6981_s14]]   ;;  %s6984_s26 = smov 6  }
   0x5   :  { %s7101_s21 = sld [smem:[%s8693_s0 + %s6982_s18]]   ;;  %s6985_s30 = smov 7  }
   0x6   :  { %s7106_s25 = sld [smem:[%s8693_s0 + %s6983_s22]]   ;;  %s6986_s4 = smov 8  }
   0x7   :  { %8775 = sst [smem:[#allocation77_spill]] %s7081_s5  ;;  %s6987_s10 = smov 9  }
   0x8   :  { %8776 = sst [smem:[#allocation78_spill]] %s7086_s9  ;;  %s6988_s15 = smov 10  }
   0x9   :  { %8777 = sst [smem:[#allocation79_spill]] %s7091_s13  ;;  %s6989_s20 = smov 11  }
   0xa   :  { %8778 = sst [smem:[#allocation80_spill]] %s7096_s17  ;;  %s6991_s1 = smov 13  }
   0xb   :  { %8779 = sst [smem:[#allocation81_spill]] %s7101_s21  ;;  %s6992_s7 = smov 14  }
   0xc   :  { %8780 = sst [smem:[#allocation82_spill]] %s7106_s25  ;;  %s6994_s22 = smov 16  }
   0xd   :  { %s7111_s29 = sld [smem:[%s8693_s0 + %s6984_s26]]   ;;  %s6990_s26 = smov 12  }
   0xe   :  { %s7116_s3 = sld [smem:[%s8693_s0 + %s6985_s30]]   ;;  %s6995_s28 = smov 17  }
   0xf   :  { %s7121_s8 = sld [smem:[%s8693_s0 + %s6986_s4]]  }
  0x10   :  { %s7126_s14 = sld [smem:[%s8693_s0 + %s6987_s10]]  }
  0x11   :  { %s7131_s19 = sld [smem:[%s8693_s0 + %s6988_s15]]   ;;  %s6993_s15 = smov 15  }
  0x12   :  { %s7136_s24 = sld [smem:[%s8693_s0 + %s6989_s20]]  }
  0x13   :  { %8781 = sst [smem:[#allocation83_spill]] %s7111_s29 }
  0x14   :  { %8782 = sst [smem:[#allocation84_spill]] %s7116_s3 }
  0x15   :  { %8783 = sst [smem:[#allocation85_spill]] %s7121_s8 }
  0x16   :  { %8784 = sst [smem:[#allocation86_spill]] %s7126_s14 }
  0x17   :  { %8785 = sst [smem:[#allocation87_spill]] %s7131_s19 }
  0x18   :  { %8786 = sst [smem:[#allocation88_spill]] %s7136_s24 }
  0x19   :  { %s7141_s30 = sld [smem:[%s8693_s0 + %s6990_s26]]  }
  0x1a   :  { %s7146_s6 = sld [smem:[%s8693_s0 + %s6991_s1]]  }
  0x1b   :  { %s7151_s12 = sld [smem:[%s8693_s0 + %s6992_s7]]   ;;  %s6996_s7 = smov 18  }
  0x1c   :  { %s7156_s20 = sld [smem:[%s8693_s0 + %s6993_s15]]   ;;  %s6997_s15 = smov 19  }
  0x1d   :  { %s7161_s27 = sld [smem:[%s8693_s0 + %s6994_s22]]   ;;  %s6998_s22 = smov 20  }
  0x1e   :  { %s7166_s4 = sld [smem:[%s8693_s0 + %s6995_s28]]   ;;  %s6999_s28 = smov 21  }
  0x1f   :  { %8787 = sst [smem:[#allocation89_spill]] %s7141_s30 }
  0x20   :  { %8788 = sst [smem:[#allocation90_spill]] %s7146_s6 }
  0x21   :  { %8789 = sst [smem:[#allocation91_spill]] %s7151_s12 }
  0x22   :  { %8790 = sst [smem:[#allocation92_spill]] %s7156_s20 }
  0x23   :  { %8791 = sst [smem:[#allocation93_spill]] %s7161_s27 }
  0x24   :  { %8792 = sst [smem:[#allocation94_spill]] %s7166_s4 }
  0x25   :  { %s7171_s12 = sld [smem:[%s8693_s0 + %s6996_s7]]   ;;  %s7000_s7 = smov 22  }
  0x26   :  { %s7176_s20 = sld [smem:[%s8693_s0 + %s6997_s15]]   ;;  %s7001_s15 = smov 23  }
  0x27   :  { %s7181_s27 = sld [smem:[%s8693_s0 + %s6998_s22]]   ;;  %s7002_s22 = smov 24  }
  0x28   :  { %s7186_s4 = sld [smem:[%s8693_s0 + %s6999_s28]]   ;;  %s7003_s28 = smov 25  }
  0x2b   :  { %8793 = sst [smem:[#allocation95_spill]] %s7171_s12 }
  0x2c   :  { %8794 = sst [smem:[#allocation96_spill]] %s7176_s20 }
  0x2d   :  { %8795 = sst [smem:[#allocation97_spill]] %s7181_s27 }
  0x2e   :  { %8796 = sst [smem:[#allocation98_spill]] %s7186_s4 }
  0x2f   :  { %s7191_s12 = sld [smem:[%s8693_s0 + %s7000_s7]]   ;;  %s7004_s7 = smov 26  }
  0x30   :  { %s7196_s20 = sld [smem:[%s8693_s0 + %s7001_s15]]   ;;  %s7005_s15 = smov 27  }
  0x31   :  { %s7201_s27 = sld [smem:[%s8693_s0 + %s7002_s22]]   ;;  %s7006_s22 = smov 28  }
  0x32   :  { %s7206_s4 = sld [smem:[%s8693_s0 + %s7003_s28]]   ;;  %s7007_s28 = smov 29  }
  0x35   :  { %8797 = sst [smem:[#allocation99_spill]] %s7191_s12 }
  0x36   :  { %8798 = sst [smem:[#allocation100_spill]] %s7196_s20 }
  0x37   :  { %8799 = sst [smem:[#allocation101_spill]] %s7201_s27 }
  0x38   :  { %8800 = sst [smem:[#allocation102_spill]] %s7206_s4 }
  0x39   :  { %s7211_s12 = sld [smem:[%s8693_s0 + %s7004_s7]]   ;;  %s7008_s7 = smov 30  }
  0x3a   :  { %s7216_s20 = sld [smem:[%s8693_s0 + %s7005_s15]]   ;;  %s7009_s15 = smov 31  }
  0x3b   :  { %s7221_s27 = sld [smem:[%s8693_s0 + %s7006_s22]]   ;;  %s7010_s22 = smov 32  }
  0x3c   :  { %s7226_s4 = sld [smem:[%s8693_s0 + %s7007_s28]]   ;;  %s7011_s28 = smov 33  }
  0x3d   :  { %s7231_s6 = sld [smem:[%s8693_s0 + %s7008_s7]]   ;;  %s7012_s7 = smov 34  }
  0x3e   :  { %s7236_s30 = sld [smem:[%s8693_s0 + %s7009_s15]]  }
  0x3f   :  { %8801 = sst [smem:[#allocation103_spill]] %s7211_s12 }
  0x40   :  { %8802 = sst [smem:[#allocation104_spill]] %s7216_s20 }
  0x41   :  { %8803 = sst [smem:[#allocation105_spill]] %s7221_s27 }
  0x42   :  { %8804 = sst [smem:[#allocation106_spill]] %s7226_s4 }
  0x43   :  { %8805 = sst [smem:[#allocation107_spill]] %s7231_s6 }
  0x44   :  { %8806 = sst [smem:[#allocation108_spill]] %s7236_s30 }
  0x45   :  { %s7241_s24 = sld [smem:[%s8693_s0 + %s7010_s22]]  }
  0x46   :  { %s7246_s19 = sld [smem:[%s8693_s0 + %s7011_s28]]  }
  0x47   :  { %s7251_s14 = sld [smem:[%s8693_s0 + %s7012_s7]]  }
  0x4b   :  { %8807 = sst [smem:[#allocation109_spill]] %s7241_s24 }
  0x4c   :  { %8808 = sst [smem:[#allocation110_spill]] %s7246_s19 }
  0x4d   :  { %8809 = sst [smem:[#allocation111_spill]] %s7251_s14 }
  0x4e   :  { %74 = vsyncpa [#allocation4], 0 }
  0x4f   :  { %76 = vsyncpa [#allocation4 + $0x1], 0 }
  0x50   :  { %77 = vsyncpa [#allocation7], 0 }
  0x51   :  { %79 = vsyncpa [#allocation7 + $0x1], 0 }
  0x52   :  { %80 = vsyncpa [#allocation10], 0 }
  0x53   :  { %82 = vsyncpa [#allocation10 + $0x1], 0 }
  0x54   :  { %83 = vsyncpa [#allocation13], 0 }
  0x55   :  { %84 = vsyncpa [#allocation37], 0 }
  0x56   :  { %85 = vsyncpa [#allocation40], 0 }
  0x57   :  { %86 = vsyncpa [#allocation43], 0 }
  0x58   :  { %87 = vsyncpa [#allocation5], 0 }
  0x59   :  { %89 = vsyncpa [#allocation5 + $0x1], 0  ;;  %s7253_s15 = smov 0   ;;  %s7255_s16 = smov 0  }
  0x5a   :  { %s7257_s18 = smov 0   ;;  %s7259_s0 = smov 0  }
  0x5b   :  { %s7261_s22 = smov 0   ;;  %s7263_s23 = smov 0  }
  0x5c   :  { %s7265_s26 = smov 0   ;;  %s7267_s28 = smov 0  }
  0x5d   :  { %s7269_s1 = smov 0   ;;  %s7271_s2 = smov 0  }
  0x5e   :  { %s7273_s7 = smov 0  }
  0x5f LB: > { %s8810_s30 = sld [smem:[#allocation108_spill]]  ;;  %s8811_s27 = sld [smem:[#allocation105_spill]]  ;;  %s6977_s7 = sphi %s7273_s7, %s95_s7   ;;  %s6973_s2 = sphi %s7271_s2, %s8941_s2   ;;  %s6969_s1 = sphi %s7269_s1, %s8940_s1   ;;  %s6965_s28 = sphi %s7267_s28, %s8939_s28   ;;  %s6961_s26 = sphi %s7265_s26, %s8938_s26   ;;  %s6957_s23 = sphi %s7263_s23, %s8937_s23   ;;  %s6953_s22 = sphi %s7261_s22, %s8946_s22   ;;  %s6949_s0 = sphi %s7259_s0, %s8945_s0   ;;  %s6945_s18 = sphi %s7257_s18, %s8944_s18   ;;  %s6941_s16 = sphi %s7255_s16, %s8943_s16   ;;  %s6937_s15 = sphi %s7253_s15, %s8942_s15  }
  0x60   : > { %s8812_s24 = sld [smem:[#allocation109_spill]]  ;;  %s8813_s20 = sld [smem:[#allocation104_spill]] }
  0x61   : > { %s8814_s19 = sld [smem:[#allocation110_spill]]  ;;  %s8815_s12 = sld [smem:[#allocation103_spill]] }
  0x62   : > { %s8816_s9 = sld [smem:[#allocation78_spill]]  ;;  %s8817_s6 = sld [smem:[#allocation107_spill]] }
  0x63   : > { %s8818_s4 = sld [smem:[#allocation106_spill]]  ;;  %s8820_s21 = sld [smem:[#allocation81_spill]] }
  0x64   : > { %s8819_s25 = sld [smem:[#allocation82_spill]]  ;;  %8821 = sst [smem:[#allocation112_spill]] %s6949_s0 }
  0x65   : > { %8822 = sst [smem:[#allocation113_spill]] %s6957_s23  ;;  %s7309_s10 = sadd.s32 4294967295, %s6977_s7  }
  0x66   : > { %8823 = sst [smem:[#allocation114_spill]] %s6961_s26  ;;  %s4903_s11 = sadd.s32 4294967294, %s6977_s7  }
  0x67   : > { %8824 = sst [smem:[#allocation115_spill]] %s6965_s28  ;;  %s104_s14 = sadd.s32 1, %s6969_s1 }
  0x68   : > { %8825 = sst [smem:[#allocation116_spill]] %s6969_s1  ;;  %s107_s28 = sadd.s32 1, %s6973_s2 }
  0x69   : > { %8826 = sst [smem:[#allocation117_spill]] %s6973_s2  ;;  %p105_p0 = scmp.ge.s32.totalorder %s104_s14, 2 }
  0x6a   : > { %s114_s26 = sadd.s32 1, %s6957_s23  ;;  %p8724_p1 = scmp.ne.s32.totalorder %s6957_s23, %s6953_s22 }
  0x6b   : > { %p122_p2 = scmp.eq.s32.totalorder %s6977_s7, 0  ;;  %s8948_s14 = smov (%p105_p0, %s104_s14), 0 }
  0x6c   : > { %8827 = sst [smem:[#allocation118_spill]] %s8948_s14  ;;  %s8950_s28 = smov (!%p105_p0, %s107_s28), %s6973_s2 }
  0x6d   : > { %p7326_p3 = por %p122_p2, %p8724_p1  ;;  %p8723_p4 = scmp.ne.s32.totalorder %s6953_s22, %s6949_s0 }
  0x6e   : > { %p109_p5 = scmp.ge.s32.totalorder %s8950_s28, 2  ;;  %p8728_p6 = scmp.eq.s32.totalorder %s7309_s10, 0 }
  0x6f   : > { %s8828_s8 = scalar_select %p7326_p3, 1, 0 }
  0x70   : > { %s257_s3 = ssub.s32 %s6969_s1, %s8948_s14  ;;  %s260_s29 = sadd.s32 1, %s6945_s18 }
  0x71   : > { %8829 = sst [smem:[#allocation119_spill]] %s8828_s8  ;;  %s8952_s28 = smov (%p109_p5, %s8950_s28), 0 }
  0x72   : > { %8830 = sst [smem:[#allocation120_spill]] %s8952_s28  ;;  %p7343_p7 = por %p8728_p6, %p8723_p4 }
  0x73   : > { %p258_p8 = scmp.eq.s32.totalorder %s257_s3, 0  ;;  %s111_s13 = ssub.s32 %s6973_s2, %s8952_s28 }
  0x74   : > { %s8831_s17 = scalar_select %p7343_p7, 1, 0 }
  0x75   : > { %p267_p9 = scmp.ne.s32.totalorder %s6945_s18, %s6941_s16  ;;  %p112_p10 = scmp.eq.s32.totalorder %s111_s13, 0 }
  0x76   : > { %p273_p11 = scmp.ne.s32.totalorder %s6941_s16, %s6937_s15  ;;  %p959_p0 = scmp.eq.s32.totalorder %s7309_s10, 3 }
  0x77   : > { %s7354_s14 = scalar_select %p258_p8, %s6945_s18, %s260_s29  }
  0x78   : > { %s7357_s1 = scalar_select %p112_p10, %s6957_s23, %s114_s26  }
  0x79   : > { %8832 = sst [smem:[#allocation121_spill]] %s7354_s14  ;;  %p7361_p12 = por %p267_p9, %p122_p2 }
  0x7a   : > { %8833 = sst [smem:[#allocation122_spill]] %s7357_s1  ;;  %p7367_p13 = por %p273_p11, %p8728_p6 }
  0x7b   : > { %s8834_s5 = scalar_select %p7361_p12, 1, 0 }
  0x7c   : > { %s8835_s8 = scalar_select %p7367_p13, 1, 0 }
  0x7d   : > { %p965_p5 = scmp.eq.s32.totalorder %s4903_s11, 3  ;;  %p4904_p4 = scmp.ge.s32.totalorder %s6977_s7, 1 }
  0x7e   : > { %p972_p1 = scmp.lt.s32.totalorder %s6977_s7, 5  ;;  %p8836_p8 = scmp.ne.s32.totalorder %s6957_s23, %s6953_s22 }
  0x7f   : > { %p8839_p2 = scmp.ne.s32.totalorder %s6953_s22, %s6949_s0  ;;  %s7013_s15 = smov [#allocation11]  }
  0x80   : > { %p7377_p7 = por %p959_p0, %p8836_p8  ;;  %p7388_p10 = pnand %p4904_p4, %p972_p1 }
  0x81   : > { %p7384_p9 = por %p965_p5, %p8839_p2  ;;  %s984_s26 = sshll.u32 %s7013_s15, 4  ;;  %s985_s26 = int_to_ptr.vmem [resolvable:$true] %s984_s26 }
  0x82   : > { %s8837_s13 = scalar_select %p7377_p7, 1, 0 }
  0x83   : > { %s8840_s29 = scalar_select %p7384_p9, 1, 0 }
  0x84   : > { %8838 = sst [smem:[#allocation123_spill]] %s8837_s13  ;;  %p5483_p11 = pneg %p7388_p10 }
  0x85   : > { %8841 = sst [smem:[#allocation124_spill]] %s8840_s29  ;;  %s7014_s28 = smov [#allocation12]  }
  0x86   : > { %s8842_s3 = scalar_select %p7388_p10, 1, 0 }
  0x87   : > { %p7396_p0 = pnand %p5483_p11, %p8728_p6  ;;  %s998_s1 = sshll.u32 %s7014_s28, 4  ;;  %s7400_s1 = int_to_ptr.vmem [resolvable:$true] %s998_s1 }
  0x88   : > { %s5787_s14 = scalar_lea.hbm %s8820_s21, 256 }
  0x89   : > { %p5788_p1 = scmp.ne.s32.totalorder %s8820_s21, %s5787_s14  ;;  %p7406_p4 = pneg %p7396_p0 }
  0x8a   : > { %p5794_p2 = scmp.lt.u32.totalorder %s5787_s14, %s8820_s21 }
  0x8b   : > { %p5790_p5 = pnand %p7406_p4, %p5788_p1 }
  0x8d   : > { %p5791_p8 = pneg %p5790_p5 }
  0x8f   : > { %p5796_p11 = pnand %p5794_p2, %p5791_p8 }
  0x91   : > { %5799 = shalt.err (!%p5796_p11)
}
  0x92   : > { %s5800_s15 = scalar_lea.vmem %s985_s26, 256  ;;  %p5808_p13 = scmp.lt.s32.totalorder %s985_s26, %s985_s26 }
  0x93   : > { %p5801_p6 = scmp.ne.s32.totalorder %s985_s26, %s5800_s15  ;;  %p5809_p10 = scmp.lt.s32.totalorder %s5800_s15, %s5800_s15 }
  0x95   : > { %p5803_p9 = pnand %p5801_p6, %p7406_p4  ;;  %p5810_p12 = por %p5809_p10, %p5808_p13 }
  0x97   : > { %p5804_p7 = pneg %p5803_p9 }
  0x99   : > { %p5811_p3 = pnand %p5810_p12, %p5804_p7 }
  0x9b   : > { %5814 = shalt.err (!%p5811_p3)
}
  0x9c   : > { %s8737_s28 = smov 64   ;;  %s8739_s14 = smov 4  }
  0x9d   : > { %5486 = dma.hbm_to_vmem [thread:$0]  (!%p7396_p0), %s8820_s21, 256, %s985_s26, [#allocation10], %s8737_s28, %s8737_s28, %s8739_s14  }
  0x9e   : > { %s5815_s0 = scalar_lea.hbm %s8819_s25, 16 }
  0x9f   : > { %p5816_p6 = scmp.ne.s32.totalorder %s8819_s25, %s5815_s0  ;;  %p5822_p7 = scmp.lt.u32.totalorder %s5815_s0, %s8819_s25 }
  0xa1   : > { %p5818_p9 = pnand %p5816_p6, %p7406_p4 }
  0xa3   : > { %p5819_p13 = pneg %p5818_p9 }
  0xa5   : > { %p5824_p3 = pnand %p5822_p7, %p5819_p13 }
  0xa7   : > { %5827 = shalt.err (!%p5824_p3)
}
  0xa8   : > { %s5828_s15 = scalar_lea.vmem %s7400_s1, 16  ;;  %s5835_s13 = scalar_lea.vmem %s7400_s1, 32 }
  0xa9   : > { %p5829_p12 = scmp.ne.s32.totalorder %s7400_s1, %s5828_s15  ;;  %p5836_p5 = scmp.lt.s32.totalorder %s7400_s1, %s7400_s1 }
  0xaa   : > { %p5837_p8 = scmp.lt.s32.totalorder %s5835_s13, %s5828_s15 }
  0xab   : > { %p5831_p10 = pnand %p5829_p12, %p7406_p4 }
  0xac   : > { %p5838_p2 = por %p5837_p8, %p5836_p5 }
  0xad   : > { %p5832_p1 = pneg %p5831_p10 }
  0xaf   : > { %p5839_p11 = pnand %p5838_p2, %p5832_p1 }
  0xb1   : > { %5842 = shalt.err (!%p5839_p11)
}
  0xb2   : > { %5489 = dma.hbm_to_vmem [thread:$0]  (!%p7396_p0), %s8819_s25, 16, %s7400_s1, [#allocation13]  }
  0xb3   : > { %s7017_s0 = smov [#allocation36]   ;;  %s7018_s28 = smov [#allocation39]  }
  0xb4   : > { %s1032_s26 = sshll.u32 %s7017_s0, 4  ;;  %s1056_s14 = sshll.u32 %s7018_s28, 4  ;;  %s1033_s26 = int_to_ptr.vmem [resolvable:$true] %s1032_s26  ;;  %s1057_s14 = int_to_ptr.vmem [resolvable:$true] %s1056_s14 }
  0xb5   : > { %s5843_s21 = scalar_lea.hbm %s8811_s27, 2048 }
  0xb6   : > { %p5844_p6 = scmp.ne.s32.totalorder %s8811_s27, %s5843_s21  ;;  %p5850_p7 = scmp.lt.u32.totalorder %s5843_s21, %s8811_s27 }
  0xb8   : > { %p5846_p9 = pnand %p5844_p6, %p7406_p4 }
  0xba   : > { %p5847_p13 = pneg %p5846_p9 }
  0xbc   : > { %p5852_p3 = pnand %p5850_p7, %p5847_p13 }
  0xbe   : > { %5855 = shalt.err (!%p5852_p3)
}
  0xbf   : > { %s5856_s13 = scalar_lea.vmem %s1033_s26, 2048  ;;  %p5864_p5 = scmp.lt.s32.totalorder %s1033_s26, %s1033_s26 }
  0xc0   : > { %p5857_p12 = scmp.ne.s32.totalorder %s1033_s26, %s5856_s13  ;;  %p5865_p8 = scmp.lt.s32.totalorder %s5856_s13, %s5856_s13 }
  0xc2   : > { %p5859_p10 = pnand %p5857_p12, %p7406_p4  ;;  %p5866_p2 = por %p5865_p8, %p5864_p5 }
  0xc4   : > { %p5860_p1 = pneg %p5859_p10 }
  0xc6   : > { %p5867_p11 = pnand %p5866_p2, %p5860_p1 }
  0xc8   : > { %5870 = shalt.err (!%p5867_p11)
}
  0xc9   : > { %s8845_s1 = smov 4   ;;  %s8846_s28 = smov 64  }
  0xca   : > { %5498 = dma.hbm_to_vmem [thread:$0]  (!%p7396_p0), %s8811_s27, 2048, %s1033_s26, [#allocation37], %s8846_s28, %s8846_s28, %s8845_s1  }
  0xcb   : > { %s5871_s21 = scalar_lea.hbm %s8817_s6, 512 }
  0xcc   : > { %p5872_p6 = scmp.ne.s32.totalorder %s8817_s6, %s5871_s21  ;;  %p5878_p7 = scmp.lt.u32.totalorder %s5871_s21, %s8817_s6 }
  0xce   : > { %p5874_p9 = pnand %p5872_p6, %p7406_p4 }
  0xd0   : > { %p5875_p13 = pneg %p5874_p9 }
  0xd2   : > { %p5880_p3 = pnand %p5878_p7, %p5875_p13 }
  0xd4   : > { %5883 = shalt.err (!%p5880_p3)
}
  0xd5   : > { %s5884_s15 = scalar_lea.vmem %s1057_s14, 512  ;;  %p5892_p5 = scmp.lt.s32.totalorder %s1057_s14, %s1057_s14 }
  0xd6   : > { %p5885_p12 = scmp.ne.s32.totalorder %s1057_s14, %s5884_s15  ;;  %p5893_p8 = scmp.lt.s32.totalorder %s5884_s15, %s5884_s15 }
  0xd8   : > { %p5887_p10 = pnand %p5885_p12, %p7406_p4  ;;  %p5894_p2 = por %p5893_p8, %p5892_p5 }
  0xda   : > { %p5888_p1 = pneg %p5887_p10 }
  0xdc   : > { %p5895_p11 = pnand %p5894_p2, %p5888_p1 }
  0xde   : > { %5898 = shalt.err (!%p5895_p11)
}
  0xdf   : > { %5504 = dma.hbm_to_vmem [thread:$0]  (!%p7396_p0), %s8817_s6, 512, %s1057_s14, [#allocation40], %s8846_s28, %s8846_s28, %s8845_s1  }
  0xe0   : > { %s7019_s0 = smov [#allocation42]   ;;  %s7020_s13 = smov [#allocation34]  }
  0xe1   : > { %s1080_s26 = sshll.u32 %s7019_s0, 4  ;;  %s1008_s21 = sshll.u32 %s7020_s13, 4  ;;  %s1081_s26 = int_to_ptr.vmem [resolvable:$true] %s1080_s26  ;;  %s1009_s21 = int_to_ptr.vmem [resolvable:$true] %s1008_s21 }
  0xe2   : > { %s5899_s15 = scalar_lea.hbm %s8812_s24, 256 }
  0xe3   : > { %p5900_p6 = scmp.ne.s32.totalorder %s8812_s24, %s5899_s15  ;;  %p5906_p7 = scmp.lt.u32.totalorder %s5899_s15, %s8812_s24 }
  0xe5   : > { %p5902_p9 = pnand %p5900_p6, %p7406_p4 }
  0xe7   : > { %p5903_p13 = pneg %p5902_p9 }
  0xe9   : > { %p5908_p3 = pnand %p5906_p7, %p5903_p13 }
  0xeb   : > { %5911 = shalt.err (!%p5908_p3)
}
  0xec   : > { %s5912_s25 = scalar_lea.vmem %s1081_s26, 256  ;;  %p5920_p5 = scmp.lt.s32.totalorder %s1081_s26, %s1081_s26 }
  0xed   : > { %p5913_p12 = scmp.ne.s32.totalorder %s1081_s26, %s5912_s25  ;;  %p5921_p8 = scmp.lt.s32.totalorder %s5912_s25, %s5912_s25 }
  0xef   : > { %p5915_p10 = pnand %p5913_p12, %p7406_p4  ;;  %p5922_p2 = por %p5921_p8, %p5920_p5 }
  0xf1   : > { %p5916_p1 = pneg %p5915_p10 }
  0xf3   : > { %p5923_p11 = pnand %p5922_p2, %p5916_p1 }
  0xf5   : > { %5926 = shalt.err (!%p5923_p11)
}
  0xf6   : > { %5510 = dma.hbm_to_vmem [thread:$0]  (!%p7396_p0), %s8812_s24, 256, %s1081_s26, [#allocation43], %s8846_s28, %s8846_s28, %s8845_s1  }
  0xf7   : > { %s5927_s14 = scalar_lea.hbm %s8815_s12, 512 }
  0xf8   : > { %p5928_p6 = scmp.ne.s32.totalorder %s8815_s12, %s5927_s14  ;;  %p5934_p7 = scmp.lt.u32.totalorder %s5927_s14, %s8815_s12 }
  0xfa   : > { %p5930_p9 = pnand %p5928_p6, %p7406_p4 }
  0xfc   : > { %p5931_p13 = pneg %p5930_p9 }
  0xfe   : > { %p5936_p3 = pnand %p5934_p7, %p5931_p13 }
 0x100   : > { %5939 = shalt.err (!%p5936_p3)
}
 0x101   : > { %s5940_s25 = scalar_lea.vmem %s1009_s21, 512  ;;  %p5948_p5 = scmp.lt.s32.totalorder %s1009_s21, %s1009_s21 }
 0x102   : > { %p5941_p12 = scmp.ne.s32.totalorder %s1009_s21, %s5940_s25  ;;  %p5949_p8 = scmp.lt.s32.totalorder %s5940_s25, %s5940_s25 }
 0x104   : > { %p5943_p10 = pnand %p5941_p12, %p7406_p4  ;;  %p5950_p2 = por %p5949_p8, %p5948_p5 }
 0x106   : > { %p5944_p1 = pneg %p5943_p10 }
 0x108   : > { %p5951_p11 = pnand %p5950_p2, %p5944_p1 }
 0x10a   : > { %5954 = shalt.err (!%p5951_p11)
}
 0x10b   : > { %s7021_s1 = smov 128   ;;  %s7022_s28 = smov 8  }
 0x10c   : > { %5492 = dma.hbm_to_vmem [thread:$0]  (!%p7396_p0), %s8815_s12, 512, %s1009_s21, [#allocation10], %s7021_s1, %s7021_s1, %s7022_s28  }
 0x10d   : > { %s7023_s0 = smov [#allocation35]   ;;  %s7024_s13 = smov [#allocation38]  }
 0x10e   : > { %s1022_s26 = sshll.u32 %s7023_s0, 4  ;;  %s1046_s15 = sshll.u32 %s7024_s13, 4  ;;  %s1023_s26 = int_to_ptr.vmem [resolvable:$true] %s1022_s26  ;;  %s1047_s15 = int_to_ptr.vmem [resolvable:$true] %s1046_s15 }
 0x10f   : > { %s5955_s14 = scalar_lea.hbm %s8813_s20, 32 }
 0x110   : > { %p5956_p6 = scmp.ne.s32.totalorder %s8813_s20, %s5955_s14  ;;  %p5962_p7 = scmp.lt.u32.totalorder %s5955_s14, %s8813_s20 }
 0x112   : > { %p5958_p9 = pnand %p5956_p6, %p7406_p4 }
 0x114   : > { %p5959_p13 = pneg %p5958_p9 }
 0x116   : > { %p5964_p3 = pnand %p5962_p7, %p5959_p13 }
 0x118   : > { %5967 = shalt.err (!%p5964_p3)
}
 0x119   : > { %s5968_s25 = scalar_lea.vmem %s1023_s26, 32  ;;  %p5976_p5 = scmp.lt.s32.totalorder %s1023_s26, %s1023_s26 }
 0x11a   : > { %p5969_p12 = scmp.ne.s32.totalorder %s1023_s26, %s5968_s25  ;;  %p5977_p8 = scmp.lt.s32.totalorder %s5968_s25, %s5968_s25 }
 0x11c   : > { %p5971_p10 = pnand %p5969_p12, %p7406_p4  ;;  %p5978_p2 = por %p5977_p8, %p5976_p5 }
 0x11e   : > { %p5972_p1 = pneg %p5971_p10 }
 0x120   : > { %p5979_p11 = pnand %p5978_p2, %p5972_p1 }
 0x122   : > { %5982 = shalt.err (!%p5979_p11)
}
 0x123   : > { %5495 = dma.hbm_to_vmem [thread:$0]  (!%p7396_p0), %s8813_s20, 32, %s1023_s26, [#allocation13]  }
 0x124   : > { %s5983_s21 = scalar_lea.hbm %s8818_s4, 16 }
 0x125   : > { %p5984_p6 = scmp.ne.s32.totalorder %s8818_s4, %s5983_s21  ;;  %p5990_p7 = scmp.lt.u32.totalorder %s5983_s21, %s8818_s4 }
 0x127   : > { %p5986_p9 = pnand %p5984_p6, %p7406_p4 }
 0x129   : > { %p5987_p13 = pneg %p5986_p9 }
 0x12b   : > { %p5992_p3 = pnand %p5990_p7, %p5987_p13 }
 0x12d   : > { %5995 = shalt.err (!%p5992_p3)
}
 0x12e   : > { %s5996_s1 = scalar_lea.vmem %s1047_s15, 16  ;;  %s6003_s28 = scalar_lea.vmem %s1047_s15, 32 }
 0x12f   : > { %p5997_p12 = scmp.ne.s32.totalorder %s1047_s15, %s5996_s1  ;;  %p6004_p5 = scmp.lt.s32.totalorder %s1047_s15, %s1047_s15 }
 0x130   : > { %p6005_p8 = scmp.lt.s32.totalorder %s6003_s28, %s5996_s1 }
 0x131   : > { %p5999_p10 = pnand %p5997_p12, %p7406_p4 }
 0x132   : > { %p6006_p2 = por %p6005_p8, %p6004_p5 }
 0x133   : > { %p6000_p1 = pneg %p5999_p10 }
 0x135   : > { %p6007_p11 = pnand %p6006_p2, %p6000_p1 }
 0x137   : > { %6010 = shalt.err (!%p6007_p11)
}
 0x138   : > { %5501 = dma.hbm_to_vmem [thread:$0]  (!%p7396_p0), %s8818_s4, 16, %s1047_s15, [#allocation37]  }
 0x139   : > { %s7025_s0 = smov [#allocation41]   ;;  %s7026_s13 = smov [#allocation44]  }
 0x13a   : > { %s1070_s26 = sshll.u32 %s7025_s0, 4  ;;  %s1094_s14 = sshll.u32 %s7026_s13, 4  ;;  %s1071_s26 = int_to_ptr.vmem [resolvable:$true] %s1070_s26  ;;  %s1095_s14 = int_to_ptr.vmem [resolvable:$true] %s1094_s14 }
 0x13b   : > { %s6011_s25 = scalar_lea.hbm %s8810_s30, 16 }
 0x13c   : > { %p6012_p6 = scmp.ne.s32.totalorder %s8810_s30, %s6011_s25  ;;  %p6018_p7 = scmp.lt.u32.totalorder %s6011_s25, %s8810_s30 }
 0x13e   : > { %p6014_p9 = pnand %p6012_p6, %p7406_p4 }
 0x140   : > { %p6015_p13 = pneg %p6014_p9 }
 0x142   : > { %p6020_p3 = pnand %p6018_p7, %p6015_p13 }
 0x144   : > { %6023 = shalt.err (!%p6020_p3)
}
 0x145   : > { %s6024_s21 = scalar_lea.vmem %s1071_s26, 16  ;;  %s6031_s15 = scalar_lea.vmem %s1071_s26, 32 }
 0x146   : > { %p6025_p12 = scmp.ne.s32.totalorder %s1071_s26, %s6024_s21  ;;  %p6032_p5 = scmp.lt.s32.totalorder %s1071_s26, %s1071_s26 }
 0x147   : > { %p6033_p8 = scmp.lt.s32.totalorder %s6031_s15, %s6024_s21 }
 0x148   : > { %p6027_p10 = pnand %p6025_p12, %p7406_p4 }
 0x149   : > { %p6034_p2 = por %p6033_p8, %p6032_p5 }
 0x14a   : > { %p6028_p1 = pneg %p6027_p10 }
 0x14c   : > { %p6035_p11 = pnand %p6034_p2, %p6028_p1 }
 0x14e   : > { %6038 = shalt.err (!%p6035_p11)
}
 0x14f   : > { %5507 = dma.hbm_to_vmem [thread:$0]  (!%p7396_p0), %s8810_s30, 16, %s1071_s26, [#allocation40]  }
 0x150   : > { %s6039_s1 = scalar_lea.hbm %s8814_s19, 16 }
 0x151   : > { %p6040_p6 = scmp.ne.s32.totalorder %s8814_s19, %s6039_s1  ;;  %p6046_p7 = scmp.lt.u32.totalorder %s6039_s1, %s8814_s19 }
 0x153   : > { %p6042_p9 = pnand %p6040_p6, %p7406_p4 }
 0x155   : > { %p6043_p13 = pneg %p6042_p9 }
 0x157   : > { %p6048_p3 = pnand %p6046_p7, %p6043_p13 }
 0x159   : > { %6051 = shalt.err (!%p6048_p3)
}
 0x15a   : > { %s6052_s28 = scalar_lea.vmem %s1095_s14, 16  ;;  %s6059_s0 = scalar_lea.vmem %s1095_s14, 32 }
 0x15b   : > { %p6053_p12 = scmp.ne.s32.totalorder %s1095_s14, %s6052_s28  ;;  %p6060_p5 = scmp.lt.s32.totalorder %s1095_s14, %s1095_s14 }
 0x15c   : > { %p6061_p8 = scmp.lt.s32.totalorder %s6059_s0, %s6052_s28 }
 0x15d   : > { %p6055_p10 = pnand %p6053_p12, %p7406_p4 }
 0x15e   : > { %p6062_p2 = por %p6061_p8, %p6060_p5 }
 0x15f   : > { %p6056_p1 = pneg %p6055_p10 }
 0x161   : > { %p6063_p11 = pnand %p6062_p2, %p6056_p1 }
 0x163   : > { %6066 = shalt.err (!%p6063_p11)
}
 0x164   : > { %5513 = dma.hbm_to_vmem [thread:$0]  (!%p7396_p0), %s8814_s19, 16, %s1095_s14, [#allocation43]  }
 0x165   : > { %p4915_p6 = scmp.ge.s32.totalorder %s6977_s7, 4 }
 0x166   : > { %s8847_s29 = sld [smem:[#allocation119_spill]] (!%p4915_p6)  ;;  %s7528_s26 = sand.u32 (!%p4915_p6), 1, %s6977_s7  }
 0x167   : > { %1101 = sbr.rel (%p4915_p6) target bundleno = 959 (0x3bf), region = 56  ;;  %s8743_s13 = sand.u32 (!%p4915_p6), 1, %s6957_s23  }
 0x168   : > { %s7533_s25 = sshll.u32 (!%p4915_p6), %s8743_s13, 3  ;;  %s7536_s11 = sshll.u32 (!%p4915_p6), %s6973_s2, 7 }
 0x169   : > { %s7540_s14 = scalar_lea.hbm (!%p4915_p6), %s8816_s9, %s7536_s11  ;;  %s1127_s21 = scalar_lea.vmem (!%p4915_p6), [#allocation6], %s7533_s25 }
 0x16a   : > { %s1134_s15 = sshll.u32 (!%p4915_p6), %s1127_s21, 4  ;;  %s7544_s1 = scalar_lea.sflag (!%p4915_p6), [#allocation7], %s7528_s26  ;;  %s1135_s15 = int_to_ptr.vmem [resolvable:$true] %s1134_s15 }
 0x16b   : > { %s6067_s28 = scalar_lea.hbm (!%p4915_p6), %s7540_s14, 128  ;;  %s6071_s0 = scalar_lea.hbm (!%p4915_p6), %s8816_s9, 256 }
 0x16c   : > { %p6068_p0 = scmp.ne.s32.totalorder (!%p4915_p6), %s7540_s14, %s6067_s28  ;;  %p8848_p4 = scmp.ne.s32.totalorder (!%p4915_p6), %s8847_s29, 0 }
 0x16d   : > { %p6072_p7 = scmp.lt.u32.totalorder (!%p4915_p6), %s7540_s14, %s8816_s9  ;;  %p6073_p3 = scmp.lt.u32.totalorder (!%p4915_p6), %s6071_s0, %s6067_s28 }
 0x16e   : > { %p6069_p9 = pnand %p6068_p0, %p8848_p4  ;;  %p6075_p10 = scmp.lt.u32.totalorder %s6067_s28, %s7540_s14 }
 0x16f   : > { %p6074_p12 = por %p6073_p3, %p6072_p7 }
 0x170   : > { %p6070_p13 = pneg %p6069_p9 }
 0x171   : > { %p6076_p1 = por %p6075_p10, %p6074_p12 }
 0x173   : > { %p6077_p5 = pnand %p6076_p1, %p6070_p13 }
 0x175   : > { %6080 = shalt.err (!%p6077_p5)
}
 0x176   : > { %s6081_s13 = scalar_lea.vmem %s1135_s15, 128  ;;  %s7027_s21 = smov [#allocation6]  }
 0x177   : > { %p6082_p8 = scmp.ne.s32.totalorder %s1135_s15, %s6081_s13  ;;  %s6085_s4 = sshll.u32 %s7027_s21, 4  ;;  %s6086_s4 = int_to_ptr.vmem [resolvable:$false] %s6085_s4 }
 0x178   : > { %s6087_s6 = scalar_lea.vmem %s6086_s4, 256  ;;  %p6088_p6 = scmp.lt.s32.totalorder %s1135_s15, %s6086_s4 }
 0x179   : > { %p6083_p2 = pnand %p6082_p8, %p8848_p4  ;;  %p6089_p0 = scmp.lt.s32.totalorder %s6087_s6, %s6081_s13 }
 0x17b   : > { %p6084_p11 = pneg %p6083_p2  ;;  %p6090_p9 = por %p6089_p0, %p6088_p6 }
 0x17d   : > { %p6091_p3 = pnand %p6090_p9, %p6084_p11 }
 0x17f   : > { %6094 = shalt.err (!%p6091_p3)
}
 0x180   : > { %s8849_s28 = sld [smem:[#allocation77_spill]]  ;;  %s8851_s0 = sld [smem:[#allocation79_spill]] }
 0x181   : > { %5414 = dma.hbm_to_vmem [thread:$0]  (%p8848_p4), %s7540_s14, 128, %s1135_s15, %s7544_s1  }
 0x182   : > { %s1109_s6 = scalar_lea.vmem [#allocation3], %s7533_s25  ;;  %s7572_s19 = scalar_lea.sflag [#allocation4], %s7528_s26 }
 0x183   : > { %s1116_s4 = sshll.u32 %s1109_s6, 4  ;;  %s7565_s4 = int_to_ptr.vmem [resolvable:$true] %s1116_s4 }
 0x186   : > { %s8850_s9 = smov %s8849_s28  ;;  %s8852_s12 = smov %s8851_s0 }
 0x187   : > { %s7562_s21 = scalar_lea.hbm %s8849_s28, %s7536_s11  ;;  %s7569_s13 = scalar_lea.hbm %s8851_s0, %s7536_s11 }
 0x188   : > { %s6095_s20 = scalar_lea.hbm %s7562_s21, 128  ;;  %s6099_s14 = scalar_lea.hbm %s8850_s9, 256 }
 0x189   : > { %p6096_p13 = scmp.ne.s32.totalorder %s7562_s21, %s6095_s20  ;;  %p6100_p10 = scmp.lt.u32.totalorder %s7562_s21, %s8850_s9 }
 0x18a   : > { %p6101_p1 = scmp.lt.u32.totalorder %s6099_s14, %s6095_s20  ;;  %p6103_p8 = scmp.lt.u32.totalorder %s6095_s20, %s7562_s21 }
 0x18b   : > { %p6097_p7 = pnand %p6096_p13, %p8848_p4 }
 0x18c   : > { %p6102_p5 = por %p6101_p1, %p6100_p10 }
 0x18d   : > { %p6098_p12 = pneg %p6097_p7 }
 0x18e   : > { %p6104_p2 = por %p6103_p8, %p6102_p5 }
 0x190   : > { %p6105_p11 = pnand %p6104_p2, %p6098_p12 }
 0x192   : > { %6108 = shalt.err (!%p6105_p11)
}
 0x193   : > { %s6109_s11 = scalar_lea.vmem %s7565_s4, 128  ;;  %s7028_s15 = smov [#allocation3]  }
 0x194   : > { %p6110_p6 = scmp.ne.s32.totalorder %s7565_s4, %s6109_s11  ;;  %s6113_s28 = sshll.u32 %s7028_s15, 4  ;;  %s6114_s28 = int_to_ptr.vmem [resolvable:$false] %s6113_s28 }
 0x195   : > { %s6115_s0 = scalar_lea.vmem %s6114_s28, 256  ;;  %p6116_p3 = scmp.lt.s32.totalorder %s7565_s4, %s6114_s28 }
 0x196   : > { %p6111_p0 = pnand %p6110_p6, %p8848_p4  ;;  %p6117_p13 = scmp.lt.s32.totalorder %s6115_s0, %s6109_s11 }
 0x198   : > { %p6112_p9 = pneg %p6111_p0  ;;  %p6118_p7 = por %p6117_p13, %p6116_p3 }
 0x19a   : > { %p6119_p10 = pnand %p6118_p7, %p6112_p9 }
 0x19c   : > { %6122 = shalt.err (!%p6119_p10)
}
 0x19d   : > { %5413 = dma.hbm_to_vmem [thread:$0]  (%p8848_p4), %s7562_s21, 128, %s7565_s4, %s7572_s19  }
 0x19e   : > { %s1145_s20 = scalar_lea.vmem [#allocation8], %s7533_s25  ;;  %s6123_s14 = scalar_lea.hbm %s7569_s13, 128 }
 0x19f   : > { %s1152_s6 = sshll.u32 %s1145_s20, 4  ;;  %p6124_p12 = scmp.ne.s32.totalorder %s7569_s13, %s6123_s14  ;;  %s1153_s6 = int_to_ptr.vmem [resolvable:$true] %s1152_s6 }
 0x1a0   : > { %s6127_s11 = scalar_lea.hbm %s8852_s12, 256  ;;  %p6128_p8 = scmp.lt.u32.totalorder %s7569_s13, %s8852_s12 }
 0x1a1   : > { %p6125_p1 = pnand %p6124_p12, %p8848_p4  ;;  %p6129_p2 = scmp.lt.u32.totalorder %s6127_s11, %s6123_s14 }
 0x1a2   : > { %p6131_p6 = scmp.lt.u32.totalorder %s6123_s14, %s7569_s13 }
 0x1a3   : > { %p6126_p5 = pneg %p6125_p1  ;;  %p6130_p11 = por %p6129_p2, %p6128_p8 }
 0x1a5   : > { %p6132_p0 = por %p6131_p6, %p6130_p11 }
 0x1a7   : > { %p6133_p9 = pnand %p6132_p0, %p6126_p5 }
 0x1a9   : > { %6136 = shalt.err (!%p6133_p9)
}
 0x1aa   : > { %s6137_s15 = scalar_lea.vmem %s1153_s6, 128  ;;  %s7029_s25 = smov [#allocation8]  }
 0x1ab   : > { %p6138_p3 = scmp.ne.s32.totalorder %s1153_s6, %s6137_s15  ;;  %s6141_s21 = sshll.u32 %s7029_s25, 4  ;;  %s6142_s21 = int_to_ptr.vmem [resolvable:$false] %s6141_s21 }
 0x1ac   : > { %s6143_s4 = scalar_lea.vmem %s6142_s21, 256  ;;  %p6144_p10 = scmp.lt.s32.totalorder %s1153_s6, %s6142_s21 }
 0x1ad   : > { %p6139_p13 = pnand %p6138_p3, %p8848_p4  ;;  %p6145_p12 = scmp.lt.s32.totalorder %s6143_s4, %s6137_s15 }
 0x1af   : > { %p6140_p7 = pneg %p6139_p13  ;;  %p6146_p1 = por %p6145_p12, %p6144_p10 }
 0x1b1   : > { %p6147_p2 = pnand %p6146_p1, %p6140_p7 }
 0x1b3   : > { %6150 = shalt.err (!%p6147_p2)
}
 0x1b4   : > { %s8853_s28 = sld [smem:[#allocation80_spill]]  ;;  %s4922_s0 = sshll.u32 %s6973_s2, 4 }
 0x1b5   : > { %5415 = dma.hbm_to_vmem [thread:$0]  (%p8848_p4), %s7569_s13, 128, %s1153_s6, %s7544_s1  }
 0x1b6   : > { %s8855_s14 = sand.u32 1, %s6957_s23   ;;  %s7614_s21 = scalar_lea.sflag [#allocation10], %s7528_s26 }
 0x1b7   : > { %s1162_s11 = scalar_lea.vmem [#allocation9], %s8855_s14 }
 0x1b8   : > { %s1169_s25 = sshll.u32 %s1162_s11, 4  ;;  %s1170_s25 = int_to_ptr.vmem [resolvable:$true] %s1169_s25 }
 0x1ba   : > { %s8854_s20 = smov %s8853_s28  ;;  %s7611_s15 = scalar_lea.hbm %s8853_s28, %s4922_s0 }
 0x1bb   : > { %s6151_s4 = scalar_lea.hbm %s7611_s15, 16  ;;  %s6155_s9 = scalar_lea.hbm %s8854_s20, 32 }
 0x1bc   : > { %p6152_p5 = scmp.ne.s32.totalorder %s7611_s15, %s6151_s4  ;;  %p6156_p6 = scmp.lt.u32.totalorder %s7611_s15, %s8854_s20 }
 0x1bd   : > { %p6157_p0 = scmp.lt.u32.totalorder %s6155_s9, %s6151_s4  ;;  %p6159_p3 = scmp.lt.u32.totalorder %s6151_s4, %s7611_s15 }
 0x1be   : > { %p6153_p8 = pnand %p6152_p5, %p8848_p4 }
 0x1bf   : > { %p6158_p9 = por %p6157_p0, %p6156_p6 }
 0x1c0   : > { %p6154_p11 = pneg %p6153_p8 }
 0x1c1   : > { %p6160_p13 = por %p6159_p3, %p6158_p9 }
 0x1c3   : > { %p6161_p7 = pnand %p6160_p13, %p6154_p11 }
 0x1c5   : > { %6164 = shalt.err (!%p6161_p7)
}
 0x1c6   : > { %s6165_s13 = scalar_lea.vmem %s1170_s25, 16  ;;  %s7030_s26 = smov [#allocation9]  }
 0x1c7   : > { %p6166_p10 = scmp.ne.s32.totalorder %s1170_s25, %s6165_s13  ;;  %s6169_s6 = sshll.u32 %s7030_s26, 4  ;;  %s6170_s6 = int_to_ptr.vmem [resolvable:$false] %s6169_s6 }
 0x1c8   : > { %s6171_s28 = scalar_lea.vmem %s6170_s6, 32  ;;  %p6172_p2 = scmp.lt.s32.totalorder %s1170_s25, %s6170_s6 }
 0x1c9   : > { %p6167_p12 = pnand %p6166_p10, %p8848_p4  ;;  %p6173_p5 = scmp.lt.s32.totalorder %s6171_s28, %s6165_s13 }
 0x1cb   : > { %p6168_p1 = pneg %p6167_p12  ;;  %p6174_p8 = por %p6173_p5, %p6172_p2 }
 0x1cd   : > { %p6175_p0 = pnand %p6174_p8, %p6168_p1 }
 0x1cf   : > { %6178 = shalt.err (!%p6175_p0)
}
 0x1d0   : > { %s8856_s9 = sld [smem:[#allocation116_spill]]  ;;  %s8857_s0 = sld [smem:[#allocation83_spill]] }
 0x1d1   : > { %5416 = dma.hbm_to_vmem [thread:$0]  (%p8848_p4), %s7611_s15, 16, %s1170_s25, %s7614_s21  }
 0x1d2   : > { %s7631_s11 = sand.u32 1, %s6945_s18   ;;  %p8859_p11 = scmp.ne.s32.totalorder %s8834_s5, 0 }
 0x1d3   : > { %s7637_s13 = sshll.u32 %s7631_s11, 4 }
 0x1d4   : > { %s1180_s29 = scalar_lea.vmem [#allocation14], %s7637_s13 }
 0x1d5   : > { %s1187_s6 = sshll.u32 %s1180_s29, 4  ;;  %s7644_s6 = int_to_ptr.vmem [resolvable:$true] %s1187_s6 }
 0x1d6   : > { %s8858_s14 = smov %s8857_s0  ;;  %s7634_s4 = sshll.u32 %s8856_s9, 8 }
 0x1d7   : > { %s7641_s26 = scalar_lea.hbm %s8857_s0, %s7634_s4  ;;  %s6183_s15 = scalar_lea.hbm %s8858_s14, 512 }
 0x1d8   : > { %s6179_s25 = scalar_lea.hbm %s7641_s26, 256  ;;  %p6184_p3 = scmp.lt.u32.totalorder %s7641_s26, %s8858_s14 }
 0x1d9   : > { %p6180_p4 = scmp.ne.s32.totalorder %s7641_s26, %s6179_s25  ;;  %p6185_p13 = scmp.lt.u32.totalorder %s6183_s15, %s6179_s25 }
 0x1da   : > { %p6187_p10 = scmp.lt.u32.totalorder %s6179_s25, %s7641_s26 }
 0x1db   : > { %p6181_p6 = pnand %p6180_p4, %p8859_p11  ;;  %p6186_p7 = por %p6185_p13, %p6184_p3 }
 0x1dd   : > { %p6182_p9 = pneg %p6181_p6  ;;  %p6188_p12 = por %p6187_p10, %p6186_p7 }
 0x1df   : > { %p6189_p1 = pnand %p6188_p12, %p6182_p9 }
 0x1e1   : > { %6192 = shalt.err (!%p6189_p1)
}
 0x1e2   : > { %s6193_s28 = scalar_lea.vmem %s7644_s6, 256  ;;  %s7031_s0 = smov [#allocation14]  }
 0x1e3   : > { %p6194_p2 = scmp.ne.s32.totalorder %s7644_s6, %s6193_s28  ;;  %s6197_s29 = sshll.u32 %s7031_s0, 4  ;;  %s6198_s29 = int_to_ptr.vmem [resolvable:$false] %s6197_s29 }
 0x1e4   : > { %s6199_s12 = scalar_lea.vmem %s6198_s29, 512  ;;  %p6200_p0 = scmp.lt.s32.totalorder %s7644_s6, %s6198_s29 }
 0x1e5   : > { %p6195_p5 = pnand %p6194_p2, %p8859_p11  ;;  %p6201_p4 = scmp.lt.s32.totalorder %s6199_s12, %s6193_s28 }
 0x1e7   : > { %p6196_p8 = pneg %p6195_p5  ;;  %p6202_p6 = por %p6201_p4, %p6200_p0 }
 0x1e9   : > { %p6203_p3 = pnand %p6202_p6, %p6196_p8 }
 0x1eb   : > { %6206 = shalt.err (!%p6203_p3)
}
 0x1ec   : > { %s8756_s25 = smov 64   ;;  %s8860_s15 = sld [smem:[#allocation84_spill]] }
 0x1ed   : > { %s8758_s20 = smov 4   ;;  %s7668_s12 = sshll.u32 %s8856_s9, 4 }
 0x1ee   : > { %5417 = dma.hbm_to_vmem [thread:$0]  (%p8859_p11), %s7641_s26, 256, %s7644_s6, %s7572_s19, %s8756_s25, %s8756_s25, %s8758_s20  }
 0x1ef   : > { %s1200_s28 = scalar_lea.vmem [#allocation15], %s7631_s11 }
 0x1f0   : > { %s1207_s0 = sshll.u32 %s1200_s28, 4  ;;  %s1208_s0 = int_to_ptr.vmem [resolvable:$true] %s1207_s0 }
 0x1f2   : > { %s8861_s14 = smov %s8860_s15  ;;  %s1205_s29 = scalar_lea.hbm %s8860_s15, %s7668_s12 }
 0x1f3   : > { %s6207_s24 = scalar_lea.hbm %s1205_s29, 16  ;;  %s6211_s27 = scalar_lea.hbm %s8861_s14, 32 }
 0x1f4   : > { %p6208_p9 = scmp.ne.s32.totalorder %s1205_s29, %s6207_s24  ;;  %p6212_p10 = scmp.lt.u32.totalorder %s1205_s29, %s8861_s14 }
 0x1f5   : > { %p6213_p12 = scmp.lt.u32.totalorder %s6211_s27, %s6207_s24  ;;  %p6215_p2 = scmp.lt.u32.totalorder %s6207_s24, %s1205_s29 }
 0x1f6   : > { %p6209_p13 = pnand %p6208_p9, %p8859_p11 }
 0x1f7   : > { %p6214_p1 = por %p6213_p12, %p6212_p10 }
 0x1f8   : > { %p6210_p7 = pneg %p6209_p13 }
 0x1f9   : > { %p6216_p5 = por %p6215_p2, %p6214_p1 }
 0x1fb   : > { %p6217_p8 = pnand %p6216_p5, %p6210_p7 }
 0x1fd   : > { %6220 = shalt.err (!%p6217_p8)
}
 0x1fe   : > { %s6221_s26 = scalar_lea.vmem %s1208_s0, 16  ;;  %s7034_s6 = smov [#allocation15]  }
 0x1ff   : > { %p6222_p0 = scmp.ne.s32.totalorder %s1208_s0, %s6221_s26  ;;  %s6225_s15 = sshll.u32 %s7034_s6, 4  ;;  %s6226_s15 = int_to_ptr.vmem [resolvable:$false] %s6225_s15 }
 0x200   : > { %s6227_s28 = scalar_lea.vmem %s6226_s15, 32  ;;  %p6228_p3 = scmp.lt.s32.totalorder %s1208_s0, %s6226_s15 }
 0x201   : > { %p6223_p4 = pnand %p6222_p0, %p8859_p11  ;;  %p6229_p9 = scmp.lt.s32.totalorder %s6227_s28, %s6221_s26 }
 0x203   : > { %p6224_p6 = pneg %p6223_p4  ;;  %p6230_p13 = por %p6229_p9, %p6228_p3 }
 0x205   : > { %p6231_p10 = pnand %p6230_p13, %p6224_p6 }
 0x207   : > { %6234 = shalt.err (!%p6231_p10)
}
 0x208   : > { %s8862_s24 = sld [smem:[#allocation85_spill]]  ;;  %s8863_s27 = sld [smem:[#allocation86_spill]] }
 0x209   : > { %5418 = dma.hbm_to_vmem [thread:$0]  (%p8859_p11), %s1205_s29, 16, %s1208_s0, %s7544_s1  }
 0x20a   : > { %s1218_s26 = scalar_lea.vmem [#allocation16], %s7637_s13 }
 0x20b   : > { %s1225_s15 = sshll.u32 %s1218_s26, 4  ;;  %s7687_s15 = int_to_ptr.vmem [resolvable:$true] %s1225_s15 }
 0x20e   : > { %s7684_s6 = scalar_lea.hbm %s8862_s24, %s7634_s4  ;;  %s7691_s28 = scalar_lea.hbm %s8863_s27, %s7668_s12 }
 0x20f   : > { %s6235_s25 = scalar_lea.hbm %s7684_s6, 256  ;;  %s6239_s20 = scalar_lea.hbm %s8862_s24, 512 }
 0x210   : > { %p6236_p7 = scmp.ne.s32.totalorder %s7684_s6, %s6235_s25  ;;  %p6240_p2 = scmp.lt.u32.totalorder %s7684_s6, %s8862_s24 }
 0x211   : > { %p6241_p5 = scmp.lt.u32.totalorder %s6239_s20, %s6235_s25  ;;  %p6243_p0 = scmp.lt.u32.totalorder %s6235_s25, %s7684_s6 }
 0x212   : > { %p6237_p12 = pnand %p6236_p7, %p8859_p11 }
 0x213   : > { %p6242_p8 = por %p6241_p5, %p6240_p2 }
 0x214   : > { %p6238_p1 = pneg %p6237_p12 }
 0x215   : > { %p6244_p4 = por %p6243_p0, %p6242_p8 }
 0x217   : > { %p6245_p6 = pnand %p6244_p4, %p6238_p1 }
 0x219   : > { %6248 = shalt.err (!%p6245_p6)
}
 0x21a   : > { %s6249_s0 = scalar_lea.vmem %s7687_s15, 256  ;;  %s7035_s29 = smov [#allocation16]  }
 0x21b   : > { %p6250_p3 = scmp.ne.s32.totalorder %s7687_s15, %s6249_s0  ;;  %s6253_s26 = sshll.u32 %s7035_s29, 4  ;;  %s6254_s26 = int_to_ptr.vmem [resolvable:$false] %s6253_s26 }
 0x21c   : > { %s6255_s14 = scalar_lea.vmem %s6254_s26, 512  ;;  %p6256_p10 = scmp.lt.s32.totalorder %s7687_s15, %s6254_s26 }
 0x21d   : > { %p6251_p9 = pnand %p6250_p3, %p8859_p11  ;;  %p6257_p7 = scmp.lt.s32.totalorder %s6255_s14, %s6249_s0 }
 0x21f   : > { %p6252_p13 = pneg %p6251_p9  ;;  %p6258_p12 = por %p6257_p7, %p6256_p10 }
 0x221   : > { %p6259_p2 = pnand %p6258_p12, %p6252_p13 }
 0x223   : > { %6262 = shalt.err (!%p6259_p2)
}
 0x224   : > { %s8864_s20 = smov 4   ;;  %s8865_s25 = smov 64  }
 0x225   : > { %s8866_s24 = sld [smem:[#allocation87_spill]]  ;;  %s1238_s14 = scalar_lea.vmem [#allocation17], %s7631_s11 }
 0x226   : > { %5419 = dma.hbm_to_vmem [thread:$0]  (%p8859_p11), %s7684_s6, 256, %s7687_s15, %s7614_s21, %s8865_s25, %s8865_s25, %s8864_s20  }
 0x227   : > { %s1245_s0 = sshll.u32 %s1238_s14, 4  ;;  %s6263_s26 = scalar_lea.hbm %s7691_s28, 16  ;;  %s1246_s0 = int_to_ptr.vmem [resolvable:$true] %s1245_s0 }
 0x228   : > { %p6264_p1 = scmp.ne.s32.totalorder %s7691_s28, %s6263_s26  ;;  %s6267_s30 = scalar_lea.hbm %s8863_s27, 32 }
 0x229   : > { %p6268_p0 = scmp.lt.u32.totalorder %s7691_s28, %s8863_s27  ;;  %p6269_p4 = scmp.lt.u32.totalorder %s6267_s30, %s6263_s26 }
 0x22a   : > { %p6265_p5 = pnand %p6264_p1, %p8859_p11  ;;  %p6271_p3 = scmp.lt.u32.totalorder %s6263_s26, %s7691_s28 }
 0x22b   : > { %s7717_s29 = scalar_lea.hbm %s8866_s24, %s7634_s4  ;;  %p6270_p6 = por %p6269_p4, %p6268_p0 }
 0x22c   : > { %p6266_p8 = pneg %p6265_p5 }
 0x22d   : > { %p6272_p9 = por %p6271_p3, %p6270_p6 }
 0x22f   : > { %p6273_p13 = pnand %p6272_p9, %p6266_p8 }
 0x231   : > { %6276 = shalt.err (!%p6273_p13)
}
 0x232   : > { %s6277_s2 = scalar_lea.vmem %s1246_s0, 16  ;;  %s7036_s6 = smov [#allocation17]  }
 0x233   : > { %p6278_p10 = scmp.ne.s32.totalorder %s1246_s0, %s6277_s2  ;;  %s6281_s15 = sshll.u32 %s7036_s6, 4  ;;  %s6282_s15 = int_to_ptr.vmem [resolvable:$false] %s6281_s15 }
 0x234   : > { %s6283_s14 = scalar_lea.vmem %s6282_s15, 32  ;;  %p6284_p2 = scmp.lt.s32.totalorder %s1246_s0, %s6282_s15 }
 0x235   : > { %p6279_p7 = pnand %p6278_p10, %p8859_p11  ;;  %p6285_p1 = scmp.lt.s32.totalorder %s6283_s14, %s6277_s2 }
 0x237   : > { %p6280_p12 = pneg %p6279_p7  ;;  %p6286_p5 = por %p6285_p1, %p6284_p2 }
 0x239   : > { %p6287_p0 = pnand %p6286_p5, %p6280_p12 }
 0x23b   : > { %6290 = shalt.err (!%p6287_p0)
}
 0x23c   : > { %s8867_s30 = sld [smem:[#allocation88_spill]]  ;;  %s1256_s26 = scalar_lea.vmem [#allocation18], %s7637_s13 }
 0x23d   : > { %5420 = dma.hbm_to_vmem [thread:$0]  (%p8859_p11), %s7691_s28, 16, %s1246_s0, %s7572_s19  }
 0x23e   : > { %s1263_s2 = sshll.u32 %s1256_s26, 4  ;;  %s6291_s15 = scalar_lea.hbm %s7717_s29, 256  ;;  %s7734_s2 = int_to_ptr.vmem [resolvable:$true] %s1263_s2 }
 0x23f   : > { %p6292_p8 = scmp.ne.s32.totalorder %s7717_s29, %s6291_s15  ;;  %s6295_s14 = scalar_lea.hbm %s8866_s24, 512 }
 0x240   : > { %p6296_p3 = scmp.lt.u32.totalorder %s7717_s29, %s8866_s24  ;;  %p6297_p9 = scmp.lt.u32.totalorder %s6295_s14, %s6291_s15 }
 0x241   : > { %p6293_p4 = pnand %p6292_p8, %p8859_p11  ;;  %p6299_p10 = scmp.lt.u32.totalorder %s6291_s15, %s7717_s29 }
 0x242   : > { %s7738_s6 = scalar_lea.hbm %s8867_s30, %s7668_s12  ;;  %p6298_p13 = por %p6297_p9, %p6296_p3 }
 0x243   : > { %p6294_p6 = pneg %p6293_p4 }
 0x244   : > { %p6300_p7 = por %p6299_p10, %p6298_p13 }
 0x246   : > { %p6301_p12 = pnand %p6300_p7, %p6294_p6 }
 0x248   : > { %6304 = shalt.err (!%p6301_p12)
}
 0x249   : > { %s6305_s28 = scalar_lea.vmem %s7734_s2, 256  ;;  %s7037_s0 = smov [#allocation18]  }
 0x24a   : > { %p6306_p2 = scmp.ne.s32.totalorder %s7734_s2, %s6305_s28  ;;  %s6309_s26 = sshll.u32 %s7037_s0, 4  ;;  %s6310_s26 = int_to_ptr.vmem [resolvable:$false] %s6309_s26 }
 0x24b   : > { %s6311_s27 = scalar_lea.vmem %s6310_s26, 512  ;;  %p6312_p0 = scmp.lt.s32.totalorder %s7734_s2, %s6310_s26 }
 0x24c   : > { %p6307_p1 = pnand %p6306_p2, %p8859_p11  ;;  %p6313_p8 = scmp.lt.s32.totalorder %s6311_s27, %s6305_s28 }
 0x24e   : > { %p6308_p5 = pneg %p6307_p1  ;;  %p6314_p4 = por %p6313_p8, %p6312_p0 }
 0x250   : > { %p6315_p3 = pnand %p6314_p4, %p6308_p5 }
 0x252   : > { %6318 = shalt.err (!%p6315_p3)
}
 0x253   : > { %s8868_s15 = sld [smem:[#allocation89_spill]]  ;;  %s1276_s27 = scalar_lea.vmem [#allocation19], %s7631_s11 }
 0x254   : > { %5421 = dma.hbm_to_vmem [thread:$0]  (%p8859_p11), %s7717_s29, 256, %s7734_s2, %s7544_s1, %s8865_s25, %s8865_s25, %s8864_s20  }
 0x255   : > { %s1283_s28 = sshll.u32 %s1276_s27, 4  ;;  %s6319_s26 = scalar_lea.hbm %s7738_s6, 16  ;;  %s1284_s28 = int_to_ptr.vmem [resolvable:$true] %s1283_s28 }
 0x256   : > { %p6320_p6 = scmp.ne.s32.totalorder %s7738_s6, %s6319_s26  ;;  %s6323_s24 = scalar_lea.hbm %s8867_s30, 32 }
 0x257   : > { %p6324_p10 = scmp.lt.u32.totalorder %s7738_s6, %s8867_s30  ;;  %p6325_p7 = scmp.lt.u32.totalorder %s6323_s24, %s6319_s26 }
 0x258   : > { %p6321_p9 = pnand %p6320_p6, %p8859_p11  ;;  %p6327_p2 = scmp.lt.u32.totalorder %s6319_s26, %s7738_s6 }
 0x259   : > { %s8869_s14 = smov %s8868_s15  ;;  %s7764_s0 = scalar_lea.hbm %s8868_s15, %s7634_s4 }
 0x25a   : > { %p6322_p13 = pneg %p6321_p9  ;;  %p6326_p12 = por %p6325_p7, %p6324_p10 }
 0x25c   : > { %p6328_p1 = por %p6327_p2, %p6326_p12 }
 0x25e   : > { %p6329_p5 = pnand %p6328_p1, %p6322_p13 }
 0x260   : > { %6332 = shalt.err (!%p6329_p5)
}
 0x261   : > { %s6333_s23 = scalar_lea.vmem %s1284_s28, 16  ;;  %s7038_s29 = smov [#allocation19]  }
 0x262   : > { %p6334_p0 = scmp.ne.s32.totalorder %s1284_s28, %s6333_s23  ;;  %s6337_s2 = sshll.u32 %s7038_s29, 4  ;;  %s6338_s2 = int_to_ptr.vmem [resolvable:$false] %s6337_s2 }
 0x263   : > { %s6339_s15 = scalar_lea.vmem %s6338_s2, 32  ;;  %p6340_p3 = scmp.lt.s32.totalorder %s1284_s28, %s6338_s2 }
 0x264   : > { %p6335_p8 = pnand %p6334_p0, %p8859_p11  ;;  %p6341_p6 = scmp.lt.s32.totalorder %s6339_s15, %s6333_s23 }
 0x266   : > { %p6336_p4 = pneg %p6335_p8  ;;  %p6342_p9 = por %p6341_p6, %p6340_p3 }
 0x268   : > { %p6343_p7 = pnand %p6342_p9, %p6336_p4 }
 0x26a   : > { %6346 = shalt.err (!%p6343_p7)
}
 0x26b   : > { %s8870_s24 = sld [smem:[#allocation90_spill]]  ;;  %s1294_s27 = scalar_lea.vmem [#allocation20], %s7637_s13 }
 0x26c   : > { %5422 = dma.hbm_to_vmem [thread:$0]  (%p8859_p11), %s7738_s6, 16, %s1284_s28, %s7614_s21  }
 0x26d   : > { %s1301_s23 = sshll.u32 %s1294_s27, 4  ;;  %s6347_s29 = scalar_lea.hbm %s7764_s0, 256  ;;  %s7781_s23 = int_to_ptr.vmem [resolvable:$true] %s1301_s23 }
 0x26e   : > { %p6348_p13 = scmp.ne.s32.totalorder %s7764_s0, %s6347_s29  ;;  %s6351_s2 = scalar_lea.hbm %s8869_s14, 512 }
 0x26f   : > { %p6352_p2 = scmp.lt.u32.totalorder %s7764_s0, %s8869_s14  ;;  %p6353_p1 = scmp.lt.u32.totalorder %s6351_s2, %s6347_s29 }
 0x270   : > { %p6349_p10 = pnand %p6348_p13, %p8859_p11  ;;  %p6355_p0 = scmp.lt.u32.totalorder %s6347_s29, %s7764_s0 }
 0x271   : > { %s7785_s26 = scalar_lea.hbm %s8870_s24, %s7668_s12  ;;  %p6354_p5 = por %p6353_p1, %p6352_p2 }
 0x272   : > { %p6350_p12 = pneg %p6349_p10 }
 0x273   : > { %p6356_p8 = por %p6355_p0, %p6354_p5 }
 0x275   : > { %p6357_p4 = pnand %p6356_p8, %p6350_p12 }
 0x277   : > { %6360 = shalt.err (!%p6357_p4)
}
 0x278   : > { %s6361_s6 = scalar_lea.vmem %s7781_s23, 256  ;;  %s7039_s28 = smov [#allocation20]  }
 0x279   : > { %p6362_p3 = scmp.ne.s32.totalorder %s7781_s23, %s6361_s6  ;;  %s6365_s15 = sshll.u32 %s7039_s28, 4  ;;  %s6366_s15 = int_to_ptr.vmem [resolvable:$false] %s6365_s15 }
 0x27a   : > { %s6367_s27 = scalar_lea.vmem %s6366_s15, 512  ;;  %p6368_p7 = scmp.lt.s32.totalorder %s7781_s23, %s6366_s15 }
 0x27b   : > { %p6363_p6 = pnand %p6362_p3, %p8859_p11  ;;  %p6369_p13 = scmp.lt.s32.totalorder %s6367_s27, %s6361_s6 }
 0x27d   : > { %p6364_p9 = pneg %p6363_p6  ;;  %p6370_p10 = por %p6369_p13, %p6368_p7 }
 0x27f   : > { %p6371_p2 = pnand %p6370_p10, %p6364_p9 }
 0x281   : > { %6374 = shalt.err (!%p6371_p2)
}
 0x282   : > { %s8871_s29 = sld [smem:[#allocation91_spill]]  ;;  %s1314_s2 = scalar_lea.vmem [#allocation21], %s7631_s11 }
 0x283   : > { %5423 = dma.hbm_to_vmem [thread:$0]  (%p8859_p11), %s7764_s0, 256, %s7781_s23, %s7572_s19, %s8865_s25, %s8865_s25, %s8864_s20  }
 0x284   : > { %s1321_s6 = sshll.u32 %s1314_s2, 4  ;;  %s6375_s15 = scalar_lea.hbm %s7785_s26, 16  ;;  %s1322_s6 = int_to_ptr.vmem [resolvable:$true] %s1321_s6 }
 0x285   : > { %p6376_p12 = scmp.ne.s32.totalorder %s7785_s26, %s6375_s15  ;;  %s6379_s27 = scalar_lea.hbm %s8870_s24, 32 }
 0x286   : > { %p6380_p0 = scmp.lt.u32.totalorder %s7785_s26, %s8870_s24  ;;  %p6381_p8 = scmp.lt.u32.totalorder %s6379_s27, %s6375_s15 }
 0x287   : > { %p6377_p1 = pnand %p6376_p12, %p8859_p11  ;;  %p6383_p3 = scmp.lt.u32.totalorder %s6375_s15, %s7785_s26 }
 0x288   : > { %s7811_s28 = scalar_lea.hbm %s8871_s29, %s7634_s4  ;;  %p6382_p4 = por %p6381_p8, %p6380_p0 }
 0x289   : > { %p6378_p5 = pneg %p6377_p1 }
 0x28a   : > { %p6384_p6 = por %p6383_p3, %p6382_p4 }
 0x28c   : > { %p6385_p9 = pnand %p6384_p6, %p6378_p5 }
 0x28e   : > { %6388 = shalt.err (!%p6385_p9)
}
 0x28f   : > { %s6389_s14 = scalar_lea.vmem %s1322_s6, 16  ;;  %s7040_s0 = smov [#allocation21]  }
 0x290   : > { %p6390_p7 = scmp.ne.s32.totalorder %s1322_s6, %s6389_s14  ;;  %s6393_s23 = sshll.u32 %s7040_s0, 4  ;;  %s6394_s23 = int_to_ptr.vmem [resolvable:$false] %s6393_s23 }
 0x291   : > { %s6395_s2 = scalar_lea.vmem %s6394_s23, 32  ;;  %p6396_p2 = scmp.lt.s32.totalorder %s1322_s6, %s6394_s23 }
 0x292   : > { %p6391_p13 = pnand %p6390_p7, %p8859_p11  ;;  %p6397_p12 = scmp.lt.s32.totalorder %s6395_s2, %s6389_s14 }
 0x294   : > { %p6392_p10 = pneg %p6391_p13  ;;  %p6398_p1 = por %p6397_p12, %p6396_p2 }
 0x296   : > { %p6399_p0 = pnand %p6398_p1, %p6392_p10 }
 0x298   : > { %6402 = shalt.err (!%p6399_p0)
}
 0x299   : > { %s8872_s15 = sld [smem:[#allocation92_spill]]  ;;  %s1332_s0 = scalar_lea.vmem [#allocation22], %s7637_s13 }
 0x29a   : > { %5424 = dma.hbm_to_vmem [thread:$0]  (%p8859_p11), %s7785_s26, 16, %s1322_s6, %s7544_s1  }
 0x29b   : > { %s1339_s14 = sshll.u32 %s1332_s0, 4  ;;  %s6403_s2 = scalar_lea.hbm %s7811_s28, 256  ;;  %s7828_s14 = int_to_ptr.vmem [resolvable:$true] %s1339_s14 }
 0x29c   : > { %p6404_p5 = scmp.ne.s32.totalorder %s7811_s28, %s6403_s2  ;;  %s6407_s24 = scalar_lea.hbm %s8871_s29, 512 }
 0x29d   : > { %p6408_p3 = scmp.lt.u32.totalorder %s7811_s28, %s8871_s29  ;;  %p6409_p6 = scmp.lt.u32.totalorder %s6407_s24, %s6403_s2 }
 0x29e   : > { %p6405_p8 = pnand %p6404_p5, %p8859_p11  ;;  %p6411_p7 = scmp.lt.u32.totalorder %s6403_s2, %s7811_s28 }
 0x29f   : > { %s8873_s27 = smov %s8872_s15  ;;  %s7832_s23 = scalar_lea.hbm %s8872_s15, %s7668_s12 }
 0x2a0   : > { %p6406_p4 = pneg %p6405_p8  ;;  %p6410_p9 = por %p6409_p6, %p6408_p3 }
 0x2a2   : > { %p6412_p13 = por %p6411_p7, %p6410_p9 }
 0x2a4   : > { %p6413_p10 = pnand %p6412_p13, %p6406_p4 }
 0x2a6   : > { %6416 = shalt.err (!%p6413_p10)
}
 0x2a7   : > { %s6417_s26 = scalar_lea.vmem %s7828_s14, 256  ;;  %s7041_s6 = smov [#allocation22]  }
 0x2a8   : > { %p6418_p2 = scmp.ne.s32.totalorder %s7828_s14, %s6417_s26  ;;  %s6421_s15 = sshll.u32 %s7041_s6, 4  ;;  %s6422_s15 = int_to_ptr.vmem [resolvable:$false] %s6421_s15 }
 0x2a9   : > { %s6423_s0 = scalar_lea.vmem %s6422_s15, 512  ;;  %p6424_p0 = scmp.lt.s32.totalorder %s7828_s14, %s6422_s15 }
 0x2aa   : > { %p6419_p12 = pnand %p6418_p2, %p8859_p11  ;;  %p6425_p5 = scmp.lt.s32.totalorder %s6423_s0, %s6417_s26 }
 0x2ac   : > { %p6420_p1 = pneg %p6419_p12  ;;  %p6426_p8 = por %p6425_p5, %p6424_p0 }
 0x2ae   : > { %p6427_p3 = pnand %p6426_p8, %p6420_p1 }
 0x2b0   : > { %6430 = shalt.err (!%p6427_p3)
}
 0x2b1   : > { %s8874_s24 = sld [smem:[#allocation93_spill]]  ;;  %s1352_s2 = scalar_lea.vmem [#allocation23], %s7631_s11 }
 0x2b2   : > { %5425 = dma.hbm_to_vmem [thread:$0]  (%p8859_p11), %s7811_s28, 256, %s7828_s14, %s7614_s21, %s8865_s25, %s8865_s25, %s8864_s20  }
 0x2b3   : > { %s1359_s26 = sshll.u32 %s1352_s2, 4  ;;  %s6431_s15 = scalar_lea.hbm %s7832_s23, 16  ;;  %s1360_s26 = int_to_ptr.vmem [resolvable:$true] %s1359_s26 }
 0x2b4   : > { %p6432_p4 = scmp.ne.s32.totalorder %s7832_s23, %s6431_s15  ;;  %s6435_s0 = scalar_lea.hbm %s8873_s27, 32 }
 0x2b5   : > { %p6436_p7 = scmp.lt.u32.totalorder %s7832_s23, %s8873_s27  ;;  %p6437_p13 = scmp.lt.u32.totalorder %s6435_s0, %s6431_s15 }
 0x2b6   : > { %p6433_p6 = pnand %p6432_p4, %p8859_p11  ;;  %p6439_p2 = scmp.lt.u32.totalorder %s6431_s15, %s7832_s23 }
 0x2b7   : > { %s7858_s6 = scalar_lea.hbm %s8874_s24, %s7634_s4  ;;  %p6438_p10 = por %p6437_p13, %p6436_p7 }
 0x2b8   : > { %p6434_p9 = pneg %p6433_p6 }
 0x2b9   : > { %p6440_p12 = por %p6439_p2, %p6438_p10 }
 0x2bb   : > { %p6441_p1 = pnand %p6440_p12, %p6434_p9 }
 0x2bd   : > { %6444 = shalt.err (!%p6441_p1)
}
 0x2be   : > { %s6445_s29 = scalar_lea.vmem %s1360_s26, 16  ;;  %s7042_s4 = smov [#allocation23]  }
 0x2bf   : > { %p6446_p0 = scmp.ne.s32.totalorder %s1360_s26, %s6445_s29  ;;  %s6449_s28 = sshll.u32 %s7042_s4, 4  ;;  %s6450_s28 = int_to_ptr.vmem [resolvable:$false] %s6449_s28 }
 0x2c0   : > { %s6451_s14 = scalar_lea.vmem %s6450_s28, 32  ;;  %p6452_p3 = scmp.lt.s32.totalorder %s1360_s26, %s6450_s28 }
 0x2c1   : > { %p6447_p5 = pnand %p6446_p0, %p8859_p11  ;;  %p6453_p4 = scmp.lt.s32.totalorder %s6451_s14, %s6445_s29 }
 0x2c3   : > { %p6448_p8 = pneg %p6447_p5  ;;  %p6454_p6 = por %p6453_p4, %p6452_p3 }
 0x2c5   : > { %p6455_p7 = pnand %p6454_p6, %p6448_p8 }
 0x2c7   : > { %6458 = shalt.err (!%p6455_p7)
}
 0x2c8   : > { %s8875_s2 = sld [smem:[#allocation94_spill]]  ;;  %s1370_s15 = scalar_lea.vmem [#allocation24], %s7637_s13 }
 0x2c9   : > { %5426 = dma.hbm_to_vmem [thread:$0]  (%p8859_p11), %s7832_s23, 16, %s1360_s26, %s7572_s19  }
 0x2ca   : > { %s1377_s29 = sshll.u32 %s1370_s15, 4  ;;  %s6459_s4 = scalar_lea.hbm %s7858_s6, 256  ;;  %s7875_s29 = int_to_ptr.vmem [resolvable:$true] %s1377_s29 }
 0x2cb   : > { %p6460_p9 = scmp.ne.s32.totalorder %s7858_s6, %s6459_s4  ;;  %s6463_s28 = scalar_lea.hbm %s8874_s24, 512 }
 0x2cc   : > { %p6464_p2 = scmp.lt.u32.totalorder %s7858_s6, %s8874_s24  ;;  %p6465_p12 = scmp.lt.u32.totalorder %s6463_s28, %s6459_s4 }
 0x2cd   : > { %p6461_p13 = pnand %p6460_p9, %p8859_p11  ;;  %p6467_p0 = scmp.lt.u32.totalorder %s6459_s4, %s7858_s6 }
 0x2ce   : > { %s8876_s27 = smov %s8875_s2  ;;  %s7879_s0 = scalar_lea.hbm %s8875_s2, %s7668_s12 }
 0x2cf   : > { %p6462_p10 = pneg %p6461_p13  ;;  %p6466_p1 = por %p6465_p12, %p6464_p2 }
 0x2d1   : > { %p6468_p5 = por %p6467_p0, %p6466_p1 }
 0x2d3   : > { %p6469_p8 = pnand %p6468_p5, %p6462_p10 }
 0x2d5   : > { %6472 = shalt.err (!%p6469_p8)
}
 0x2d6   : > { %s6473_s13 = scalar_lea.vmem %s7875_s29, 256  ;;  %s7043_s23 = smov [#allocation24]  }
 0x2d7   : > { %p6474_p3 = scmp.ne.s32.totalorder %s7875_s29, %s6473_s13  ;;  %s6477_s26 = sshll.u32 %s7043_s23, 4  ;;  %s6478_s26 = int_to_ptr.vmem [resolvable:$false] %s6477_s26 }
 0x2d8   : > { %s6479_s14 = scalar_lea.vmem %s6478_s26, 512  ;;  %p6480_p7 = scmp.lt.s32.totalorder %s7875_s29, %s6478_s26 }
 0x2d9   : > { %p6475_p4 = pnand %p6474_p3, %p8859_p11  ;;  %p6481_p9 = scmp.lt.s32.totalorder %s6479_s14, %s6473_s13 }
 0x2db   : > { %p6476_p6 = pneg %p6475_p4  ;;  %p6482_p13 = por %p6481_p9, %p6480_p7 }
 0x2dd   : > { %p6483_p2 = pnand %p6482_p13, %p6476_p6 }
 0x2df   : > { %6486 = shalt.err (!%p6483_p2)
}
 0x2e0   : > { %5427 = dma.hbm_to_vmem [thread:$0]  (%p8859_p11), %s7858_s6, 256, %s7875_s29, %s7544_s1, %s8865_s25, %s8865_s25, %s8864_s20  }
 0x2e1   : > { %s1390_s2 = scalar_lea.vmem [#allocation25], %s7631_s11  ;;  %s4947_s4 = sshll.u32 %s7631_s11, 5 }
 0x2e2   : > { %s1397_s15 = sshll.u32 %s1390_s2, 4  ;;  %s6487_s28 = scalar_lea.hbm %s7879_s0, 16  ;;  %s1398_s15 = int_to_ptr.vmem [resolvable:$true] %s1397_s15 }
 0x2e3   : > { %p6488_p10 = scmp.ne.s32.totalorder %s7879_s0, %s6487_s28  ;;  %s6491_s13 = scalar_lea.hbm %s8876_s27, 32 }
 0x2e4   : > { %p6492_p0 = scmp.lt.u32.totalorder %s7879_s0, %s8876_s27  ;;  %p6493_p5 = scmp.lt.u32.totalorder %s6491_s13, %s6487_s28 }
 0x2e5   : > { %p6489_p12 = pnand %p6488_p10, %p8859_p11  ;;  %p6495_p3 = scmp.lt.u32.totalorder %s6487_s28, %s7879_s0 }
 0x2e6   : > { %p6494_p8 = por %p6493_p5, %p6492_p0 }
 0x2e7   : > { %p6490_p1 = pneg %p6489_p12 }
 0x2e8   : > { %p6496_p4 = por %p6495_p3, %p6494_p8 }
 0x2ea   : > { %p6497_p6 = pnand %p6496_p4, %p6490_p1 }
 0x2ec   : > { %6500 = shalt.err (!%p6497_p6)
}
 0x2ed   : > { %s6501_s23 = scalar_lea.vmem %s1398_s15, 16  ;;  %s7044_s6 = smov [#allocation25]  }
 0x2ee   : > { %p6502_p7 = scmp.ne.s32.totalorder %s1398_s15, %s6501_s23  ;;  %s6505_s29 = sshll.u32 %s7044_s6, 4  ;;  %s6506_s29 = int_to_ptr.vmem [resolvable:$false] %s6505_s29 }
 0x2ef   : > { %s6507_s26 = scalar_lea.vmem %s6506_s29, 32  ;;  %p6508_p2 = scmp.lt.s32.totalorder %s1398_s15, %s6506_s29 }
 0x2f0   : > { %p6503_p9 = pnand %p6502_p7, %p8859_p11  ;;  %p6509_p10 = scmp.lt.s32.totalorder %s6507_s26, %s6501_s23 }
 0x2f2   : > { %p6504_p13 = pneg %p6503_p9  ;;  %p6510_p12 = por %p6509_p10, %p6508_p2 }
 0x2f4   : > { %p6511_p0 = pnand %p6510_p12, %p6504_p13 }
 0x2f6   : > { %6514 = shalt.err (!%p6511_p0)
}
 0x2f7   : > { %s8877_s14 = sld [smem:[#allocation95_spill]]  ;;  %s5078_s2 = sshll.u32 %s8856_s9, 9 }
 0x2f8   : > { %5428 = dma.hbm_to_vmem [thread:$0]  (%p8859_p11), %s7879_s0, 16, %s1398_s15, %s7614_s21  }
 0x2f9   : > { %s1408_s28 = scalar_lea.vmem [#allocation26], %s4947_s4 }
 0x2fa   : > { %s1415_s13 = sshll.u32 %s1408_s28, 4  ;;  %s7924_s13 = int_to_ptr.vmem [resolvable:$true] %s1415_s13 }
 0x2fd   : > { %s7922_s6 = scalar_lea.hbm %s8877_s14, %s5078_s2  ;;  %s6519_s29 = scalar_lea.hbm %s8877_s14, 1024 }
 0x2fe   : > { %s6515_s23 = scalar_lea.hbm %s7922_s6, 512  ;;  %p6520_p3 = scmp.lt.u32.totalorder %s7922_s6, %s8877_s14 }
 0x2ff   : > { %p6516_p1 = scmp.ne.s32.totalorder %s7922_s6, %s6515_s23  ;;  %p6521_p4 = scmp.lt.u32.totalorder %s6519_s29, %s6515_s23 }
 0x300   : > { %p6523_p7 = scmp.lt.u32.totalorder %s6515_s23, %s7922_s6 }
 0x301   : > { %p6517_p5 = pnand %p6516_p1, %p8859_p11  ;;  %p6522_p6 = por %p6521_p4, %p6520_p3 }
 0x303   : > { %p6518_p8 = pneg %p6517_p5  ;;  %p6524_p9 = por %p6523_p7, %p6522_p6 }
 0x305   : > { %p6525_p13 = pnand %p6524_p9, %p6518_p8 }
 0x307   : > { %6528 = shalt.err (!%p6525_p13)
}
 0x308   : > { %s6529_s9 = scalar_lea.vmem %s7924_s13, 512  ;;  %s7045_s0 = smov [#allocation26]  }
 0x309   : > { %p6530_p2 = scmp.ne.s32.totalorder %s7924_s13, %s6529_s9  ;;  %s6533_s15 = sshll.u32 %s7045_s0, 4  ;;  %s6534_s15 = int_to_ptr.vmem [resolvable:$false] %s6533_s15 }
 0x30a   : > { %s6535_s4 = scalar_lea.vmem %s6534_s15, 1024  ;;  %p6536_p0 = scmp.lt.s32.totalorder %s7924_s13, %s6534_s15 }
 0x30b   : > { %p6531_p10 = pnand %p6530_p2, %p8859_p11  ;;  %p6537_p1 = scmp.lt.s32.totalorder %s6535_s4, %s6529_s9 }
 0x30d   : > { %p6532_p12 = pneg %p6531_p10  ;;  %p6538_p5 = por %p6537_p1, %p6536_p0 }
 0x30f   : > { %p6539_p3 = pnand %p6538_p5, %p6532_p12 }
 0x311   : > { %6542 = shalt.err (!%p6539_p3)
}
 0x312   : > { %s8878_s26 = sld [smem:[#allocation96_spill]]  ;;  %s8880_s2 = sld [smem:[#allocation97_spill]] }
 0x313   : > { %5429 = dma.hbm_to_vmem [thread:$0]  (%p8859_p11), %s7922_s6, 512, %s7924_s13, %s7572_s19, %s8865_s25, %s8865_s25, %s8864_s20  }
 0x314   : > { %s1428_s23 = scalar_lea.vmem [#allocation27], %s7631_s11 }
 0x315   : > { %s1435_s9 = sshll.u32 %s1428_s23, 4  ;;  %s1436_s9 = int_to_ptr.vmem [resolvable:$true] %s1435_s9 }
 0x318   : > { %s8879_s29 = smov %s8878_s26  ;;  %s8881_s14 = smov %s8880_s2 }
 0x319   : > { %s7949_s28 = scalar_lea.hbm %s8878_s26, %s7668_s12  ;;  %s7954_s0 = scalar_lea.hbm %s8880_s2, %s7668_s12 }
 0x31a   : > { %s6543_s15 = scalar_lea.hbm %s7949_s28, 16  ;;  %s6547_s4 = scalar_lea.hbm %s8879_s29, 32 }
 0x31b   : > { %p6544_p8 = scmp.ne.s32.totalorder %s7949_s28, %s6543_s15  ;;  %p6548_p7 = scmp.lt.u32.totalorder %s7949_s28, %s8879_s29 }
 0x31c   : > { %p6549_p9 = scmp.lt.u32.totalorder %s6547_s4, %s6543_s15  ;;  %p6551_p2 = scmp.lt.u32.totalorder %s6543_s15, %s7949_s28 }
 0x31d   : > { %p6545_p4 = pnand %p6544_p8, %p8859_p11 }
 0x31e   : > { %p6550_p13 = por %p6549_p9, %p6548_p7 }
 0x31f   : > { %p6546_p6 = pneg %p6545_p4 }
 0x320   : > { %p6552_p10 = por %p6551_p2, %p6550_p13 }
 0x322   : > { %p6553_p12 = pnand %p6552_p10, %p6546_p6 }
 0x324   : > { %6556 = shalt.err (!%p6553_p12)
}
 0x325   : > { %s6557_s20 = scalar_lea.vmem %s1436_s9, 16  ;;  %s7046_s25 = smov [#allocation27]  }
 0x326   : > { %p6558_p0 = scmp.ne.s32.totalorder %s1436_s9, %s6557_s20  ;;  %s6561_s13 = sshll.u32 %s7046_s25, 4  ;;  %s6562_s13 = int_to_ptr.vmem [resolvable:$false] %s6561_s13 }
 0x327   : > { %s6563_s6 = scalar_lea.vmem %s6562_s13, 32  ;;  %p6564_p3 = scmp.lt.s32.totalorder %s1436_s9, %s6562_s13 }
 0x328   : > { %p6559_p1 = pnand %p6558_p0, %p8859_p11  ;;  %p6565_p8 = scmp.lt.s32.totalorder %s6563_s6, %s6557_s20 }
 0x32a   : > { %p6560_p5 = pneg %p6559_p1  ;;  %p6566_p4 = por %p6565_p8, %p6564_p3 }
 0x32c   : > { %p6567_p7 = pnand %p6566_p4, %p6560_p5 }
 0x32e   : > { %6570 = shalt.err (!%p6567_p7)
}
 0x32f   : > { %s8882_s26 = sld [smem:[#allocation98_spill]]  ;;  %s1445_s2 = scalar_lea.vmem [#allocation28], %s7631_s11 }
 0x330   : > { %5430 = dma.hbm_to_vmem [thread:$0]  (%p8859_p11), %s7949_s28, 16, %s1436_s9, %s7544_s1  }
 0x331   : > { %s1452_s23 = sshll.u32 %s1445_s2, 4  ;;  %s6571_s20 = scalar_lea.hbm %s7954_s0, 16  ;;  %s1453_s23 = int_to_ptr.vmem [resolvable:$true] %s1452_s23 }
 0x332   : > { %p6572_p6 = scmp.ne.s32.totalorder %s7954_s0, %s6571_s20  ;;  %s6575_s25 = scalar_lea.hbm %s8881_s14, 32 }
 0x333   : > { %p6576_p2 = scmp.lt.u32.totalorder %s7954_s0, %s8881_s14  ;;  %p6577_p10 = scmp.lt.u32.totalorder %s6575_s25, %s6571_s20 }
 0x334   : > { %p6573_p9 = pnand %p6572_p6, %p8859_p11  ;;  %p6579_p0 = scmp.lt.u32.totalorder %s6571_s20, %s7954_s0 }
 0x335   : > { %s8883_s4 = smov %s8882_s26  ;;  %s7973_s15 = scalar_lea.hbm %s8882_s26, %s7668_s12 }
 0x336   : > { %p6574_p13 = pneg %p6573_p9  ;;  %p6578_p12 = por %p6577_p10, %p6576_p2 }
 0x338   : > { %p6580_p1 = por %p6579_p0, %p6578_p12 }
 0x33a   : > { %p6581_p5 = pnand %p6580_p1, %p6574_p13 }
 0x33c   : > { %6584 = shalt.err (!%p6581_p5)
}
 0x33d   : > { %s6585_s13 = scalar_lea.vmem %s1453_s23, 16  ;;  %s7047_s28 = smov [#allocation28]  }
 0x33e   : > { %p6586_p3 = scmp.ne.s32.totalorder %s1453_s23, %s6585_s13  ;;  %s6589_s9 = sshll.u32 %s7047_s28, 4  ;;  %s6590_s9 = int_to_ptr.vmem [resolvable:$false] %s6589_s9 }
 0x33f   : > { %s6591_s6 = scalar_lea.vmem %s6590_s9, 32  ;;  %p6592_p7 = scmp.lt.s32.totalorder %s1453_s23, %s6590_s9 }
 0x340   : > { %p6587_p8 = pnand %p6586_p3, %p8859_p11  ;;  %p6593_p6 = scmp.lt.s32.totalorder %s6591_s6, %s6585_s13 }
 0x342   : > { %p6588_p4 = pneg %p6587_p8  ;;  %p6594_p9 = por %p6593_p6, %p6592_p7 }
 0x344   : > { %p6595_p2 = pnand %p6594_p9, %p6588_p4 }
 0x346   : > { %6598 = shalt.err (!%p6595_p2)
}
 0x347   : > { %s8884_s26 = sld [smem:[#allocation99_spill]]  ;;  %s1462_s2 = scalar_lea.vmem [#allocation29], %s7631_s11 }
 0x348   : > { %5431 = dma.hbm_to_vmem [thread:$0]  (%p8859_p11), %s7954_s0, 16, %s1453_s23, %s7614_s21  }
 0x349   : > { %s1469_s25 = sshll.u32 %s1462_s2, 4  ;;  %s6599_s28 = scalar_lea.hbm %s7973_s15, 16  ;;  %s1470_s25 = int_to_ptr.vmem [resolvable:$true] %s1469_s25 }
 0x34a   : > { %p6600_p13 = scmp.ne.s32.totalorder %s7973_s15, %s6599_s28  ;;  %s6603_s9 = scalar_lea.hbm %s8883_s4, 32 }
 0x34b   : > { %p6604_p0 = scmp.lt.u32.totalorder %s7973_s15, %s8883_s4  ;;  %p6605_p1 = scmp.lt.u32.totalorder %s6603_s9, %s6599_s28 }
 0x34c   : > { %p6601_p10 = pnand %p6600_p13, %p8859_p11  ;;  %p6607_p3 = scmp.lt.u32.totalorder %s6599_s28, %s7973_s15 }
 0x34d   : > { %s8885_s20 = smov %s8884_s26  ;;  %s7992_s13 = scalar_lea.hbm %s8884_s26, %s7668_s12 }
 0x34e   : > { %p6602_p12 = pneg %p6601_p10  ;;  %p6606_p5 = por %p6605_p1, %p6604_p0 }
 0x350   : > { %p6608_p8 = por %p6607_p3, %p6606_p5 }
 0x352   : > { %p6609_p4 = pnand %p6608_p8, %p6602_p12 }
 0x354   : > { %6612 = shalt.err (!%p6609_p4)
}
 0x355   : > { %s6613_s6 = scalar_lea.vmem %s1470_s25, 16  ;;  %s7048_s0 = smov [#allocation29]  }
 0x356   : > { %p6614_p7 = scmp.ne.s32.totalorder %s1470_s25, %s6613_s6  ;;  %s6617_s23 = sshll.u32 %s7048_s0, 4  ;;  %s6618_s23 = int_to_ptr.vmem [resolvable:$false] %s6617_s23 }
 0x357   : > { %s6619_s26 = scalar_lea.vmem %s6618_s23, 32  ;;  %p6620_p2 = scmp.lt.s32.totalorder %s1470_s25, %s6618_s23 }
 0x358   : > { %p6615_p6 = pnand %p6614_p7, %p8859_p11  ;;  %p6621_p13 = scmp.lt.s32.totalorder %s6619_s26, %s6613_s6 }
 0x35a   : > { %p6616_p9 = pneg %p6615_p6  ;;  %p6622_p10 = por %p6621_p13, %p6620_p2 }
 0x35c   : > { %p6623_p0 = pnand %p6622_p10, %p6616_p9 }
 0x35e   : > { %6626 = shalt.err (!%p6623_p0)
}
 0x35f   : > { %s8886_s2 = sld [smem:[#allocation100_spill]]  ;;  %s1479_s28 = scalar_lea.vmem [#allocation30], %s7631_s11 }
 0x360   : > { %5432 = dma.hbm_to_vmem [thread:$0]  (%p8859_p11), %s7973_s15, 16, %s1470_s25, %s7572_s19  }
 0x361   : > { %s1486_s6 = sshll.u32 %s1479_s28, 4  ;;  %s6627_s23 = scalar_lea.hbm %s7992_s13, 16  ;;  %s1487_s6 = int_to_ptr.vmem [resolvable:$true] %s1486_s6 }
 0x362   : > { %p6628_p12 = scmp.ne.s32.totalorder %s7992_s13, %s6627_s23  ;;  %s6631_s26 = scalar_lea.hbm %s8885_s20, 32 }
 0x363   : > { %p6632_p3 = scmp.lt.u32.totalorder %s7992_s13, %s8885_s20  ;;  %p6633_p8 = scmp.lt.u32.totalorder %s6631_s26, %s6627_s23 }
 0x364   : > { %p6629_p1 = pnand %p6628_p12, %p8859_p11  ;;  %p6635_p7 = scmp.lt.u32.totalorder %s6627_s23, %s7992_s13 }
 0x365   : > { %s8887_s9 = smov %s8886_s2  ;;  %s8011_s0 = scalar_lea.hbm %s8886_s2, %s7668_s12 }
 0x366   : > { %p6630_p5 = pneg %p6629_p1  ;;  %p6634_p4 = por %p6633_p8, %p6632_p3 }
 0x368   : > { %p6636_p6 = por %p6635_p7, %p6634_p4 }
 0x36a   : > { %p6637_p9 = pnand %p6636_p6, %p6630_p5 }
 0x36c   : > { %6640 = shalt.err (!%p6637_p9)
}
 0x36d   : > { %s6641_s4 = scalar_lea.vmem %s1487_s6, 16  ;;  %s7049_s15 = smov [#allocation30]  }
 0x36e   : > { %p6642_p2 = scmp.ne.s32.totalorder %s1487_s6, %s6641_s4  ;;  %s6645_s25 = sshll.u32 %s7049_s15, 4  ;;  %s6646_s25 = int_to_ptr.vmem [resolvable:$false] %s6645_s25 }
 0x36f   : > { %s6647_s2 = scalar_lea.vmem %s6646_s25, 32  ;;  %p6648_p0 = scmp.lt.s32.totalorder %s1487_s6, %s6646_s25 }
 0x370   : > { %p6643_p13 = pnand %p6642_p2, %p8859_p11  ;;  %p6649_p12 = scmp.lt.s32.totalorder %s6647_s2, %s6641_s4 }
 0x372   : > { %p6644_p10 = pneg %p6643_p13  ;;  %p6650_p1 = por %p6649_p12, %p6648_p0 }
 0x374   : > { %p6651_p3 = pnand %p6650_p1, %p6644_p10 }
 0x376   : > { %6654 = shalt.err (!%p6651_p3)
}
 0x377   : > { %s8888_s28 = sld [smem:[#allocation101_spill]]  ;;  %s1496_s23 = scalar_lea.vmem [#allocation31], %s7631_s11 }
 0x378   : > { %5433 = dma.hbm_to_vmem [thread:$0]  (%p8859_p11), %s7992_s13, 16, %s1487_s6, %s7544_s1  }
 0x379   : > { %s1503_s4 = sshll.u32 %s1496_s23, 4  ;;  %s6655_s15 = scalar_lea.hbm %s8011_s0, 16  ;;  %s1504_s4 = int_to_ptr.vmem [resolvable:$true] %s1503_s4 }
 0x37a   : > { %p6656_p5 = scmp.ne.s32.totalorder %s8011_s0, %s6655_s15  ;;  %s6659_s25 = scalar_lea.hbm %s8887_s9, 32 }
 0x37b   : > { %p6660_p7 = scmp.lt.u32.totalorder %s8011_s0, %s8887_s9  ;;  %p6661_p6 = scmp.lt.u32.totalorder %s6659_s25, %s6655_s15 }
 0x37c   : > { %p6657_p8 = pnand %p6656_p5, %p8859_p11  ;;  %p6663_p2 = scmp.lt.u32.totalorder %s6655_s15, %s8011_s0 }
 0x37d   : > { %s8889_s14 = smov %s8888_s28  ;;  %s8030_s26 = scalar_lea.hbm %s8888_s28, %s7668_s12 }
 0x37e   : > { %p6658_p4 = pneg %p6657_p8  ;;  %p6662_p9 = por %p6661_p6, %p6660_p7 }
 0x380   : > { %p6664_p13 = por %p6663_p2, %p6662_p9 }
 0x382   : > { %p6665_p10 = pnand %p6664_p13, %p6658_p4 }
 0x384   : > { %6668 = shalt.err (!%p6665_p10)
}
 0x385   : > { %s6669_s2 = scalar_lea.vmem %s1504_s4, 16  ;;  %s7050_s13 = smov [#allocation31]  }
 0x386   : > { %p6670_p0 = scmp.ne.s32.totalorder %s1504_s4, %s6669_s2  ;;  %s6673_s6 = sshll.u32 %s7050_s13, 4  ;;  %s6674_s6 = int_to_ptr.vmem [resolvable:$false] %s6673_s6 }
 0x387   : > { %s6675_s28 = scalar_lea.vmem %s6674_s6, 32  ;;  %p6676_p3 = scmp.lt.s32.totalorder %s1504_s4, %s6674_s6 }
 0x388   : > { %p6671_p12 = pnand %p6670_p0, %p8859_p11  ;;  %p6677_p5 = scmp.lt.s32.totalorder %s6675_s28, %s6669_s2 }
 0x38a   : > { %p6672_p1 = pneg %p6671_p12  ;;  %p6678_p8 = por %p6677_p5, %p6676_p3 }
 0x38c   : > { %p6679_p6 = pnand %p6678_p8, %p6672_p1 }
 0x38e   : > { %6682 = shalt.err (!%p6679_p6)
}
 0x38f   : > { %s8890_s23 = sld [smem:[#allocation102_spill]]  ;;  %s1513_s15 = scalar_lea.vmem [#allocation32], %s7631_s11 }
 0x390   : > { %5434 = dma.hbm_to_vmem [thread:$0]  (%p8859_p11), %s8011_s0, 16, %s1504_s4, %s7614_s21  }
 0x391   : > { %s1520_s2 = sshll.u32 %s1513_s15, 4  ;;  %s6683_s6 = scalar_lea.hbm %s8030_s26, 16  ;;  %s1521_s2 = int_to_ptr.vmem [resolvable:$true] %s1520_s2 }
 0x392   : > { %p6684_p4 = scmp.ne.s32.totalorder %s8030_s26, %s6683_s6  ;;  %s6687_s28 = scalar_lea.hbm %s8889_s14, 32 }
 0x393   : > { %p6688_p2 = scmp.lt.u32.totalorder %s8030_s26, %s8889_s14  ;;  %p6689_p13 = scmp.lt.u32.totalorder %s6687_s28, %s6683_s6 }
 0x394   : > { %p6685_p7 = pnand %p6684_p4, %p8859_p11  ;;  %p6691_p0 = scmp.lt.u32.totalorder %s6683_s6, %s8030_s26 }
 0x395   : > { %s8891_s25 = smov %s8890_s23  ;;  %s8049_s13 = scalar_lea.hbm %s8890_s23, %s7668_s12 }
 0x396   : > { %p6686_p9 = pneg %p6685_p7  ;;  %p6690_p10 = por %p6689_p13, %p6688_p2 }
 0x398   : > { %p6692_p12 = por %p6691_p0, %p6690_p10 }
 0x39a   : > { %p6693_p1 = pnand %p6692_p12, %p6686_p9 }
 0x39c   : > { %6696 = shalt.err (!%p6693_p1)
}
 0x39d   : > { %s6697_s9 = scalar_lea.vmem %s1521_s2, 16  ;;  %s7051_s21 = smov [#allocation32]  }
 0x39e   : > { %p6698_p3 = scmp.ne.s32.totalorder %s1521_s2, %s6697_s9  ;;  %s6701_s12 = sshll.u32 %s7051_s21, 4  ;;  %s6702_s12 = int_to_ptr.vmem [resolvable:$false] %s6701_s12 }
 0x39f   : > { %s6703_s0 = scalar_lea.vmem %s6702_s12, 32  ;;  %p6704_p6 = scmp.lt.s32.totalorder %s1521_s2, %s6702_s12 }
 0x3a0   : > { %p6699_p5 = pnand %p6698_p3, %p8859_p11  ;;  %p6705_p4 = scmp.lt.s32.totalorder %s6703_s0, %s6697_s9 }
 0x3a2   : > { %p6700_p8 = pneg %p6699_p5  ;;  %p6706_p7 = por %p6705_p4, %p6704_p6 }
 0x3a4   : > { %p6707_p2 = pnand %p6706_p7, %p6700_p8 }
 0x3a6   : > { %6710 = shalt.err (!%p6707_p2)
}
 0x3a7   : > { %5435 = dma.hbm_to_vmem [thread:$0]  (%p8859_p11), %s8030_s26, 16, %s1521_s2, %s7572_s19  }
 0x3a8   : > { %s1530_s4 = scalar_lea.vmem [#allocation33], %s7631_s11  ;;  %s6711_s9 = scalar_lea.hbm %s8049_s13, 16 }
 0x3a9   : > { %s1537_s23 = sshll.u32 %s1530_s4, 4  ;;  %p6712_p9 = scmp.ne.s32.totalorder %s8049_s13, %s6711_s9  ;;  %s1538_s23 = int_to_ptr.vmem [resolvable:$true] %s1537_s23 }
 0x3aa   : > { %s6715_s15 = scalar_lea.hbm %s8891_s25, 32  ;;  %p6716_p0 = scmp.lt.u32.totalorder %s8049_s13, %s8891_s25 }
 0x3ab   : > { %p6713_p13 = pnand %p6712_p9, %p8859_p11  ;;  %p6717_p12 = scmp.lt.u32.totalorder %s6715_s15, %s6711_s9 }
 0x3ac   : > { %p6719_p3 = scmp.lt.u32.totalorder %s6711_s9, %s8049_s13 }
 0x3ad   : > { %p6714_p10 = pneg %p6713_p13  ;;  %p6718_p1 = por %p6717_p12, %p6716_p0 }
 0x3af   : > { %p6720_p5 = por %p6719_p3, %p6718_p1 }
 0x3b1   : > { %p6721_p8 = pnand %p6720_p5, %p6714_p10 }
 0x3b3   : > { %6724 = shalt.err (!%p6721_p8)
}
 0x3b4   : > { %s6725_s6 = scalar_lea.vmem %s1538_s23, 16  ;;  %s7052_s19 = smov [#allocation33]  }
 0x3b5   : > { %p6726_p6 = scmp.ne.s32.totalorder %s1538_s23, %s6725_s6  ;;  %s6729_s11 = sshll.u32 %s7052_s19, 4  ;;  %s6730_s11 = int_to_ptr.vmem [resolvable:$false] %s6729_s11 }
 0x3b6   : > { %s6731_s26 = scalar_lea.vmem %s6730_s11, 32  ;;  %p6732_p2 = scmp.lt.s32.totalorder %s1538_s23, %s6730_s11 }
 0x3b7   : > { %p6727_p4 = pnand %p6726_p6, %p8859_p11  ;;  %p6733_p9 = scmp.lt.s32.totalorder %s6731_s26, %s6725_s6 }
 0x3b9   : > { %p6728_p7 = pneg %p6727_p4  ;;  %p6734_p13 = por %p6733_p9, %p6732_p2 }
 0x3bb   : > { %p6735_p0 = pnand %p6734_p13, %p6728_p7 }
 0x3bd   : > { %6738 = shalt.err (!%p6735_p0)
}
 0x3be   : > { %5436 = dma.hbm_to_vmem [thread:$0]  (%p8859_p11), %s8049_s13, 16, %s1538_s23, %s7544_s1  }
 0x3bf PF: > { %p8892_p10 = scmp.ne.s32.totalorder %s8842_s3, 0 }
 0x3c0   : > { %s1548_s2 = sand.u32 (!%p8892_p10), 1, %s7309_s10   ;;  %s8084_s28 = sand.u32 (!%p8892_p10), 1, %s6953_s22  }
 0x3c1   : > { %1546 = sbr.rel (%p8892_p10) target bundleno = 8816 (0x2270), region = 156  ;;  %s8087_s21 = sshll.u32 (!%p8892_p10), %s8084_s28, 3 }
 0x3c2   : > { %s8089_s12 = scalar_lea.sflag (!%p8892_p10), [#allocation4], %s1548_s2  ;;  %s1552_s5 = scalar_lea.vmem (!%p8892_p10), [#allocation3], %s8087_s21 }
 0x3c3   : > { %p8893_p12 = scmp.ne.s32.totalorder (!%p8892_p10), %s8831_s17, 0 }
 0x3c8   : > { %6812 = dma.done.wait (%p8893_p12), %s8089_s12, 128  }
 0x3c9   : > { %6814 = vsyncadd (%p8893_p12), %s8089_s12, 4294967168  ;;  %s8098_s3 = scalar_lea.sflag [#allocation7], %s1548_s2  ;;  %s1561_s1 = scalar_lea.vmem [#allocation6], %s8087_s21 }
 0x3ca   : > { %6816 = dma.done.wait (%p8893_p12), %s8098_s3, 256  }
 0x3cb   : > { %6818 = vsyncadd (%p8893_p12), %s8098_s3, 4294967040  ;;  %s1570_s13 = scalar_lea.vmem [#allocation8], %s8087_s21  ;;  %s8108_s0 = scalar_lea.sflag [#allocation10], %s1548_s2 }
 0x3cc   : > { %s1578_s4 = scalar_lea.vmem [#allocation9], %s8084_s28 }
 0x3cd   : > { %6820 = dma.done.wait (%p8893_p12), %s8108_s0, 16  }
 0x3ce   : > { %6822 = vsyncadd (%p8893_p12), %s8108_s0, 4294967280  ;;  %p8894_p11 = scmp.eq.s32.totalorder %s7309_s10, 0 }
 0x3d0   : > { %6824 = dma.done.wait (%p8894_p11), [#allocation10], 256   ;;  %p8895_p1 = pmov %p8894_p11 }
 0x3d2   : > { %6826 = vsyncadd (%p8895_p1), [#allocation10], 4294967040  ;;  %p8896_p3 = pmov %p8895_p1 }
 0x3d3   : > { %p8897_p5 = pmov %p8895_p1 }
 0x3d4   : > { %6828 = dma.done.wait (%p8896_p3), [#allocation13], 16  }
 0x3d5   : > { %6830 = vsyncadd (%p8897_p5), [#allocation13], 4294967280  ;;  %s8126_s23 = sand.u32 1, %s6941_s16   ;;  %p8898_p8 = scmp.ne.s32.totalorder %s8835_s8, 0 }
 0x3d6   : > { %s8129_s17 = sshll.u32 %s8126_s23, 4 }
 0x3d7   : > { %s1595_s9 = scalar_lea.vmem [#allocation14], %s8129_s17 }
 0x3d8   : > { %6832 = dma.done.wait (%p8898_p8), %s8089_s12, 256  }
 0x3d9   : > { %6834 = vsyncadd (%p8898_p8), %s8089_s12, 4294967040  ;;  %s1603_s15 = scalar_lea.vmem [#allocation15], %s8126_s23 }
 0x3da   : > { %6836 = dma.done.wait (%p8898_p8), %s8098_s3, 16  }
 0x3db   : > { %6838 = vsyncadd (%p8898_p8), %s8098_s3, 4294967280  ;;  %s8146_s6 = scalar_lea.vmem [#allocation16], %s8129_s17 }
 0x3dc   : > { %6840 = dma.done.wait (%p8898_p8), %s8108_s0, 256  }
 0x3dd   : > { %6842 = vsyncadd (%p8898_p8), %s8108_s0, 4294967040 }
 0x3de   : > { %6844 = dma.done.wait (%p8898_p8), %s8089_s12, 16  }
 0x3df   : > { %6846 = vsyncadd (%p8898_p8), %s8089_s12, 4294967280 }
 0x3e0   : > { %6848 = dma.done.wait (%p8898_p8), %s8098_s3, 256  }
 0x3e1   : > { %6850 = vsyncadd (%p8898_p8), %s8098_s3, 4294967040 }
 0x3e2   : > { %6852 = dma.done.wait (%p8898_p8), %s8108_s0, 16  }
 0x3e3   : > { %6854 = vsyncadd (%p8898_p8), %s8108_s0, 4294967280 }
 0x3e4   : > { %6856 = dma.done.wait (%p8898_p8), %s8089_s12, 256  }
 0x3e5   : > { %6858 = vsyncadd (%p8898_p8), %s8089_s12, 4294967040 }
 0x3e6   : > { %6860 = dma.done.wait (%p8898_p8), %s8098_s3, 16  }
 0x3e7   : > { %6862 = vsyncadd (%p8898_p8), %s8098_s3, 4294967280  ;;  %s8190_s11 = scalar_lea.vmem [#allocation22], %s8129_s17 }
 0x3e8   : > { %6864 = dma.done.wait (%p8898_p8), %s8108_s0, 256  }
 0x3e9   : > { %6866 = vsyncadd (%p8898_p8), %s8108_s0, 4294967040 }
 0x3ea   : > { %6868 = dma.done.wait (%p8898_p8), %s8089_s12, 16  }
 0x3eb   : > { %6870 = vsyncadd (%p8898_p8), %s8089_s12, 4294967280 }
 0x3ec   : > { %6872 = dma.done.wait (%p8898_p8), %s8098_s3, 256  }
 0x3ed   : > { %6874 = vsyncadd (%p8898_p8), %s8098_s3, 4294967040 }
 0x3ee   : > { %6876 = dma.done.wait (%p8898_p8), %s8108_s0, 16  }
 0x3ef   : > { %6878 = vsyncadd (%p8898_p8), %s8108_s0, 4294967280  ;;  %s4969_s2 = sshll.u32 %s8126_s23, 5 }
 0x3f0   : > { %s8220_s19 = scalar_lea.vmem [#allocation26], %s4969_s2 }
 0x3f1   : > { %6880 = dma.done.wait (%p8898_p8), %s8089_s12, 512  }
 0x3f2   : > { %6882 = vsyncadd (%p8898_p8), %s8089_s12, 4294966784 }
 0x3f3   : > { %6884 = dma.done.wait (%p8898_p8), %s8098_s3, 16  }
 0x3f4   : > { %6886 = vsyncadd (%p8898_p8), %s8098_s3, 4294967280 }
 0x3f5   : > { %6888 = dma.done.wait (%p8898_p8), %s8108_s0, 16  }
 0x3f6   : > { %6890 = vsyncadd (%p8898_p8), %s8108_s0, 4294967280 }
 0x3f7   : > { %6892 = dma.done.wait (%p8898_p8), %s8089_s12, 16  }
 0x3f8   : > { %6894 = vsyncadd (%p8898_p8), %s8089_s12, 4294967280 }
 0x3f9   : > { %6896 = dma.done.wait (%p8898_p8), %s8098_s3, 16  }
 0x3fa   : > { %6898 = vsyncadd (%p8898_p8), %s8098_s3, 4294967280 }
 0x3fb   : > { %6900 = dma.done.wait (%p8898_p8), %s8108_s0, 16  }
 0x3fc   : > { %6902 = vsyncadd (%p8898_p8), %s8108_s0, 4294967280  ;;  %s1745_s2 = scalar_lea.vmem [#allocation32], %s8126_s23 }
 0x3fd   : > { %6904 = dma.done.wait (%p8898_p8), %s8089_s12, 16  }
 0x3fe   : > { %6906 = vsyncadd (%p8898_p8), %s8089_s12, 4294967280  ;;  %s1753_s26 = scalar_lea.vmem [#allocation33], %s8126_s23 }
 0x3ff   : > { %6908 = dma.done.wait (%p8898_p8), %s8098_s3, 16  }
 0x400   : > { %6910 = vsyncadd (%p8898_p8), %s8098_s3, 4294967280  ;;  %p8899_p6 = pmov %p8895_p1 }
 0x401   : > { %p8900_p4 = pmov %p8895_p1 }
 0x402   : > { %6912 = dma.done.wait (%p8899_p6), [#allocation10], 512  }
 0x403   : > { %6914 = vsyncadd (%p8900_p4), [#allocation10], 4294966784  ;;  %p8901_p7 = pmov %p8895_p1 }
 0x404   : > { %p8902_p2 = pmov %p8895_p1 }
 0x405   : > { %6916 = dma.done.wait (%p8901_p7), [#allocation13], 32  }
 0x406   : > { %6918 = vsyncadd (%p8902_p2), [#allocation13], 4294967264  ;;  %p8903_p9 = pmov %p8895_p1 }
 0x407   : > { %p8904_p13 = pmov %p8895_p1 }
 0x408   : > { %6920 = dma.done.wait (%p8903_p9), [#allocation37], 2064  }
 0x409   : > { %6922 = vsyncadd (%p8904_p13), [#allocation37], 4294965232  ;;  %p8905_p0 = pmov %p8895_p1 }
 0x40b   : > { %6924 = dma.done.wait (%p8905_p0), [#allocation40], 528   ;;  %p8906_p10 = pmov %p8905_p0 }
 0x40c   : > { %p8907_p12 = pmov %p8905_p0 }
 0x40d   : > { %6926 = vsyncadd (%p8906_p10), [#allocation40], 4294966768 }
 0x40e   : > { %6928 = dma.done.wait (%p8907_p12), [#allocation43], 272   ;;  %p8908_p11 = pmov %p8905_p0 }
 0x40f   : > { %v8299_v0 = vld [vmem:[%s1570_s13] sm:$0xff]  ;;  %v1972_v1 = vld [vmem:[%s1578_s4] sm:$0x1]  ;;  %s1969_s8 = scalar_lea.vmem [#allocation45], %s8084_s28  ;;  %s8909_s10 = sld [smem:[#allocation114_spill]] }
 0x410   : > { %6930 = vsyncadd (%p8908_p11), [#allocation43], 4294967024  ;;  %v8305_v2 = vld [vmem:[%s1561_s1] sm:$0xff]  ;;  %v4978_v3 = vadd.f32 -1.0, %v8299_v0  ;;  %v4979_v4 = vadd.f32 -1.0, %v1972_v1 }
 0x411   : > { %v1978_v5 = vpack.c.bf16 %v8305_v2, %v8305_v2 }
 0x412   : > { %v1974_v6 = vmul.f32 1e+10, %v4978_v3  ;;  %v8310_v7 = vmul.f32 1e+10, %v4979_v4 }
 0x415   : > { %p4980_p1 = scmp.ne.s32.totalorder %s8909_s10, 0 }
 0x416   : > { %v5696_v8 = vld [vmem:[#allocation11] sm:$0xff] (!%p4980_p1)   ;;  %v7053_v9 = vmov (!%p4980_p1), 0.0   ;;  %v5697_v10 = vld [vmem:[#allocation11 + $0x8] sm:$0xff] (!%p4980_p1)   ;;  %vm7054_vm0 = vmmov (!%p4980_p1), 0   ;;  %vm2008_vm1 = vcmask (!%p4980_p1), 261120  }
 0x417   : > { %1982 = sbr.rel (%p4980_p1) target bundleno = 1270 (0x4f6), region = 296  ;;  %5177 = vmatprep.subr.bf16.mxu0 (!%p4980_p1), %v7053_v9  ;;  %5181 = vmatprep.mubr.msk.bf16.mxu0 (!%p4980_p1), %vm7054_vm0, %v7053_v9  ;;  %v1983_v11 = vld [vmem:[%s1552_s5] sm:$0xff] (!%p4980_p1) }
 0x418   : > { %5178 = vmatpush3.bf16.msra.mxu0 (!%p4980_p1), %v5696_v8  ;;  %v1984_v12 = vpack.c.bf16 (!%p4980_p1), %v1983_v11, %v1983_v11  ;;  %v4981_v13 = vld [vmem:[#allocation12] ss:$0 sm:$0xff] (!%p4980_p1) }
 0x419   : > { %5179 = vmatprep.subr.bf16.mxu0 (!%p4980_p1), %v7053_v9 }
 0x41c   : > { %5180 = vmatpush3.bf16.msra.mxu0 (!%p4980_p1), %v5697_v10 }
 0x41f   : > { %5182 = vmatmul.mubr.msk.bf16.vlgmr.msra.gmra.mrb[0].mxu0 %vm2008_vm1, %v1984_v12 }
 0x4f2   : > { %v2046_v14 = vpop.f32.mrb[0].mxu0 }
 0x4f3   : > { %v2047_v15 = vadd.f32 %v4981_v13, %v2046_v14  ;;  %v5183_v16 = vpop.f32.mrb[1].mxu0 }
 0x4f4   : > { %v2049_v17 = vpop.f32.mrb[2].mxu0 }
 0x4f5   : > { %2052 = vst.msk [vmem:[#allocation2] sm:$0xff] %vm2008_vm1, %v2047_v15  ;;  %v5184_v18 = vpop.f32.mrb[3].mxu0 }
 0x4f6 PF: > { %v5700_v19 = vld [vmem:[%s1595_s9] sm:$0xff]   ;;  %v7055_v20 = vmov 0.0   ;;  %v5701_v21 = vld [vmem:[%s1595_s9 + $0x8] sm:$0xff]   ;;  %vm7056_vm2 = vmmov 0   ;;  %vm2078_vm3 = vcmask 261120   ;;  %s7057_s21 = smov 120  }
 0x4f7   : > { %5185 = vmatprep.subr.bf16.mxu1 %v7055_v20  ;;  %5199 = vmatprep.subr.bf16.mxu0 %v7055_v20  ;;  %v4985_v24 = vld [vmem:[%s1603_s15] ss:$0 sm:$0xff]  ;;  %s7058_s12 = smov 96   ;;  %s7059_s5 = smov 88   ;;  %v7060_v31 = vmov 0   ;;  %vm2131_vm4 = vcmask 64512  }
 0x4f8   : > { %5186 = vmatpush3.bf16.msra.mxu1 %v5700_v19  ;;  %5189 = vmatprep.mubr.msk.bf16.mxu1 %vm7056_vm2, %v7055_v20  ;;  %s7061_s3 = smov 64   ;;  %s7062_s1 = smov 80   ;;  %vm2202_vm5 = vcmask 1043456   ;;  %v2123_v14 = vld [vmem:[%s8146_s6] sm:$0xf]  ;;  %vm3751_vm10 = vcmask 523264  }
 0x4f9   : > { %5187 = vmatprep.subr.bf16.mxu1 %v7055_v20  ;;  %5201 = vmatprep.mubr.msk.bf16.mxu0 %vm7056_vm2, %v7055_v20  ;;  %s7063_s13 = smov 112   ;;  %s7064_s0 = smov 56   ;;  %v2410_v15 = vsel %vm2202_vm5, %v2123_v14, 0  ;;  %v2124_v16 = vld [vmem:[%s8146_s6 + $0x4] sm:$0xf] }
 0x4fa   : > { %5698 = vset.pattern.permute.xlu1 %v7060_v31  ;;  %5699 = vset.pattern.permute.xlu0 %v7060_v31  ;;  %v2364_v17 = vsel %vm2202_vm5, %v2124_v16, 0  ;;  %s7065_s4 = smov 48   ;;  %s7066_s9 = smov 104  }
 0x4fb   : > { %s7067_s15 = smov 72   ;;  %s7068_s10 = smov 40  }
 0x4fc   : > { %v8324_v22 = vld [vmem:[#allocation2] sm:$0xff]  ;;  %5188 = vmatpush3.bf16.msra.mxu1 %v5701_v21 }
 0x4fd   : > { %v2054_v23 = vpack.c.bf16 %v8324_v22, %v8324_v22  ;;  %5193 = vmatprep.subr.bf16.mxu1 %v7055_v20 }
 0x4ff   : > { %5190 = vmatmul.mubr.msk.bf16.vlgmr.msra.gmra.mrb[0].mxu1 %vm2078_vm3, %v2054_v23 }
 0x500   : > { %5195 = vmatprep.mubr.msk.bf16.mxu1 %vm7056_vm2, %v7055_v20 }
 0x5d2   : > { %v2116_v25 = vpop.f32.mrb[0].mxu1 }
 0x5d3   : > { %v2117_v26 = vadd.f32 %v4985_v24, %v2116_v25  ;;  %v5191_v27 = vpop.f32.mrb[1].mxu1 }
 0x5d4   : > { %v2119_v28 = vpop.f32.mrb[2].mxu1 }
 0x5d5   : > { %v8337_v29 = vpack.c.bf16 %v2117_v26, %v2117_v26  ;;  %v5192_v30 = vpop.f32.mrb[3].mxu1 }
 0x5d7   : > { %2247 = vrot.lane.b32.xlu1 %v8337_v29, %s7057_s21  ;;  %2129 = vrot.lane.b32.xlu0 %v8337_v29, %s7058_s12 }
 0x5db   : > { %2249 = vrot.lane.b32.xlu0 %v8337_v29, %s7059_s5  ;;  %2181 = vperm.xlu1 %5698, %v1974_v6  }
 0x649   : > { %v2130_v32 = vpop.permute.xlu0 %2129  ;;  %v2248_v36 = vpop.permute.xlu1 %2247 }
 0x64a   : > { %v2136_v33 = vsel %vm2131_vm4, %v2130_v32, 0 }
 0x64b   : > { %5194 = vmatpush3.bf16.xpose.msra.mxu1 %v2136_v33 }
 0x64c   : > { %5205 = vmatprep.subr.bf16.mxu1 %v7055_v20 }
 0x64d   : > { %v2250_v34 = vpop.permute.xlu0 %2249 }
 0x64e   : > { %v2255_v35 = vsel %vm2131_vm4, %v2250_v34, 0 }
 0x652   : > { %5196 = vmatmul.mubr.msk.bf16.vlgmr.msra.gmra.mrb[4].mxu1 %vm2131_vm4, %v8337_v29 }
 0x653   : > { %5206 = vmatpush3.bf16.xpose.msra.mxu1 %v2255_v35  ;;  %5207 = vmatprep.mubr.msk.bf16.mxu1 %vm7056_vm2, %v7055_v20 }
 0x654   : > { %5217 = vmatprep.subr.bf16.mxu1 %v7055_v20 }
 0x65a   : > { %5208 = vmatmul.mubr.msk.bf16.vlgmr.msra.gmra.mrb[8].mxu1 %vm2131_vm4, %v2248_v36  ;;  %v8356_v38 = vpop.permute.xlu1 %2181 }
 0x65b   : > { %5219 = vmatprep.mubr.msk.bf16.mxu1 %vm7056_vm2, %v7055_v20  ;;  %5218 = vmatpush3.bf16.msra.mxu1 %v2364_v17 }
 0x65c   : > { %5229 = vmatprep.subr.bf16.mxu1 %v7055_v20 }
 0x725   : > { %v2172_v37 = vpop.f32.mrb[4].mxu1 }
 0x726   : > { %v2178_v39 = vmul.f32 0.35355338, %v2172_v37  ;;  %v5197_v40 = vpop.f32.mrb[5].mxu1 }
 0x727   : > { %v2175_v41 = vpop.f32.mrb[6].mxu1 }
 0x728   : > { %v5198_v42 = vpop.f32.mrb[7].mxu1  ;;  %v2184_v43 = vadd.f32 %v8356_v38, %v2178_v39 }
 0x72a   : > { %v2185_v44 = vsel %vm2131_vm4, %v2184_v43, -inf }
 0x72b   : > { %2186 = vmax.xlane.f32.xlu0 %v2185_v44 }
 0x72d   : > { %v2291_v45 = vpop.f32.mrb[8].mxu1 }
 0x72e   : > { %v2297_v46 = vmul.f32 0.35355338, %v2291_v45  ;;  %v5209_v47 = vpop.f32.mrb[9].mxu1 }
 0x72f   : > { %v2294_v48 = vpop.f32.mrb[10].mxu1 }
 0x730   : > { %v5210_v49 = vpop.f32.mrb[11].mxu1  ;;  %v2298_v50 = vadd.f32 %v2297_v46, %v8356_v38 }
 0x732   : > { %v2299_v51 = vsel %vm2131_vm4, %v2298_v50, -inf }
 0x733   : > { %2300 = vmax.xlane.f32.xlu1 %v2299_v51 }
 0x744   : > { %2197 = vrot.lane.b32.xlu1 %v8337_v29, %s7061_s3  ;;  %s8911_s3 = scalar_lea.vmem [#allocation20], %s8129_s17 }
 0x748   : > { %2454 = vrot.lane.b32.xlu1 %v8337_v29, %s7062_s1 }
 0x74c   : > { %2452 = vrot.lane.b32.xlu1 %v8337_v29, %s7063_s13 }
 0x7b8   : > { %v2187_v52 = vpop.xlane.xlu0 %2186 }
 0x7b9   : > { %v2188_v53 = vsub.f32 %v2184_v43, %v2187_v52 }
 0x7bb   : > { %v2189_v54 = vmul.f32 1.442695, %v2188_v53 }
 0x7bd   : > { %5712 = vpow2.f32 %v2189_v54 }
 0x7c0   : > { %v2301_v55 = vpop.xlane.xlu1 %2300 }
 0x7c1   : > { %v2302_v56 = vsub.f32 %v2298_v50, %v2301_v55 }
 0x7c3   : > { %v2303_v57 = vmul.f32 1.442695, %v2302_v56 }
 0x7c4   : > { %v2198_v58 = vpop.permute.xlu1 %2197 }
 0x7c5   : > { %5714 = vpow2.f32 %v2303_v57  ;;  %v2204_v59 = vsel %vm2202_vm5, %v2198_v58, 0 }
 0x7c6   : > { %5200 = vmatpush3.bf16.msra.mxu0 %v2204_v59 }
 0x7c7   : > { %v5713_v60 = vpop.eup %5712  ;;  %5211 = vmatprep.subr.bf16.mxu0 %v7055_v20 }
 0x7c8   : > { %v2191_v61 = vsel %vm2131_vm4, %v5713_v60, 0.0  ;;  %v2455_v25 = vpop.permute.xlu1 %2454 }
 0x7c9   : > { %2192 = vadd.xlane.f32.xlu0 %v2191_v61  ;;  %v2460_v31 = vsel %vm2131_vm4, %v2455_v25, 0 }
 0x7cc   : > { %v2453_v33 = vpop.permute.xlu1 %2452 }
 0x7cf   : > { %v5715_v62 = vpop.eup %5714 }
 0x7d0   : > { %v2305_v63 = vsel %vm2131_vm4, %v5715_v62, 0.0 }
 0x7d1   : > { %2306 = vadd.xlane.f32.xlu0 %v2305_v63 }
 0x7e7   : > { %2311 = vrot.lane.b32.xlu0 %v8337_v29, %s7064_s0  ;;  %s8912_s0 = scalar_lea.vmem [#allocation18], %s8129_s17 }
 0x856   : > { %v2193_v1 = vpop.xlane.xlu0 %2192 }
 0x857   : > { %5716 = vrcp.f32 %v2193_v1 }
 0x85e   : > { %v2307_v3 = vpop.xlane.xlu0 %2306 }
 0x85f   : > { %5718 = vrcp.f32 %v2307_v3  ;;  %v2125_v3 = vld [vmem:[%s8146_s6 + $0x8] sm:$0xf] }
 0x861   : > { %v5717_v4 = vpop.eup %5716 }
 0x862   : > { %v2195_v6 = vmul.f32 %v5717_v4, %v5713_v60  ;;  %v2312_v8 = vpop.permute.xlu0 %2311  ;;  %v2569_v4 = vsel %vm2202_vm5, %v2125_v3, 0 }
 0x863   : > { %v2317_v10 = vsel %vm2202_vm5, %v2312_v8, 0 }
 0x864   : > { %v2196_v9 = vpack.c.bf16 %v2195_v6, %v2195_v6 }
 0x866   : > { %5202 = vmatmul.mubr.msk.bf16.vlgmr.msra.gmra.mrb[0].mxu0 %vm2131_vm4, %v2196_v9 }
 0x867   : > { %5212 = vmatpush3.bf16.msra.mxu0 %v2317_v10  ;;  %5213 = vmatprep.mubr.msk.bf16.mxu0 %vm7056_vm2, %v7055_v20 }
 0x868   : > { %5223 = vmatprep.subr.bf16.mxu0 %v7055_v20 }
 0x869   : > { %v5719_v11 = vpop.eup %5718 }
 0x86a   : > { %v2309_v12 = vmul.f32 %v5719_v11, %v5715_v62 }
 0x86c   : > { %v2310_v13 = vpack.c.bf16 %v2309_v12, %v2309_v12 }
 0x86e   : > { %5214 = vmatmul.mubr.msk.bf16.vlgmr.msra.gmra.mrb[4].mxu0 %vm2131_vm4, %v2310_v13 }
 0x86f   : > { %5225 = vmatprep.mubr.msk.bf16.mxu0 %vm7056_vm2, %v7055_v20  ;;  %5224 = vmatpush3.bf16.msra.mxu0 %v2410_v15 }
 0x870   : > { %5235 = vmatprep.subr.bf16.mxu0 %v7055_v20 }
 0x939   : > { %v2240_v18 = vpop.f32.mrb[0].mxu0 }
 0x93a   : > { %v2246_v19 = vpack.c.bf16 %v2240_v18, %v2240_v18  ;;  %v5203_v21 = vpop.f32.mrb[1].mxu0 }
 0x93b   : > { %v2243_v23 = vpop.f32.mrb[2].mxu0 }
 0x93c   : > { %v5204_v24 = vpop.f32.mrb[3].mxu0  ;;  %5226 = vmatmul.mubr.msk.bf16.vlgmr.msra.gmra.mrb[8].mxu0 %vm2131_vm4, %v2246_v19 }
 0x93d   : > { %5237 = vmatprep.mubr.msk.bf16.mxu0 %vm7056_vm2, %v7055_v20 }
 0x941   : > { %v2353_v26 = vpop.f32.mrb[4].mxu0 }
 0x942   : > { %v2359_v27 = vpack.c.bf16 %v2353_v26, %v2353_v26  ;;  %v5215_v28 = vpop.f32.mrb[5].mxu0  ;;  %v2126_v26 = vld [vmem:[%s8146_s6 + $0xc] sm:$0xf]  ;;  %s8910_s6 = scalar_lea.vmem [#allocation17], %s8126_s23 }
 0x943   : > { %v2356_v30 = vpop.f32.mrb[6].mxu0 }
 0x944   : > { %v5216_v32 = vpop.f32.mrb[7].mxu0  ;;  %5220 = vmatmul.mubr.msk.bf16.vlgmr.msra.gmra.mrb[12].mxu1 %vm2131_vm4, %v2359_v27  ;;  %v2729_v27 = vsel %vm2202_vm5, %v2126_v26, 0 }
 0x945   : > { %5230 = vmatpush3.bf16.xpose.msra.mxu1 %v2460_v31  ;;  %5231 = vmatprep.mubr.msk.bf16.mxu1 %vm7056_vm2, %v7055_v20 }
 0x946   : > { %5241 = vmatprep.subr.bf16.mxu1 %v7055_v20 }
 0x94c   : > { %5232 = vmatmul.mubr.msk.bf16.vlgmr.msra.gmra.mrb[16].mxu1 %vm2131_vm4, %v2453_v33 }
 0x94d   : > { %5243 = vmatprep.mubr.msk.bf16.mxu1 %vm7056_vm2, %v7055_v20  ;;  %5242 = vmatpush3.bf16.msra.mxu1 %v2569_v4 }
 0x94e   : > { %5253 = vmatprep.subr.bf16.mxu1 %v7055_v20 }
 0xa0f   : > { %v2446_v34 = vpop.f32.mrb[8].mxu0 }
 0xa10   : > { %v5227_v35 = vpop.f32.mrb[9].mxu0 }
 0xa11   : > { %v2449_v36 = vpop.f32.mrb[10].mxu0 }
 0xa12   : > { %v5228_v37 = vpop.f32.mrb[11].mxu0 }
 0xa17   : > { %v2400_v39 = vpop.f32.mrb[12].mxu1 }
 0xa18   : > { %v8397_v40 = vadd.f32 %v2446_v34, %v2400_v39  ;;  %v5221_v41 = vpop.f32.mrb[13].mxu1 }
 0xa19   : > { %v2403_v42 = vpop.f32.mrb[14].mxu1 }
 0xa1a   : > { %v5222_v43 = vpop.f32.mrb[15].mxu1 }
 0xa1f   : > { %v2496_v44 = vpop.f32.mrb[16].mxu1 }
 0xa20   : > { %v2502_v45 = vmul.f32 0.35355338, %v2496_v44  ;;  %v5233_v46 = vpop.f32.mrb[17].mxu1  ;;  %v5001_v44 = vld [vmem:[%s8910_s6] ss:$0 sm:$0xff]  ;;  %s8915_s6 = scalar_lea.vmem [#allocation28], %s8126_s23 }
 0xa21   : > { %v2499_v47 = vpop.f32.mrb[18].mxu1 }
 0xa22   : > { %v5234_v48 = vpop.f32.mrb[19].mxu1  ;;  %v2503_v49 = vadd.f32 %v2502_v45, %v8356_v38 }
 0xa24   : > { %v2504_v50 = vsel %vm2131_vm4, %v2503_v49, -inf }
 0xa25   : > { %2505 = vmax.xlane.f32.xlu0 %v2504_v50 }
 0xa3b   : > { %2516 = vrot.lane.b32.xlu0 %v8337_v29, %s7065_s4  ;;  %s8913_s4 = smov %s8911_s3 }
 0xa3f   : > { %2612 = vrot.lane.b32.xlu0 %v8337_v29, %s7066_s9 }
 0xab2   : > { %v2506_v51 = vpop.xlane.xlu0 %2505 }
 0xab3   : > { %v2507_v52 = vsub.f32 %v2503_v49, %v2506_v51 }
 0xab5   : > { %v2508_v53 = vmul.f32 1.442695, %v2507_v52 }
 0xab6   : > { %v2517_v54 = vpop.permute.xlu0 %2516 }
 0xab7   : > { %5720 = vpow2.f32 %v2508_v53  ;;  %v2522_v55 = vsel %vm2202_vm5, %v2517_v54, 0 }
 0xab8   : > { %5236 = vmatpush3.bf16.msra.mxu0 %v2522_v55 }
 0xab9   : > { %5247 = vmatprep.subr.bf16.mxu0 %v7055_v20 }
 0xaba   : > { %v2613_v1 = vpop.permute.xlu0 %2612 }
 0xac1   : > { %v5721_v56 = vpop.eup %5720 }
 0xac2   : > { %v2510_v57 = vsel %vm2131_vm4, %v5721_v56, 0.0 }
 0xac3   : > { %2511 = vadd.xlane.f32.xlu1 %v2510_v57 }
 0xad4   : > { %2614 = vrot.lane.b32.xlu1 %v8337_v29, %s7067_s15 }
 0xb50   : > { %v2512_v58 = vpop.xlane.xlu1 %2511 }
 0xb51   : > { %5722 = vrcp.f32 %v2512_v58  ;;  %v5702_v58 = vld [vmem:[%s8911_s3] sm:$0xff]   ;;  %s8916_s3 = scalar_lea.vmem [#allocation29], %s8126_s23 }
 0xb54   : > { %v2615_v61 = vpop.permute.xlu1 %2614 }
 0xb55   : > { %v2620_v63 = vsel %vm2131_vm4, %v2615_v61, 0 }
 0xb5b   : > { %v5723_v59 = vpop.eup %5722 }
 0xb5c   : > { %v2514_v60 = vmul.f32 %v5723_v59, %v5721_v56  ;;  %v5704_v59 = vld [vmem:[%s8912_s0] sm:$0xff]  }
 0xb5e   : > { %v2515_v62 = vpack.c.bf16 %v2514_v60, %v2514_v60  ;;  %v5703_v60 = vld [vmem:[%s8913_s4 + $0x8] sm:$0xff]   ;;  %s8918_s4 = scalar_lea.vmem [#allocation19], %s8126_s23 }
 0xb60   : > { %5238 = vmatmul.mubr.msk.bf16.vlgmr.msra.gmra.mrb[12].mxu0 %vm2131_vm4, %v2515_v62 }
 0xb61   : > { %5248 = vmatpush3.bf16.xpose.msra.mxu0 %v2620_v63  ;;  %5249 = vmatprep.mubr.msk.bf16.mxu0 %vm7056_vm2, %v7055_v20 }
 0xb62   : > { %5259 = vmatprep.subr.bf16.mxu0 %v7055_v20 }
 0xb68   : > { %5250 = vmatmul.mubr.msk.bf16.vlgmr.msra.gmra.mrb[16].mxu0 %vm2131_vm4, %v2613_v1 }
 0xb69   : > { %5261 = vmatprep.mubr.msk.bf16.mxu0 %vm7056_vm2, %v7055_v20  ;;  %5260 = vmatpush3.bf16.msra.mxu0 %v2729_v27 }
 0xb6a   : > { %5273 = vmatprep.subr.bf16.mxu0 %v7055_v20 }
 0xc33   : > { %v2558_v6 = vpop.f32.mrb[12].mxu0 }
 0xc34   : > { %v2564_v8 = vpack.c.bf16 %v2558_v6, %v2558_v6  ;;  %v5239_v9 = vpop.f32.mrb[13].mxu0 }
 0xc35   : > { %v2561_v10 = vpop.f32.mrb[14].mxu0 }
 0xc36   : > { %v5240_v11 = vpop.f32.mrb[15].mxu0  ;;  %5244 = vmatmul.mubr.msk.bf16.vlgmr.msra.gmra.mrb[20].mxu1 %vm2131_vm4, %v2564_v8  ;;  %v5003_v10 = vld [vmem:[%s8916_s3] ss:$0 sm:$0xff] }
 0xc37   : > { %5255 = vmatprep.mubr.msk.bf16.mxu1 %vm7056_vm2, %v7055_v20 }
 0xc3b   : > { %v2656_v12 = vpop.f32.mrb[16].mxu0 }
 0xc3c   : > { %v2662_v13 = vmul.f32 0.35355338, %v2656_v12  ;;  %v5251_v14 = vpop.f32.mrb[17].mxu0 }
 0xc3d   : > { %v2659_v15 = vpop.f32.mrb[18].mxu0 }
 0xc3e   : > { %v5252_v16 = vpop.f32.mrb[19].mxu0  ;;  %v2663_v17 = vadd.f32 %v2662_v13, %v8356_v38 }
 0xc40   : > { %v2664_v18 = vsel %vm2131_vm4, %v2663_v17, -inf }
 0xc41   : > { %2665 = vmax.xlane.f32.xlu1 %v2664_v18 }
 0xcce   : > { %v2666_v19 = vpop.xlane.xlu1 %2665 }
 0xccf   : > { %v2667_v21 = vsub.f32 %v2663_v17, %v2666_v19 }
 0xcd1   : > { %v2668_v23 = vmul.f32 1.442695, %v2667_v21 }
 0xcd3   : > { %5724 = vpow2.f32 %v2668_v23 }
 0xcdd   : > { %v5725_v24 = vpop.eup %5724 }
 0xcde   : > { %v2670_v25 = vsel %vm2131_vm4, %v5725_v24, 0.0 }
 0xcdf   : > { %2671 = vadd.xlane.f32.xlu0 %v2670_v25 }
 0xcf5   : > { %2676 = vrot.lane.b32.xlu0 %v8337_v29, %s7068_s10  ;;  %s8914_s10 = smov %s8912_s0  ;;  %s8917_s0 = scalar_lea.vmem [#allocation21], %s8126_s23 }
 0xcf6   : > { %v5008_v14 = vld [vmem:[%s8917_s0] ss:$0 sm:$0xff] }
 0xd09   : > { %v2605_v38 = vpop.f32.mrb[20].mxu1 }
 0xd0a   : > { %v2611_v28 = vadd.f32 %v2605_v38, %v8397_v40  ;;  %v5245_v30 = vpop.f32.mrb[21].mxu1 }
 0xd0b   : > { %v2608_v31 = vpop.f32.mrb[22].mxu1 }
 0xd0c   : > { %v5246_v32 = vpop.f32.mrb[23].mxu1 }
 0xd6c   : > { %v2672_v33 = vpop.xlane.xlu0 %2671 }
 0xd6d   : > { %5726 = vrcp.f32 %v2672_v33 }
 0xd70   : > { %v2677_v34 = vpop.permute.xlu0 %2676 }
 0xd71   : > { %v2682_v35 = vsel %vm2202_vm5, %v2677_v34, 0  ;;  %v3005_v34 = vlaneseq }
 0xd72   : > { %5254 = vmatpush3.bf16.msra.mxu1 %v2682_v35 }
 0xd73   : > { %5265 = vmatprep.subr.bf16.mxu1 %v7055_v20  ;;  %v8497_v35 = vshrl.u32 %v3005_v34, 7 }
 0xd77   : > { %v5727_v29 = vpop.eup %5726 }
 0xd78   : > { %v2674_v36 = vmul.f32 %v5727_v29, %v5725_v24  ;;  %v5004_v24 = vld [vmem:[%s8918_s4] ss:$0 sm:$0xff]  ;;  %v3007_v29 = vsub.s32 0, %v8497_v35 }
 0xd7a   : > { %v2675_v37 = vpack.c.bf16 %v2674_v36, %v2674_v36  ;;  %v8503_v36 = vrot.slane %v8310_v7, %v3007_v29 }
 0xd7c   : > { %5256 = vmatmul.mubr.msk.bf16.vlgmr.msra.gmra.mrb[24].mxu1 %vm2131_vm4, %v2675_v37 }
 0xd7d   : > { %5269 = vmatprep.mubr.msk.bf16.mxu1 %vm7056_vm2, %v7055_v20  ;;  %5266 = vmatpush3.bf16.msra.mxu1 %v5704_v59 }
 0xd7e   : > { %5267 = vmatprep.subr.bf16.mxu1 %v7055_v20 }
 0xe4f   : > { %v2718_v39 = vpop.f32.mrb[24].mxu1 }
 0xe50   : > { %v2724_v40 = vpack.c.bf16 %v2718_v39, %v2718_v39  ;;  %v5257_v41 = vpop.f32.mrb[25].mxu1 }
 0xe51   : > { %v2721_v42 = vpop.f32.mrb[26].mxu1 }
 0xe52   : > { %v5258_v43 = vpop.f32.mrb[27].mxu1  ;;  %5262 = vmatmul.mubr.msk.bf16.vlgmr.msra.gmra.mrb[20].mxu0 %vm2131_vm4, %v2724_v40 }
 0xe53   : > { %5277 = vmatprep.mubr.msk.bf16.mxu0 %vm7056_vm2, %v7055_v20  ;;  %5274 = vmatpush3.bf16.msra.mxu0 %v5702_v58 }
 0xe54   : > { %5275 = vmatprep.subr.bf16.mxu0 %v7055_v20 }
 0xe57   : > { %5276 = vmatpush3.bf16.msra.mxu0 %v5703_v60 }
 0xe58   : > { %5287 = vmatprep.subr.bf16.mxu0 %v7055_v20 }
 0xe5a   : > { %5278 = vmatmul.mubr.msk.bf16.vlgmr.msra.gmra.mrb[24].mxu0 %vm2078_vm3, %v1978_v5  ;;  %v5002_v5 = vld [vmem:[%s8915_s6] ss:$0 sm:$0xff] }
 0xe5b   : > { %5289 = vmatprep.mubr.msk.bf16.mxu0 %vm7056_vm2, %v7055_v20 }
 0xf25   : > { %v2765_v45 = vpop.f32.mrb[20].mxu0 }
 0xf26   : > { %v2771_v46 = vadd.f32 %v2765_v45, %v2611_v28  ;;  %v5263_v47 = vpop.f32.mrb[21].mxu0 }
 0xf27   : > { %v2768_v48 = vpop.f32.mrb[22].mxu0 }
 0xf28   : > { %v2778_v49 = vadd.f32 %v5001_v44, %v2771_v46  ;;  %v5264_v50 = vpop.f32.mrb[23].mxu0 }
 0xf2a   : > { %v2779_v51 = vadd.f32 %v2778_v49, %v8324_v22  ;;  %v5705_v22 = vld [vmem:[%s8914_s10 + $0x8] sm:$0xff]  }
 0xf2b   : > { %5268 = vmatpush3.bf16.msra.mxu1 %v5705_v22 }
 0xf2c   : > { %v2782_v52 = vsel %vm2078_vm3, %v2779_v51, 0.0  ;;  %5281 = vmatprep.subr.bf16.mxu1 %v7055_v20 }
 0xf2d   : > { %2783 = vadd.xlane.f32.xlu1 %v2782_v52  ;;  %v2945_v15 = vpop.f32.mrb[24].mxu0 }
 0xf2e   : > { %v2946_v16 = vadd.f32 %v5008_v14, %v2945_v15  ;;  %v5279_v17 = vpop.f32.mrb[25].mxu0 }
 0xf2f   : > { %v2948_v18 = vpop.f32.mrb[26].mxu0 }
 0xf30   : > { %v8475_v19 = vpack.c.bf16 %v2946_v16, %v2946_v16  ;;  %v5280_v21 = vpop.f32.mrb[27].mxu0 }
 0xf32   : > { %v2961_v23 = vsel %vm2131_vm4, %v8475_v19, 0 }
 0xfba   : > { %v2784_v53 = vpop.xlane.xlu1 %2783 }
 0xfbb   : > { %v2786_v54 = vmul.f32 0.03125, %v2784_v53 }
 0xfbd   : > { %v2787_v55 = vsub.f32 %v2779_v51, %v2786_v54 }
 0xfbf   : > { %v2788_v56 = vmul.f32 %v2787_v55, %v2787_v55 }
 0xfc1   : > { %v2789_v57 = vsel %vm2078_vm3, %v2788_v56, 0.0 }
 0xfc2   : > { %2790 = vadd.xlane.f32.xlu1 %v2789_v57 }
 0xfd3   : > { %3076 = vrot.lane.b32.xlu1 %v8475_v19, %s7057_s21 }
0x104f   : > { %v2791_v61 = vpop.xlane.xlu1 %2790 }
0x1050   : > { %v2792_v62 = vmul.f32 0.032258064, %v2791_v61 }
0x1052   : > { %5728 = vrsqrt.f32 %v2792_v62  ;;  %vm2795_vm6 = vcmp.eq.f32.partialorder %v2792_v62, inf  ;;  %v2798_v3 = vand.u32 2147483648, %v2792_v62  ;;  %vm2797_vm7 = vcmp.eq.f32.partialorder %v2792_v62, 0.0 }
0x1053   : > { %v3077_v26 = vpop.permute.xlu1 %3076 }
0x1054   : > { %v3082_v32 = vsel %vm2131_vm4, %v3077_v26, 0 }
0x105c   : > { %v5729_v63 = vpop.eup %5728 }
0x105d   : > { %v2794_v1 = vmul.f32 %v5729_v63, %v2792_v62 }
0x105f   : > { %v2796_v4 = vsel %vm2795_vm6, %v2792_v62, %v2794_v1 }
0x1060   : > { %v2799_v6 = vsel %vm2797_vm7, %v2798_v3, %v2796_v4  ;;  %v2953_v4 = vld [vmem:[%s8190_s11 + $0x4] sm:$0xf] }
0x1061   : > { %v2800_v8 = vadd.f32 1e-12, %v2799_v6  ;;  %v3191_v6 = vsel %vm2202_vm5, %v2953_v4, 0 }
0x1063   : > { %5730 = vrcp.f32 %v2800_v8 }
0x106d   : > { %v5731_v2 = vpop.eup %5730 }
0x106e   : > { %v2802_v9 = vmul.f32 %v5731_v2, %v2787_v55 }
0x1070   : > { %v2809_v11 = vmul.f32 %v5002_v5, %v2802_v9 }
0x1072   : > { %v8466_v12 = vadd.f32 %v5003_v10, %v2809_v11  ;;  %v2952_v10 = vld [vmem:[%s8190_s11] sm:$0xf] }
0x1073   : > { %v3237_v14 = vsel %vm2202_vm5, %v2952_v10, 0 }
0x1074   : > { %v2817_v13 = vpack.c.bf16 %v8466_v12, %v8466_v12 }
0x1076   : > { %5270 = vmatmul.mubr.msk.bf16.vlgmr.msra.gmra.mrb[28].mxu1 %vm2078_vm3, %v2817_v13 }
0x1077   : > { %5283 = vmatprep.mubr.msk.bf16.mxu1 %vm7056_vm2, %v7055_v20  ;;  %5282 = vmatpush3.bf16.xpose.msra.mxu1 %v2961_v23 }
0x1078   : > { %5293 = vmatprep.subr.bf16.mxu1 %v7055_v20 }
0x1149   : > { %v2878_v25 = vpop.f32.mrb[28].mxu1 }
0x114a   : > { %v2879_v27 = vadd.f32 %v5004_v24, %v2878_v25  ;;  %v5271_v38 = vpop.f32.mrb[29].mxu1 }
0x114b   : > { %v2881_v28 = vpop.f32.mrb[30].mxu1 }
0x114c   : > { %v8484_v30 = vpack.c.bf16 %v2879_v27, %v2879_v27  ;;  %v5272_v31 = vpop.f32.mrb[31].mxu1 }
0x114e   : > { %3074 = vrot.lane.b32.xlu0 %v8484_v30, %s7057_s21  ;;  %5284 = vmatmul.mubr.msk.bf16.vlgmr.msra.gmra.mrb[32].mxu1 %vm2131_vm4, %v8484_v30  ;;  %s8920_s21 = scalar_lea.vmem [#allocation24], %s8129_s17  ;;  %s8922_s17 = scalar_lea.vmem [#allocation30], %s8126_s23 }
0x114f   : > { %5294 = vmatpush3.bf16.xpose.msra.mxu1 %v3082_v32  ;;  %5295 = vmatprep.mubr.msk.bf16.mxu1 %vm7056_vm2, %v7055_v20 }
0x1150   : > { %5305 = vmatprep.subr.bf16.mxu1 %v7055_v20 }
0x11c0   : > { %v3075_v33 = vpop.permute.xlu0 %3074 }
0x11c1   : > { %5296 = vmatmul.mubr.msk.bf16.vlgmr.msra.gmra.mrb[36].mxu1 %vm2131_vm4, %v3075_v33 }
0x11c2   : > { %5307 = vmatprep.mubr.msk.bf16.mxu1 %vm7056_vm2, %v7055_v20  ;;  %5306 = vmatpush3.bf16.msra.mxu1 %v3191_v6 }
0x11c3   : > { %5317 = vmatprep.subr.bf16.mxu1 %v7055_v20 }
0x1221   : > { %v2997_v37 = vpop.f32.mrb[32].mxu1 }
0x1222   : > { %v3003_v39 = vmul.f32 0.35355338, %v2997_v37  ;;  %v5285_v40 = vpop.f32.mrb[33].mxu1 }
0x1223   : > { %v3000_v41 = vpop.f32.mrb[34].mxu1 }
0x1224   : > { %v5286_v42 = vpop.f32.mrb[35].mxu1  ;;  %v3010_v43 = vadd.f32 %v8503_v36, %v3003_v39 }
0x1226   : > { %v3011_v44 = vsel %vm2131_vm4, %v3010_v43, -inf }
0x1227   : > { %3012 = vmax.xlane.f32.xlu0 %v3011_v44 }
0x1294   : > { %v3118_v45 = vpop.f32.mrb[36].mxu1 }
0x1295   : > { %v3124_v46 = vmul.f32 0.35355338, %v3118_v45  ;;  %v5297_v47 = vpop.f32.mrb[37].mxu1 }
0x1296   : > { %v3121_v48 = vpop.f32.mrb[38].mxu1 }
0x1297   : > { %v5298_v49 = vpop.f32.mrb[39].mxu1  ;;  %v3125_v50 = vadd.f32 %v3124_v46, %v8503_v36 }
0x1299   : > { %v3126_v7 = vsel %vm2131_vm4, %v3125_v50, -inf }
0x129a   : > { %3127 = vmax.xlane.f32.xlu1 %v3126_v7 }
0x12ab   : > { %3024 = vrot.lane.b32.xlu1 %v8475_v19, %s7058_s12  ;;  %s8921_s12 = smov %s8920_s21 }
0x12af   : > { %3281 = vrot.lane.b32.xlu1 %v8475_v19, %s7063_s13 }
0x12b3   : > { %3279 = vrot.lane.b32.xlu1 %v8484_v30, %s7063_s13  ;;  %s8925_s13 = scalar_lea.vmem [#allocation27], %s8126_s23 }
0x12b4   : > { %v3013_v51 = vpop.xlane.xlu0 %3012 }
0x12b5   : > { %v3014_v52 = vsub.f32 %v3010_v43, %v3013_v51 }
0x12b7   : > { %v3015_v53 = vmul.f32 1.442695, %v3014_v52 }
0x12b9   : > { %5732 = vpow2.f32 %v3015_v53 }
0x12c3   : > { %v5733_v54 = vpop.eup %5732 }
0x12c4   : > { %v3017_v55 = vsel %vm2131_vm4, %v5733_v54, 0.0 }
0x12c5   : > { %3018 = vadd.xlane.f32.xlu0 %v3017_v55 }
0x1327   : > { %v3128_v56 = vpop.xlane.xlu1 %3127 }
0x1328   : > { %v3129_v57 = vsub.f32 %v3125_v50, %v3128_v56 }
0x132a   : > { %v3130_v58 = vmul.f32 1.442695, %v3129_v57 }
0x132b   : > { %v3025_v59 = vpop.permute.xlu1 %3024 }
0x132c   : > { %5734 = vpow2.f32 %v3130_v58  ;;  %v3030_v60 = vsel %vm2202_vm5, %v3025_v59, 0 }
0x132d   : > { %5288 = vmatpush3.bf16.msra.mxu0 %v3030_v60 }
0x132e   : > { %5299 = vmatprep.subr.bf16.mxu0 %v7055_v20 }
0x132f   : > { %v3282_v23 = vpop.permute.xlu1 %3281 }
0x1330   : > { %v3287_v38 = vsel %vm2131_vm4, %v3282_v23, 0  ;;  %v2955_v23 = vld [vmem:[%s8190_s11 + $0xc] sm:$0xf] }
0x1333   : > { %v3280_v31 = vpop.permute.xlu1 %3279 }
0x1336   : > { %v5735_v22 = vpop.eup %5734 }
0x1337   : > { %v3132_v61 = vsel %vm2131_vm4, %v5735_v22, 0.0 }
0x1338   : > { %3133 = vadd.xlane.f32.xlu0 %v3132_v61 }
0x134e   : > { %3138 = vrot.lane.b32.xlu0 %v8475_v19, %s7059_s5  ;;  %s8923_s5 = scalar_lea.vmem [#allocation31], %s8126_s23 }
0x1352   : > { %v3019_v62 = vpop.xlane.xlu0 %3018 }
0x1353   : > { %5736 = vrcp.f32 %v3019_v62  ;;  %v2954_v62 = vld [vmem:[%s8190_s11 + $0x8] sm:$0xf]  ;;  %s8919_s11 = scalar_lea.vmem [#allocation23], %s8126_s23 }
0x135d   : > { %v5737_v63 = vpop.eup %5736 }
0x135e   : > { %v3021_v1 = vmul.f32 %v5737_v63, %v5733_v54  ;;  %v3396_v63 = vsel %vm2202_vm5, %v2954_v62, 0 }
0x1360   : > { %v3022_v3 = vpack.c.bf16 %v3021_v1, %v3021_v1 }
0x1362   : > { %5290 = vmatmul.mubr.msk.bf16.vlgmr.msra.gmra.mrb[28].mxu0 %vm2131_vm4, %v3022_v3 }
0x1363   : > { %5301 = vmatprep.mubr.msk.bf16.mxu0 %vm7056_vm2, %v7055_v20 }
0x13c5   : > { %v3134_v8 = vpop.xlane.xlu0 %3133 }
0x13c6   : > { %5738 = vrcp.f32 %v3134_v8 }
0x13c9   : > { %v3139_v2 = vpop.permute.xlu0 %3138 }
0x13ca   : > { %v3144_v5 = vsel %vm2202_vm5, %v3139_v2, 0 }
0x13cb   : > { %5300 = vmatpush3.bf16.msra.mxu0 %v3144_v5 }
0x13cc   : > { %5311 = vmatprep.subr.bf16.mxu0 %v7055_v20 }
0x13d0   : > { %v5739_v9 = vpop.eup %5738 }
0x13d1   : > { %v3136_v11 = vmul.f32 %v5739_v9, %v5735_v22 }
0x13d3   : > { %v3137_v13 = vpack.c.bf16 %v3136_v11, %v3136_v11 }
0x13d5   : > { %5302 = vmatmul.mubr.msk.bf16.vlgmr.msra.gmra.mrb[32].mxu0 %vm2131_vm4, %v3137_v13 }
0x13d6   : > { %5312 = vmatpush3.bf16.msra.mxu0 %v3237_v14  ;;  %5313 = vmatprep.mubr.msk.bf16.mxu0 %vm7056_vm2, %v7055_v20 }
0x13d7   : > { %5323 = vmatprep.subr.bf16.mxu0 %v7055_v20 }
0x1435   : > { %v3066_v15 = vpop.f32.mrb[28].mxu0 }
0x1436   : > { %v3072_v16 = vpack.c.bf16 %v3066_v15, %v3066_v15  ;;  %v5291_v17 = vpop.f32.mrb[29].mxu0 }
0x1437   : > { %v3069_v18 = vpop.f32.mrb[30].mxu0 }
0x1438   : > { %v5292_v21 = vpop.f32.mrb[31].mxu0  ;;  %5314 = vmatmul.mubr.msk.bf16.vlgmr.msra.gmra.mrb[36].mxu0 %vm2131_vm4, %v3072_v16 }
0x1439   : > { %5325 = vmatprep.mubr.msk.bf16.mxu0 %vm7056_vm2, %v7055_v20 }
0x14a8   : > { %v3180_v24 = vpop.f32.mrb[32].mxu0 }
0x14a9   : > { %v3186_v25 = vpack.c.bf16 %v3180_v24, %v3180_v24  ;;  %v5303_v26 = vpop.f32.mrb[33].mxu0  ;;  %v3556_v24 = vsel %vm2202_vm5, %v2955_v23, 0 }
0x14aa   : > { %v3183_v27 = vpop.f32.mrb[34].mxu0 }
0x14ab   : > { %v5304_v28 = vpop.f32.mrb[35].mxu0  ;;  %5308 = vmatmul.mubr.msk.bf16.vlgmr.msra.gmra.mrb[40].mxu1 %vm2131_vm4, %v3186_v25 }
0x14ac   : > { %5318 = vmatpush3.bf16.xpose.msra.mxu1 %v3287_v38  ;;  %5319 = vmatprep.mubr.msk.bf16.mxu1 %vm7056_vm2, %v7055_v20 }
0x14ad   : > { %5329 = vmatprep.subr.bf16.mxu1 %v7055_v20 }
0x14b3   : > { %5320 = vmatmul.mubr.msk.bf16.vlgmr.msra.gmra.mrb[44].mxu1 %vm2131_vm4, %v3280_v31 }
0x14b4   : > { %5331 = vmatprep.mubr.msk.bf16.mxu1 %vm7056_vm2, %v7055_v20  ;;  %5330 = vmatpush3.bf16.msra.mxu1 %v3396_v63 }
0x14b5   : > { %5341 = vmatprep.subr.bf16.mxu1 %v7055_v20 }
0x150b   : > { %v3273_v32 = vpop.f32.mrb[36].mxu0 }
0x150c   : > { %v5315_v33 = vpop.f32.mrb[37].mxu0 }
0x150d   : > { %v3276_v34 = vpop.f32.mrb[38].mxu0 }
0x150e   : > { %v5316_v37 = vpop.f32.mrb[39].mxu0 }
0x157e   : > { %v3227_v39 = vpop.f32.mrb[40].mxu1 }
0x157f   : > { %v8546_v40 = vadd.f32 %v3273_v32, %v3227_v39  ;;  %v5309_v41 = vpop.f32.mrb[41].mxu1 }
0x1580   : > { %v3230_v42 = vpop.f32.mrb[42].mxu1 }
0x1581   : > { %v5310_v43 = vpop.f32.mrb[43].mxu1 }
0x1582   : > { %v5024_v43 = vld [vmem:[%s8919_s11] ss:$0 sm:$0xff] }
0x1586   : > { %v3323_v44 = vpop.f32.mrb[44].mxu1 }
0x1587   : > { %v3329_v45 = vmul.f32 0.35355338, %v3323_v44  ;;  %v5321_v46 = vpop.f32.mrb[45].mxu1 }
0x1588   : > { %v3326_v47 = vpop.f32.mrb[46].mxu1 }
0x1589   : > { %v5322_v48 = vpop.f32.mrb[47].mxu1  ;;  %v3330_v49 = vadd.f32 %v3329_v45, %v8503_v36 }
0x158b   : > { %v3331_v50 = vsel %vm2131_vm4, %v3330_v49, -inf }
0x158c   : > { %3332 = vmax.xlane.f32.xlu0 %v3331_v50 }
0x15a2   : > { %3343 = vrot.lane.b32.xlu0 %v8475_v19, %s7062_s1  ;;  %s8924_s1 = scalar_lea.vmem [#allocation25], %s8126_s23 }
0x15a6   : > { %3439 = vrot.lane.b32.xlu0 %v8484_v30, %s7066_s9 }
0x1619   : > { %v3333_v7 = vpop.xlane.xlu0 %3332 }
0x161a   : > { %v3334_v51 = vsub.f32 %v3330_v49, %v3333_v7 }
0x161c   : > { %v3335_v52 = vmul.f32 1.442695, %v3334_v51 }
0x161d   : > { %v3344_v53 = vpop.permute.xlu0 %3343 }
0x161e   : > { %5740 = vpow2.f32 %v3335_v52  ;;  %v3349_v54 = vsel %vm2202_vm5, %v3344_v53, 0 }
0x161f   : > { %5324 = vmatpush3.bf16.msra.mxu0 %v3349_v54 }
0x1620   : > { %5335 = vmatprep.subr.bf16.mxu0 %v7055_v20 }
0x1621   : > { %v3440_v61 = vpop.permute.xlu0 %3439 }
0x1628   : > { %v5741_v55 = vpop.eup %5740 }
0x1629   : > { %v3337_v56 = vsel %vm2131_vm4, %v5741_v55, 0.0 }
0x162a   : > { %3338 = vadd.xlane.f32.xlu1 %v3337_v56  ;;  %v5706_v56 = vld [vmem:[%s8920_s21] sm:$0xff]  }
0x163b   : > { %3441 = vrot.lane.b32.xlu1 %v8475_v19, %s7066_s9 }
0x16b7   : > { %v3339_v57 = vpop.xlane.xlu1 %3338 }
0x16b8   : > { %5742 = vrcp.f32 %v3339_v57  ;;  %v5707_v57 = vld [vmem:[%s8921_s12 + $0x8] sm:$0xff]  }
0x16bb   : > { %v3442_v59 = vpop.permute.xlu1 %3441 }
0x16bc   : > { %v3447_v22 = vsel %vm2131_vm4, %v3442_v59, 0 }
0x16c2   : > { %v5743_v30 = vpop.eup %5742 }
0x16c3   : > { %v3341_v58 = vmul.f32 %v5743_v30, %v5741_v55  ;;  %v5709_v30 = vld [vmem:[%s8220_s19 + $0x8] sm:$0xff]  }
0x16c5   : > { %v3342_v60 = vpack.c.bf16 %v3341_v58, %v3341_v58 }
0x16c7   : > { %5326 = vmatmul.mubr.msk.bf16.vlgmr.msra.gmra.mrb[40].mxu0 %vm2131_vm4, %v3342_v60 }
0x16c8   : > { %5336 = vmatpush3.bf16.xpose.msra.mxu0 %v3447_v22  ;;  %5337 = vmatprep.mubr.msk.bf16.mxu0 %vm7056_vm2, %v7055_v20 }
0x16c9   : > { %5347 = vmatprep.subr.bf16.mxu0 %v7055_v20 }
0x16cf   : > { %5338 = vmatmul.mubr.msk.bf16.vlgmr.msra.gmra.mrb[44].mxu0 %vm2131_vm4, %v3440_v61 }
0x16d0   : > { %5349 = vmatprep.mubr.msk.bf16.mxu0 %vm7056_vm2, %v7055_v20  ;;  %5348 = vmatpush3.bf16.msra.mxu0 %v3556_v24  ;;  %v5031_v24 = vld [vmem:[%s8925_s13] ss:$0 sm:$0xff] }
0x16d1   : > { %5361 = vmatprep.subr.bf16.mxu0 %v7055_v20 }
0x179a   : > { %v3385_v1 = vpop.f32.mrb[40].mxu0 }
0x179b   : > { %v3391_v3 = vpack.c.bf16 %v3385_v1, %v3385_v1  ;;  %v5327_v4 = vpop.f32.mrb[41].mxu0 }
0x179c   : > { %v3388_v6 = vpop.f32.mrb[42].mxu0  ;;  %v5025_v4 = vld [vmem:[%s8922_s17] ss:$0 sm:$0xff] }
0x179d   : > { %v5328_v8 = vpop.f32.mrb[43].mxu0  ;;  %5332 = vmatmul.mubr.msk.bf16.vlgmr.msra.gmra.mrb[48].mxu1 %vm2131_vm4, %v3391_v3 }
0x179e   : > { %5343 = vmatprep.mubr.msk.bf16.mxu1 %vm7056_vm2, %v7055_v20  ;;  %v5026_v8 = vld [vmem:[%s8923_s5] ss:$0 sm:$0xff] }
0x17a2   : > { %v3483_v2 = vpop.f32.mrb[44].mxu0 }
0x17a3   : > { %v3489_v5 = vmul.f32 0.35355338, %v3483_v2  ;;  %v5339_v9 = vpop.f32.mrb[45].mxu0 }
0x17a4   : > { %v3486_v10 = vpop.f32.mrb[46].mxu0 }
0x17a5   : > { %v5340_v11 = vpop.f32.mrb[47].mxu0  ;;  %v3490_v13 = vadd.f32 %v3489_v5, %v8503_v36  ;;  %v5710_v10 = vld [vmem:[%s8220_s19 + $0x10] sm:$0xff]  }
0x17a6   : > { %v5711_v11 = vld [vmem:[%s8220_s19 + $0x18] sm:$0xff]  }
0x17a7   : > { %v3491_v14 = vsel %vm2131_vm4, %v3490_v13, -inf }
0x17a8   : > { %3492 = vmax.xlane.f32.xlu1 %v3491_v14 }
0x1835   : > { %v3493_v15 = vpop.xlane.xlu1 %3492 }
0x1836   : > { %v3494_v16 = vsub.f32 %v3490_v13, %v3493_v15  ;;  %v5027_v13 = vld [vmem:[%s8924_s1] ss:$0 sm:$0xff] }
0x1838   : > { %v3495_v17 = vmul.f32 1.442695, %v3494_v16 }
0x183a   : > { %5744 = vpow2.f32 %v3495_v17 }
0x1844   : > { %v5745_v18 = vpop.eup %5744 }
0x1845   : > { %v3497_v21 = vsel %vm2131_vm4, %v5745_v18, 0.0 }
0x1846   : > { %3498 = vadd.xlane.f32.xlu0 %v3497_v21 }
0x185c   : > { %3503 = vrot.lane.b32.xlu0 %v8475_v19, %s7067_s15 }
0x1870   : > { %v3432_v36 = vpop.f32.mrb[48].mxu1 }
0x1871   : > { %v3438_v25 = vadd.f32 %v3432_v36, %v8546_v40  ;;  %v5333_v26 = vpop.f32.mrb[49].mxu1 }
0x1872   : > { %v3435_v27 = vpop.f32.mrb[50].mxu1 }
0x1873   : > { %v5334_v38 = vpop.f32.mrb[51].mxu1 }
0x18d3   : > { %v3499_v28 = vpop.xlane.xlu0 %3498 }
0x18d4   : > { %5746 = vrcp.f32 %v3499_v28 }
0x18d7   : > { %v3504_v31 = vpop.permute.xlu0 %3503 }
0x18d8   : > { %v3509_v32 = vsel %vm2202_vm5, %v3504_v31, 0 }
0x18d9   : > { %5342 = vmatpush3.bf16.msra.mxu1 %v3509_v32 }
0x18da   : > { %5353 = vmatprep.subr.bf16.mxu1 %v7055_v20 }
0x18de   : > { %v5747_v19 = vpop.eup %5746 }
0x18df   : > { %v3501_v33 = vmul.f32 %v5747_v19, %v5745_v18 }
0x18e1   : > { %v3502_v34 = vpack.c.bf16 %v3501_v33, %v3501_v33 }
0x18e3   : > { %5344 = vmatmul.mubr.msk.bf16.vlgmr.msra.gmra.mrb[52].mxu1 %vm2131_vm4, %v3502_v34 }
0x18e4   : > { %5357 = vmatprep.mubr.msk.bf16.mxu1 %vm7056_vm2, %v7055_v20  ;;  %5354 = vmatpush3.bf16.msra.mxu1 %v5706_v56 }
0x18e5   : > { %5355 = vmatprep.subr.bf16.mxu1 %v7055_v20 }
0x18e8   : > { %5356 = vmatpush3.bf16.msra.mxu1 %v5707_v57 }
0x19b6   : > { %v3545_v37 = vpop.f32.mrb[52].mxu1 }
0x19b7   : > { %v3551_v39 = vpack.c.bf16 %v3545_v37, %v3545_v37  ;;  %v5345_v40 = vpop.f32.mrb[53].mxu1 }
0x19b8   : > { %v3548_v41 = vpop.f32.mrb[54].mxu1 }
0x19b9   : > { %v5346_v42 = vpop.f32.mrb[55].mxu1  ;;  %5350 = vmatmul.mubr.msk.bf16.vlgmr.msra.gmra.mrb[48].mxu0 %vm2131_vm4, %v3551_v39 }
0x19ba   : > { %5369 = vmatprep.mubr.msk.bf16.mxu0 %vm7056_vm2, %v7055_v20 }
0x1a8c   : > { %v3592_v44 = vpop.f32.mrb[48].mxu0 }
0x1a8d   : > { %v3598_v45 = vadd.f32 %v3592_v44, %v3438_v25  ;;  %v5351_v46 = vpop.f32.mrb[49].mxu0 }
0x1a8e   : > { %v3595_v47 = vpop.f32.mrb[50].mxu0 }
0x1a8f   : > { %v3605_v48 = vadd.f32 %v5024_v43, %v3598_v45  ;;  %v5352_v49 = vpop.f32.mrb[51].mxu0  ;;  %v5037_v47 = vld [vmem:[%s1745_s2] ss:$0 sm:$0xff] }
0x1a90   : > { %v5038_v49 = vld [vmem:[%s1753_s26] ss:$0 sm:$0xff] }
0x1a91   : > { %v3606_v50 = vadd.f32 %v3605_v48, %v8466_v12  ;;  %v5708_v12 = vld [vmem:[%s8220_s19] sm:$0xff]   ;;  %s8926_s19 = sld [smem:[#allocation114_spill]] }
0x1a92   : > { %5362 = vmatpush3.bf16.msra.mxu0 %v5708_v12 }
0x1a93   : > { %v3609_v7 = vsel %vm2078_vm3, %v3606_v50, 0.0  ;;  %5363 = vmatprep.subr.bf16.mxu0 %v7055_v20 }
0x1a94   : > { %3610 = vadd.xlane.f32.xlu1 %v3609_v7 }
0x1a96   : > { %5364 = vmatpush3.bf16.msra.mxu0 %v5709_v30 }
0x1a97   : > { %5365 = vmatprep.subr.bf16.mxu0 %v7055_v20  ;;  %p5039_p3 = scmp.ne.s32.totalorder %s8926_s19, 1 }
0x1a98   : > { %vm3850_vm13 = vcmask (!%p5039_p3), 7168   ;;  %v5757_v30 = vld [vmem:[#allocation34 + $0x4] ss:$8 sps:$4 sm:$0xff] (!%p5039_p3)   ;;  %vm7071_vm14 = vmmov (!%p5039_p3), 0  }
0x1a9a   : > { %5366 = vmatpush3.bf16.msra.mxu0 %v5710_v10 }
0x1a9b   : > { %5367 = vmatprep.subr.bf16.mxu0 %v7055_v20 }
0x1a9e   : > { %5368 = vmatpush3.bf16.msra.mxu0 %v5711_v11 }
0x1a9f   : > { %3905 = vmatprep.subr.bf16.mxu0 (!%p5039_p3), %v5757_v30 }
0x1b21   : > { %v3611_v51 = vpop.xlane.xlu1 %3610 }
0x1b22   : > { %v3612_v52 = vmul.f32 0.03125, %v3611_v51  ;;  %v7069_v51 = vmov (!%p5039_p3), 0  }
0x1b23   : > { %5756 = vset.pattern.permute.xlu0 (!%p5039_p3), %v7069_v51 }
0x1b24   : > { %v3613_v53 = vsub.f32 %v3606_v50, %v3612_v52  ;;  %v3851_v52 = vsel (!%p5039_p3), %vm3850_vm13, %v8299_v0, 0.0  ;;  %3839 = vperm.xlu0 (!%p5039_p3), %5756, %v8299_v0   ;;  %v5766_v0 = vld [vmem:[#allocation36 + $0x8] sm:$0xff] (!%p5039_p3)  }
0x1b26   : > { %v3614_v54 = vmul.f32 %v3613_v53, %v3613_v53 }
0x1b28   : > { %v3615_v55 = vsel %vm2078_vm3, %v3614_v54, 0.0 }
0x1b29   : > { %3616 = vadd.xlane.f32.xlu1 %v3615_v55 }
0x1bb6   : > { %v3617_v58 = vpop.xlane.xlu1 %3616 }
0x1bb7   : > { %v3618_v59 = vmul.f32 0.032258064, %v3617_v58  ;;  %v5759_v58 = vld [vmem:[#allocation34] ss:$8 sps:$4 sm:$0xff] (!%p5039_p3)  }
0x1bb9   : > { %5748 = vrsqrt.f32 %v3618_v59  ;;  %vm3621_vm8 = vcmp.eq.f32.partialorder %v3618_v59, inf  ;;  %v3624_v61 = vand.u32 2147483648, %v3618_v59  ;;  %vm3623_vm9 = vcmp.eq.f32.partialorder %v3618_v59, 0.0 }
0x1bc3   : > { %v5749_v60 = vpop.eup %5748 }
0x1bc4   : > { %v3620_v22 = vmul.f32 %v5749_v60, %v3618_v59  ;;  %v5762_v60 = vld [vmem:[#allocation34 + $0x10] ss:$8 sps:$4 sm:$0xff] (!%p5039_p3)  }
0x1bc6   : > { %v3622_v62 = vsel %vm3621_vm8, %v3618_v59, %v3620_v22  ;;  %v5760_v59 = vld [vmem:[#allocation34 + $0x14] ss:$8 sps:$4 sm:$0xff] (!%p5039_p3)   ;;  %v5763_v22 = vld [vmem:[#allocation36 + $0x40] sm:$0xff] (!%p5039_p3)  }
0x1bc7   : > { %v3625_v63 = vsel %vm3623_vm9, %v3624_v61, %v3622_v62  ;;  %v5764_v61 = vld [vmem:[#allocation36] sm:$0xff] (!%p5039_p3)   ;;  %v5765_v62 = vld [vmem:[#allocation36 + $0x48] sm:$0xff] (!%p5039_p3)   ;;  %5147 = vmatprep.subr.bf16.mxu1 (!%p5039_p3), %v5763_v22 }
0x1bc8   : > { %v3626_v1 = vadd.f32 1e-12, %v3625_v63  ;;  %v5767_v63 = vld [vmem:[#allocation36 + $0x50] sm:$0xff] (!%p5039_p3)  }
0x1bca   : > { %5750 = vrcp.f32 %v3626_v1  ;;  %v5768_v1 = vld [vmem:[#allocation36 + $0x10] sm:$0xff] (!%p5039_p3)  }
0x1bd4   : > { %v5751_v3 = vpop.eup %5750 }
0x1bd5   : > { %v3628_v6 = vmul.f32 %v5751_v3, %v3613_v53  ;;  %v3852_v53 = vrot.slane (!%p5039_p3), %v3851_v52, 4  ;;  %v5769_v3 = vld [vmem:[#allocation36 + $0x58] sm:$0xff] (!%p5039_p3)  }
0x1bd7   : > { %v3635_v2 = vmul.f32 %v5025_v4, %v3628_v6  ;;  %v3853_v54 = vadd.f32 (!%p5039_p3), %v3852_v53, %v3851_v52  ;;  %v5770_v4 = vld [vmem:[#allocation36 + $0x18] sm:$0xff] (!%p5039_p3)   ;;  %v5771_v6 = vld [vmem:[#allocation36 + $0x60] sm:$0xff] (!%p5039_p3)  }
0x1bd9   : > { %v3642_v5 = vadd.f32 %v5026_v8, %v3635_v2  ;;  %v3854_v55 = vrot.slane (!%p5039_p3), %v3853_v54, 2  ;;  %v5772_v8 = vld [vmem:[#allocation36 + $0x20] sm:$0xff] (!%p5039_p3)   ;;  %v5773_v2 = vld [vmem:[#allocation36 + $0x68] sm:$0xff] (!%p5039_p3)  }
0x1bdb   : > { %v3643_v9 = vpack.c.bf16 %v3642_v5, %v3642_v5  ;;  %v3855_v56 = vadd.f32 (!%p5039_p3), %v3854_v55, %v3853_v54  ;;  %v5783_v55 = vld [vmem:[#allocation42] sm:$0xff] (!%p5039_p3)  }
0x1bdd   : > { %5358 = vmatmul.mubr.msk.bf16.vlgmr.msra.gmra.mrb[56].mxu1 %vm2078_vm3, %v3643_v9  ;;  %v3856_v57 = vrot.slane (!%p5039_p3), %v3855_v56, 1  ;;  %v3840_v9 = vpop.permute.xlu0 (!%p5039_p3), %3839 }
0x1bde   : > { %5148 = vmatpush3.bf16.msra.mxu1 (!%p5039_p3), %v5764_v61 }
0x1bdf   : > { %v3857_v12 = vadd.f32 (!%p5039_p3), %v3856_v57, %v3855_v56  ;;  %5149 = vmatprep.subr.bf16.mxu1 (!%p5039_p3), %v5765_v62  ;;  %v5784_v57 = vld [vmem:[#allocation42 + $0x8] sm:$0xff] (!%p5039_p3)  }
0x1be1   : > { %3860 = vperm.xlu0 (!%p5039_p3), %5756, %v3857_v12   ;;  %v4129_v12 = vld [vmem:[#allocation41] sm:$0x1] (!%p5039_p3) }
0x1be2   : > { %5150 = vmatpush3.bf16.msra.mxu1 (!%p5039_p3), %v5766_v0  ;;  %v4203_v0 = vld [vmem:[#allocation44] sm:$0x1] (!%p5039_p3) }
0x1be3   : > { %5151 = vmatprep.subr.bf16.mxu1 (!%p5039_p3), %v5767_v63 }
0x1be6   : > { %5152 = vmatpush3.bf16.msra.mxu1 (!%p5039_p3), %v5768_v1 }
0x1be7   : > { %5153 = vmatprep.subr.bf16.mxu1 (!%p5039_p3), %v5769_v3 }
0x1bea   : > { %5154 = vmatpush3.bf16.msra.mxu1 (!%p5039_p3), %v5770_v4 }
0x1beb   : > { %5155 = vmatprep.subr.bf16.mxu1 (!%p5039_p3), %v5771_v6 }
0x1bee   : > { %5156 = vmatpush3.bf16.msra.mxu1 (!%p5039_p3), %v5772_v8 }
0x1bef   : > { %5157 = vmatprep.subr.bf16.mxu1 (!%p5039_p3), %v5773_v2 }
0x1cb0   : > { %v3704_v14 = vpop.f32.mrb[56].mxu1 }
0x1cb1   : > { %v3705_v15 = vadd.f32 %v5027_v13, %v3704_v14  ;;  %v5359_v16 = vpop.f32.mrb[57].mxu1 }
0x1cb2   : > { %v3707_v17 = vpop.f32.mrb[58].mxu1  ;;  %v3861_v16 = vpop.permute.xlu0 (!%p5039_p3), %3860 }
0x1cb3   : > { %v3710_v18 = vmax.f32 %v3705_v15, 0.0  ;;  %v5360_v21 = vpop.f32.mrb[59].mxu1 }
0x1cb5   : > { %v3711_v23 = vpack.c.bf16 %v3710_v18, %v3710_v18 }
0x1cb7   : > { %5370 = vmatmul.mubr.msk.bf16.vlgmr.msra.gmra.mrb[52].mxu0 %vm3751_vm10, %v3711_v23 }
0x1cb8   : > { %3937 = vmatprep.mubr.bf16.mxu0 (!%p5039_p3), %v7069_v51  ;;  %3906 = vmatpush1.bf16.msra.mxu0 (!%p5039_p3), %v5759_v58 }
0x1cb9   : > { %3907 = vmatprep.subr.bf16.mxu0 (!%p5039_p3), %v5760_v59 }
0x1cbc   : > { %3908 = vmatpush1.bf16.msra.mxu0 (!%p5039_p3), %v5762_v60 }
0x1d8a   : > { %v3789_v36 = vpop.f32.mrb[52].mxu0 }
0x1d8b   : > { %v3790_v25 = vadd.f32 %v5031_v24, %v3789_v36  ;;  %v5371_v26 = vpop.f32.mrb[53].mxu0 }
0x1d8c   : > { %v3792_v20 = vpop.f32.mrb[54].mxu0  ;;  %v5776_v26 = vld [vmem:[#allocation36 + $0x30] sm:$0xff] (!%p5039_p3)  }
0x1d8d   : > { %v5372_v27 = vpop.f32.mrb[55].mxu0  ;;  %v3795_v38 = vadd.f32 %v3790_v25, %v3642_v5  ;;  %v5774_v5 = vld [vmem:[#allocation36 + $0x28] sm:$0xff] (!%p5039_p3)   ;;  %v5775_v25 = vld [vmem:[#allocation36 + $0x70] sm:$0xff] (!%p5039_p3)   ;;  %v5777_v20 = vld [vmem:[#allocation36 + $0x78] sm:$0xff] (!%p5039_p3)  }
0x1d8e   : > { %5158 = vmatpush3.bf16.msra.mxu1 (!%p5039_p3), %v5774_v5  ;;  %v5778_v27 = vld [vmem:[#allocation36 + $0x38] sm:$0xff] (!%p5039_p3)  }
0x1d8f   : > { %v3798_v28 = vsel %vm2078_vm3, %v3795_v38, 0.0  ;;  %5159 = vmatprep.subr.bf16.mxu1 (!%p5039_p3), %v5775_v25 }
0x1d90   : > { %3799 = vadd.xlane.f32.xlu1 %v3798_v28  ;;  %v7070_v28 = vmov (!%p5039_p3), 0.0  }
0x1d91   : > { %5373 = vmatprep.subr.bf16.mxu0 (!%p5039_p3), %v7070_v28 }
0x1d92   : > { %5160 = vmatpush3.bf16.msra.mxu1 (!%p5039_p3), %v5776_v26 }
0x1d93   : > { %5161 = vmatprep.subr.bf16.mxu1 (!%p5039_p3), %v5777_v20 }
0x1d96   : > { %5162 = vmatpush3.bf16.msra.mxu1 (!%p5039_p3), %v5778_v27 }
0x1e1d   : > { %v3800_v31 = vpop.xlane.xlu1 %3799 }
0x1e1e   : > { %v3801_v32 = vmul.f32 0.03125, %v3800_v31  ;;  %v5780_v31 = vld [vmem:[#allocation39 + $0x8] sm:$0xff] (!%p5039_p3)  }
0x1e20   : > { %v3802_v19 = vsub.f32 %v3795_v38, %v3801_v32  ;;  %v5779_v38 = vld [vmem:[#allocation39] sm:$0xff] (!%p5039_p3)   ;;  %v3870_v32 = vld [vmem:[#allocation35] sm:$0x3] (!%p5039_p3) }
0x1e22   : > { %v3803_v33 = vmul.f32 %v3802_v19, %v3802_v19 }
0x1e24   : > { %v3804_v34 = vsel %vm2078_vm3, %v3803_v33, 0.0  ;;  %v3895_v33 = vrot.slane (!%p5039_p3), %v3870_v32, %v3007_v29  ;;  %v3982_v29 = vld [vmem:[#allocation38] sm:$0x1] (!%p5039_p3) }
0x1e25   : > { %3805 = vadd.xlane.f32.xlu1 %v3804_v34 }
0x1eb2   : > { %v3806_v37 = vpop.xlane.xlu1 %3805 }
0x1eb3   : > { %v3807_v39 = vmul.f32 0.032258064, %v3806_v37 }
0x1eb5   : > { %5752 = vrsqrt.f32 %v3807_v39  ;;  %vm3810_vm11 = vcmp.eq.f32.partialorder %v3807_v39, inf  ;;  %v3813_v42 = vand.u32 2147483648, %v3807_v39  ;;  %vm3812_vm12 = vcmp.eq.f32.partialorder %v3807_v39, 0.0 }
0x1ebf   : > { %v5753_v40 = vpop.eup %5752 }
0x1ec0   : > { %v3809_v41 = vmul.f32 %v5753_v40, %v3807_v39 }
0x1ec2   : > { %v3811_v43 = vsel %vm3810_vm11, %v3807_v39, %v3809_v41 }
0x1ec3   : > { %v3814_v44 = vsel %vm3812_vm12, %v3813_v42, %v3811_v43 }
0x1ec4   : > { %v3815_v45 = vadd.f32 1e-12, %v3814_v44 }
0x1ec6   : > { %5754 = vrcp.f32 %v3815_v45 }
0x1ec7   : > { %5785 = vrcp.f32 (!%p5039_p3), %v3861_v16 }
0x1ed0   : > { %v5755_v46 = vpop.eup %5754 }
0x1ed1   : > { %v3817_v48 = vmul.f32 %v5755_v46, %v3802_v19  ;;  %3836 = sbr.rel (%p5039_p3) target bundleno = 8788 (0x2254), region = 300  ;;  %v5786_v23 = vpop.eup (!%p5039_p3), %5785  ;;  %v3898_v19 = vsub.s32 (!%p5039_p3), 1, %v8497_v35 }
0x1ed3   : > { %v3824_v50 = vmul.f32 %v5037_v47, %v3817_v48  ;;  %v3899_v34 = vrot.slane (!%p5039_p3), %v3870_v32, %v3898_v19  ;;  %v5781_v48 = vld [vmem:[#allocation39 + $0x10] sm:$0xff] (!%p5039_p3)  }
0x1ed5   : > { %v3831_v7 = vadd.f32 %v5038_v49, %v3824_v50  ;;  %v5782_v49 = vld [vmem:[#allocation39 + $0x18] sm:$0xff] (!%p5039_p3)  }
0x1ed7   : > { %3832 = vst.msk [vmem:[#allocation2] sm:$0xff] %vm2078_vm3, %v3831_v7  ;;  %v3842_v10 = vmul.f32 (!%p5039_p3), %v3840_v9, %v3831_v7 }
0x1ed9   : > { %v3843_v11 = vsel %vm2078_vm3, %v3842_v10, 0.0 }
0x1eda   : > { %v3844_v13 = vrot.slane %v3843_v11, 4 }
0x1edc   : > { %v3845_v14 = vadd.f32 %v3844_v13, %v3843_v11 }
0x1ede   : > { %v3846_v15 = vrot.slane %v3845_v14, 2 }
0x1ee0   : > { %v3847_v17 = vadd.f32 %v3846_v15, %v3845_v14 }
0x1ee2   : > { %v3848_v18 = vrot.slane %v3847_v17, 1 }
0x1ee4   : > { %v3849_v21 = vadd.f32 %v3848_v18, %v3847_v17 }
0x1ee6   : > { %v3864_v24 = vmul.f32 %v5786_v23, %v3849_v21 }
0x1ee8   : > { %v3865_v36 = vpack.c.bf16 %v3864_v24, %v3864_v24 }
0x1eea   : > { %5044 = vmatmul.mubr.msk.bf16.vlgmr.msra.gmra.mrb[0].mxu0 %vm2078_vm3, %v3865_v36 }
0x1eeb   : > { %5374 = vmatpush3.bf16.msra.mxu0 %v5779_v38  ;;  %5381 = vmatprep.mubr.msk.bf16.mxu0 %vm7071_vm14, %v7070_v28 }
0x1eec   : > { %5375 = vmatprep.subr.bf16.mxu0 %v7070_v28 }
0x1eef   : > { %5376 = vmatpush3.bf16.msra.mxu0 %v5780_v31 }
0x1ef0   : > { %5377 = vmatprep.subr.bf16.mxu0 %v7070_v28 }
0x1ef3   : > { %5378 = vmatpush3.bf16.msra.mxu0 %v5781_v48 }
0x1ef4   : > { %5379 = vmatprep.subr.bf16.mxu0 %v7070_v28 }
0x1ef7   : > { %5380 = vmatpush3.bf16.msra.mxu0 %v5782_v49 }
0x1ef8   : > { %5385 = vmatprep.subr.bf16.mxu0 %v7070_v28 }
0x1fbd   : > { %v3939_v37 = vpop.f32.mrb[0].mxu0 }
0x1fbe   : > { %v3940_v39 = vadd.f32 %v3939_v37, %v3895_v33  ;;  %v3941_v40 = vpop.f32.mrb[1].mxu0 }
0x1fbf   : > { %v3942_v41 = vadd.f32 %v3941_v40, %v3899_v34  ;;  %v3943_v42 = vpop.f32.mrb[2].mxu0 }
0x1fc0   : > { %v3946_v43 = vmax.f32 %v3940_v39, 0.0  ;;  %v3944_v44 = vpop.f32.mrb[3].mxu0 }
0x1fc1   : > { %v3947_v45 = vmax.f32 %v3942_v41, 0.0 }
0x1fc2   : > { %v3948_v47 = vpack.c.bf16 %v3946_v43, %v3946_v43 }
0x1fc3   : > { %v3949_v46 = vpack.c.bf16 %v3947_v45, %v3947_v45 }
0x1fc5   : > { %4111 = vmatprep.mubr.bf16.mxu1 %v3949_v46 }
0x1fc6   : > { %4112 = vmatmul.mubr.bf16.vlgmr.msra.gmra.mrb[0].mxu1 %v3948_v47 }
0x2099   : > { %v5163_v35 = vpop.f32.mrb[0].mxu1 }
0x209a   : > { %v5164_v50 = vpop.f32.mrb[1].mxu1 }
0x209b   : > { %v5165_v7 = vadd.f32 %v5164_v50, %v5163_v35  ;;  %v5166_v51 = vpop.f32.mrb[2].mxu1 }
0x209c   : > { %v5167_v52 = vpop.f32.mrb[3].mxu1 }
0x209d   : > { %v4114_v53 = vadd.f32 %v5165_v7, %v3982_v29 }
0x209f   : > { %v4119_v54 = vmax.f32 %v4114_v53, 0.0 }
0x20a1   : > { %v4120_v56 = vpack.c.bf16 %v4119_v54, %v4119_v54 }
0x20a3   : > { %5382 = vmatmul.mubr.msk.bf16.vlgmr.msra.gmra.mrb[4].mxu0 %vm3751_vm10, %v4120_v56 }
0x20a4   : > { %5386 = vmatpush3.bf16.msra.mxu0 %v5783_v55  ;;  %5389 = vmatprep.mubr.msk.bf16.mxu0 %vm7071_vm14, %v7070_v28 }
0x20a5   : > { %5387 = vmatprep.subr.bf16.mxu0 %v7070_v28 }
0x20a8   : > { %5388 = vmatpush3.bf16.msra.mxu0 %v5784_v57 }
0x2176   : > { %v4191_v30 = vpop.f32.mrb[4].mxu0 }
0x2177   : > { %v4192_v58 = vadd.f32 %v4191_v30, %v4129_v12  ;;  %v5383_v59 = vpop.f32.mrb[5].mxu0 }
0x2178   : > { %v4194_v60 = vpop.f32.mrb[6].mxu0 }
0x2179   : > { %v4197_v22 = vmax.f32 %v4192_v58, 0.0  ;;  %v5384_v61 = vpop.f32.mrb[7].mxu0 }
0x217b   : > { %v4198_v62 = vpack.c.bf16 %v4197_v22, %v4197_v22 }
0x217d   : > { %5390 = vmatmul.mubr.msk.bf16.vlgmr.msra.gmra.mrb[8].mxu0 %vm2078_vm3, %v4198_v62 }
0x2250   : > { %v4253_v63 = vpop.f32.mrb[8].mxu0 }
0x2251   : > { %v4254_v1 = vadd.f32 %v4253_v63, %v4203_v0  ;;  %v5391_v3 = vpop.f32.mrb[9].mxu0 }
0x2252   : > { %v4256_v4 = vpop.f32.mrb[10].mxu0 }
0x2253   : > { %4259 = vst [vmem:[%s1969_s8] sm:$0x1] %v4254_v1  ;;  %v5392_v6 = vpop.f32.mrb[11].mxu0 }
0x2254 PF: > { %s8927_s23 = sld [smem:[#allocation115_spill]]  ;;  %s8928_s26 = sld [smem:[#allocation111_spill]] }
0x2255   : > { %s8930_s2 = sld [smem:[#allocation123_spill]]  ;;  %s4273_s6 = sshll.u32 %s1969_s8, 4  ;;  %s4274_s6 = int_to_ptr.vmem [resolvable:$true] %s4273_s6 }
0x2256   : > { %s4261_s3 = scalar_lea.sflag [#allocation5], %s8084_s28  ;;  %s6739_s0 = scalar_lea.vmem %s4274_s6, 16 }
0x2257   : > { %p6740_p5 = scmp.ne.s32.totalorder %s4274_s6, %s6739_s0  ;;  %s7072_s4 = smov [#allocation45]  }
0x2258   : > { %s6743_s11 = sshll.u32 %s7072_s4, 4  ;;  %s6744_s11 = int_to_ptr.vmem [resolvable:$false] %s6743_s11 }
0x2259   : > { %s6745_s21 = scalar_lea.vmem %s6744_s11, 32  ;;  %p6746_p7 = scmp.lt.s32.totalorder %s4274_s6, %s6744_s11 }
0x225a   : > { %s8929_s9 = smov %s8928_s26  ;;  %s5069_s15 = sshll.u32 %s8927_s23, 4 }
0x225b   : > { %s8638_s10 = scalar_lea.hbm %s8928_s26, %s5069_s15  ;;  %p8931_p8 = scmp.ne.s32.totalorder %s8930_s2, 0 }
0x225c   : > { %p6747_p2 = scmp.lt.s32.totalorder %s6745_s21, %s6739_s0 }
0x225d   : > { %p6741_p6 = pnand %p6740_p5, %p8931_p8 }
0x225e   : > { %p6748_p9 = por %p6747_p2, %p6746_p7 }
0x225f   : > { %p6742_p4 = pneg %p6741_p6 }
0x2261   : > { %p6749_p13 = pnand %p6748_p9, %p6742_p4 }
0x2263   : > { %6752 = shalt.err (!%p6749_p13)
}
0x2264   : > { %s6753_s28 = scalar_lea.hbm %s8638_s10, 16  ;;  %s6757_s8 = scalar_lea.hbm %s8929_s9, 32 }
0x2265   : > { %p6754_p0 = scmp.ne.s32.totalorder %s8638_s10, %s6753_s28  ;;  %p6758_p11 = scmp.lt.u32.totalorder %s8638_s10, %s8929_s9 }
0x2266   : > { %p6759_p1 = scmp.lt.u32.totalorder %s6757_s8, %s6753_s28  ;;  %p6761_p5 = scmp.lt.u32.totalorder %s6753_s28, %s8638_s10 }
0x2267   : > { %p6755_p10 = pnand %p6754_p0, %p8931_p8 }
0x2268   : > { %p6760_p3 = por %p6759_p1, %p6758_p11 }
0x2269   : > { %p6756_p12 = pneg %p6755_p10 }
0x226a   : > { %p6762_p6 = por %p6761_p5, %p6760_p3 }
0x226c   : > { %p6763_p4 = pnand %p6762_p6, %p6756_p12 }
0x226e   : > { %6766 = shalt.err (!%p6763_p4)
}
0x226f   : > { %5481 = dma.vmem_to_hbm [thread:$0]  (%p8931_p8), %s4274_s6, 16, %s8638_s10, %s4261_s3  }
0x2270 PF: > { %s8932_s12 = sld [smem:[#allocation112_spill]]  ;;  %s8933_s17 = sld [smem:[#allocation124_spill]] }
0x2271   : > { %p5538_p7 = scmp.ge.s32.totalorder %s6977_s7, 2 }
0x2276   : > { %s4285_s5 = sand.u32 1, %s8932_s12   ;;  %p8934_p2 = scmp.ne.s32.totalorder %s8933_s17, 0 }
0x2277   : > { %s4286_s1 = scalar_lea.sflag [#allocation5], %s4285_s5 }
0x2278   : > { %p5515_p9 = pnand %p5538_p7, %p8934_p2 }
0x227a   : > { %6932 = dma.done.wait (!%p5515_p9), %s4286_s1, 16  }
0x227b   : > { %6934 = vsyncadd (!%p5515_p9), %s4286_s1, 4294967280  ;;  %s95_s7 = sadd.s32 1, %s6977_s7   ;;  %s8935_s13 = sld [smem:[#allocation121_spill]] }
0x227c   : > { %p92_p13 = scmp.ge.s32.totalorder %s95_s7, 6   ;;  %s8936_s19 = sld [smem:[#allocation113_spill]] }
0x227d   : > { %s8937_s23 = sld [smem:[#allocation122_spill]]  ;;  %s8938_s26 = sld [smem:[#allocation116_spill]] }
0x227e   : > { %s8939_s28 = sld [smem:[#allocation117_spill]]  ;;  %s8940_s1 = sld [smem:[#allocation118_spill]] }
0x227f   : > { %s8941_s2 = sld [smem:[#allocation120_spill]]  ;;  %s8942_s15 = smov %s6941_s16 }
0x2280   : > { %s8943_s16 = smov %s6945_s18  ;;  %s8945_s0 = smov %s6953_s22 }
0x2281   : > { %s8944_s18 = smov %s8935_s13  ;;  %94 = sbr.rel (!%p92_p13) target bundleno = 95 (0x5f), region = 540 }
0x2282   : > { %s8946_s22 = smov %s8936_s19 }
0x2288   :  { %4290 = vsyncpa [#allocation4], 1 }
0x2289   :  { %4292 = vsyncpa [#allocation4 + $0x1], 1 }
0x228a   :  { %4293 = vsyncpa [#allocation7], 1 }
0x228b   :  { %4295 = vsyncpa [#allocation7 + $0x1], 1 }
0x228c   :  { %4296 = vsyncpa [#allocation10], 1 }
0x228d   :  { %4298 = vsyncpa [#allocation10 + $0x1], 1 }
0x228e   :  { %4299 = vsyncpa [#allocation13], 1 }
0x228f   :  { %4300 = vsyncpa [#allocation37], 1 }
0x2290   :  { %4301 = vsyncpa [#allocation40], 1 }
0x2291   :  { %4302 = vsyncpa [#allocation43], 1 }
0x2292   :  { %4303 = vsyncpa [#allocation5], 1 }
0x2293   :  { %4305 = vsyncpa [#allocation5 + $0x1], 1 }

</bundles_post_ra>
